<compile_context>
chip_gen: v7x
topology: tpu7x:2x2x1
jax: 0.10.0
libtpu: 0.0.40
codegen_flags: <defaults>
</compile_context>

<pallas_src>
import math

import jax
import jax.numpy as jnp
from jax.experimental import pallas as pl
from jax.experimental.pallas import tpu as pltpu

BETA = 1.0
LOSS_WEIGHT = 1.0
SIGMA_REPGT = 0.9
SIGMA_REPBOX = 0.0  # sigma 0 => each positive iou contributes exactly `iou`

_STATS = 128  # lane-dense per-row-block stats slab (only lanes 0..4 used)


def _round_up(x, m):
    return ((x + m - 1) // m) * m


def _pick_tiles(n_pad):
    """Generation-aware tile / VMEM-limit selection.

    Conservative default (safe on v7x, 64 MiB VMEM per TC): tm=128, tc<=2048,
    scoped VMEM limit 48 MiB (~16 live (tm,tc) f32 temporaries + 2 (tm,tc)
    accumulators ~= 20 MiB).  When the chip reports >=100 MiB of VMEM
    (v5e / v6e, 128 MiB physical) use tm=256 and a 96 MiB limit; on v5e this
    also raises the 16 MiB default scoped limit explicitly.
    """
    tm_max, tc_max, vmem_limit = 128, 2048, 48 << 20
    try:
        info = pltpu.get_tpu_info()
        vmem_cap = getattr(info, "vmem_capacity_bytes", None)
        if vmem_cap is not None and vmem_cap >= (100 << 20):
            tm_max, tc_max, vmem_limit = 256, 2048, 96 << 20
    except Exception:
        pass  # fall back to the conservative (v7x-safe) configuration

    # Column tile: full n_pad when it fits, else the largest multiple of 128
    # that divides n_pad and is <= tc_max (128 always divides n_pad).
    if n_pad <= tc_max:
        tc = n_pad
    else:
        tc = 128
        d = tc_max // 128
        while d >= 1:
            cand = d * 128
            if n_pad % cand == 0:
                tc = cand
                break
            d -= 1

    # Row tile: must divide n_pad; keep >=2 row blocks so the "parallel" axis
    # can be sharded across both v7x TensorCores.
    tm = tm_max
    while n_pad % tm != 0:
        tm //= 2
    if n_pad // tm < 2:
        tm = max(8, n_pad // 2)
    return tm, tc, vmem_limit


def _make_kernel(n_valid, tm, tc, n_pad):
    log1msig = math.log(1.0 - SIGMA_REPGT)
    inv_1msig = 1.0 / (1.0 - SIGMA_REPGT)

    def kernel(rows_ref, tcols_ref, out_ref, m_run, iog_run, bsum_acc, bnum_acc):
        r = pl.program_id(0)
        c = pl.program_id(1)

        # -------- per-row-block state reset (col axis is the inner loop) ----
        @pl.when(c == 0)
        def _init():
            m_run[...] = jnp.zeros_like(m_run)
            iog_run[...] = jnp.zeros_like(iog_run)
            bsum_acc[...] = jnp.zeros_like(bsum_acc)
            bnum_acc[...] = jnp.zeros_like(bnum_acc)

        rows = rows_ref[...]   # (tm, 8): [:, :4] = pred, [:, 4:] = target
        tcb = tcols_ref[...]   # (4, tc): target coords, lane-dense

        px1 = rows[:, 0:1]; py1 = rows[:, 1:2]; px2 = rows[:, 2:3]; py2 = rows[:, 3:4]
        jx1 = rows[:, 4:5]; jy1 = rows[:, 5:6]; jx2 = rows[:, 6:7]; jy2 = rows[:, 7:8]
        tx1 = tcb[0:1, :];  ty1 = tcb[1:2, :];  tx2 = tcb[2:3, :];  ty2 = tcb[3:4, :]

        # global indices / validity (no (tm,tc) iota materialization)
        grow = jax.lax.broadcasted_iota(jnp.int32, (tm, 1), 0) + r * tm   # (tm,1)
        gcol = jax.lax.broadcasted_iota(jnp.int32, (1, tc), 1) + c * tc   # (1,tc)
        row_valid = grow < n_valid
        col_valid = gcol < n_valid

        # shared intersection extremes for IoU (+1) and IoG (no +1)
        xmx = jnp.maximum(px1, tx1)
        xmn = jnp.minimum(px2, tx2)
        ymx = jnp.maximum(py1, ty1)
        ymn = jnp.minimum(py2, ty2)

        iw = jnp.maximum(xmn - xmx + 1.0, 0.0)
        ih = jnp.maximum(ymn - ymx + 1.0, 0.0)
        inter = iw * ih
        an_area = (px2 - px1 + 1.0) * (py2 - py1 + 1.0)   # (tm,1)
        gt_area = (tx2 - tx1 + 1.0) * (ty2 - ty1 + 1.0)   # (1,tc)
        # EUP reciprocal instead of an N^2 VALU divide.
        overlaps = inter * pl.reciprocal(an_area + gt_area - inter, approx=True)

        # "target[j] == target[z] on all 4 coords" (exact float equality).
        same = (jx1 == tx1) & (jy1 == ty1) & (jx2 == tx2) & (jy2 == ty2)
        usable = (row_valid & col_valid) & jnp.logical_not(same)

        ov_gt = jnp.where(usable, overlaps, 0.0)

        # -------- repbox partials: z < j, not-same, iou > 0 -----------------
        # Deferred reduction: accumulate elementwise into (tm,tc) scratch and
        # lane-reduce only once per row block in _finalize (XLU relief).
        ov_box = jnp.where(gcol < grow, ov_gt, 0.0)
        bsum_acc[...] += ov_box
        bnum_acc[...] += (ov_box > 0.0).astype(jnp.float32)

        # -------- repgt running max + IoG at first-occurrence argmax --------
        # Kept as the exact 3-pass form (matches torch.max tie-breaking).
        blk_max = jnp.max(ov_gt, axis=1, keepdims=True)                   # (tm,1)
        arg = jnp.min(jnp.where(ov_gt == blk_max, gcol, n_pad),
                      axis=1, keepdims=True)                              # (tm,1)
        onehot = gcol == arg                                              # (tm,tc)

        Iw = jnp.maximum(xmn - xmx, 0.0)
        Ih = jnp.maximum(ymn - ymx, 0.0)
        G = (tx2 - tx1) * (ty2 - ty1)                                     # (1,tc)
        # One (1,tc) EUP reciprocal replaces a (tm,tc) divide; clamp degenerate /
        # padded target boxes (reference would emit inf here).
        recip_g = pl.reciprocal(jnp.maximum(G, 1e-12), approx=True)
        iog_mat = (Iw * Ih) * recip_g
        blk_iog = jnp.sum(jnp.where(onehot, iog_mat, 0.0), axis=1, keepdims=True)

        take_new = blk_max > m_run[...]   # strict '>' keeps earliest block on ties
        iog_run[...] = jnp.where(take_new, blk_iog, iog_run[...])
        m_run[...] = jnp.where(take_new, blk_max, m_run[...])

        # -------- finalize this row block at the last column block ----------
        @pl.when(c == pl.num_programs(1) - 1)
        def _finalize():
            # smooth L1 partial (padding rows are zero in pred AND target -> 0)
            diff = jnp.abs(rows[:, 0:4] - rows[:, 4:8])
            sl = jnp.where(diff < BETA, 0.5 * diff * diff * (1.0 / BETA),
                           diff - 0.5 * BETA)
            sl_sum = jnp.sum(sl)

            iog = iog_run[...]
            active = (m_run[...] > 0.0) & row_valid
            safe_iog = jnp.minimum(iog, 1.0 - 1e-7)   # guard log() in unused branch
            term = jnp.where(iog > SIGMA_REPGT,
                             (iog - SIGMA_REPGT) * inv_1msig - log1msig,
                             -jnp.log(1.0 - safe_iog))
            gt_sum = jnp.sum(jnp.where(active, term, 0.0))
            gt_num = jnp.sum(active.astype(jnp.float32))
            # deferred repbox reductions happen here, once per row block
            box_sum = jnp.sum(bsum_acc[...])
            box_num = jnp.sum(bnum_acc[...])

            lane = jax.lax.broadcasted_iota(jnp.int32, (1, _STATS), 1)
            stats = (jnp.where(lane == 0, sl_sum, 0.0) +
                     jnp.where(lane == 1, gt_sum, 0.0) +
                     jnp.where(lane == 2, gt_num, 0.0) +
                     jnp.where(lane == 3, box_sum, 0.0) +
                     jnp.where(lane == 4, box_num, 0.0))
            out_ref[...] = jnp.broadcast_to(stats, (8, _STATS))

    return kernel


def repulsion_loss(pred, target):
    """pred, target: (N, 4) float32 boxes (x1, y1, x2, y2) -> (N,) loss vector."""
    N = pred.shape[0]
    pred = pred.astype(jnp.float32)
    target = target.astype(jnp.float32)

    n_pad = _round_up(N, 128)
    tm, tc, vmem_limit = _pick_tiles(n_pad)
    n_row_blocks = n_pad // tm
    n_col_blocks = n_pad // tc

    pad = n_pad - N
    # Padded rows MUST be zero in both pred and target (smooth-L1 invariant).
    rows = jnp.pad(jnp.concatenate([pred, target], axis=1), ((0, pad), (0, 0)))  # (NP, 8)
    tcols = jnp.pad(target, ((0, pad), (0, 0))).T                                 # (4, NP)

    kernel = _make_kernel(n_valid=N, tm=tm, tc=tc, n_pad=n_pad)

    stats = pl.pallas_call(
        kernel,
        out_shape=jax.ShapeDtypeStruct((n_row_blocks * 8, _STATS), jnp.float32),
        grid_spec=pltpu.PrefetchScalarGridSpec(
            num_scalar_prefetch=0,
            grid=(n_row_blocks, n_col_blocks),
            in_specs=[
                pl.BlockSpec((tm, 8), lambda r, c: (r, 0)),   # [pred | target] rows
                pl.BlockSpec((4, tc), lambda r, c: (0, c)),   # target^T columns
            ],
            out_specs=pl.BlockSpec((8, _STATS), lambda r, c: (r, 0)),
            scratch_shapes=[
                pltpu.VMEM((tm, 1), jnp.float32),    # running max overlap
                pltpu.VMEM((tm, 1), jnp.float32),    # IoG at running argmax
                pltpu.VMEM((tm, tc), jnp.float32),   # deferred repbox sum
                pltpu.VMEM((tm, tc), jnp.float32),   # deferred repbox count
            ],
        ),
        compiler_params=pltpu.CompilerParams(
            dimension_semantics=("parallel", "arbitrary"),
            vmem_limit_bytes=vmem_limit),
    )(rows, tcols)

    # Final cross-row-block combine (tiny) done in plain JAX.
    per_block = stats.reshape(n_row_blocks, 8, _STATS)[:, 0, :]
    tot = jnp.sum(per_block, axis=0)
    sl_mean = tot[0] / float(N * 4)
    repgt = jnp.where(tot[2] > 0.0, tot[1] / jnp.maximum(tot[2], 1.0), 0.0)
    repbox = jnp.where(tot[4] > 0.0, tot[3] / jnp.maximum(tot[4], 1.0), 0.0)
    total = LOSS_WEIGHT * sl_mean + LOSS_WEIGHT * repgt + LOSS_WEIGHT * repbox
    return jnp.broadcast_to(total, (N,)).astype(jnp.float32)


# ------------------------- pure-JAX reference ------------------------------
def _reference(pred, target):
    N = pred.shape[0]
    diff = jnp.abs(pred - target)
    sl = jnp.where(diff < BETA, 0.5 * diff * diff / BETA, diff - 0.5 * BETA).mean()

    p = pred[:, None, :]
    t = target[None, :, :]
    iw = jnp.maximum(jnp.minimum(p[..., 2], t[..., 2]) - jnp.maximum(p[..., 0], t[..., 0]) + 1.0, 0.0)
    ih = jnp.maximum(jnp.minimum(p[..., 3], t[..., 3]) - jnp.maximum(p[..., 1], t[..., 1]) + 1.0, 0.0)
    pa = (pred[:, 2] - pred[:, 0] + 1.0) * (pred[:, 3] - pred[:, 1] + 1.0)
    ta = (target[:, 2] - target[:, 0] + 1.0) * (target[:, 3] - target[:, 1] + 1.0)
    inter = iw * ih
    ov = inter / (pa[:, None] + ta[None, :] - inter)
    same = jnp.all(target[:, None, :] == target[None, :, :], axis=-1)

    tri = jnp.arange(N)[None, :] < jnp.arange(N)[:, None]
    ovb = jnp.where(tri & ~same, ov, 0.0)
    nb = (ovb > 0).sum()
    repbox = jnp.where(nb > 0, ovb.sum() / jnp.maximum(nb, 1), 0.0)

    ovg = jnp.where(~same, ov, 0.0)
    mx = ovg.max(axis=1)
    tg = target[jnp.argmax(ovg, axis=1)]
    Iw = jnp.maximum(jnp.minimum(pred[:, 2], tg[:, 2]) - jnp.maximum(pred[:, 0], tg[:, 0]), 0.0)
    Ih = jnp.maximum(jnp.minimum(pred[:, 3], tg[:, 3]) - jnp.maximum(pred[:, 1], tg[:, 1]), 0.0)
    G = (tg[:, 2] - tg[:, 0]) * (tg[:, 3] - tg[:, 1])
    iog = Iw * Ih / G
    term = jnp.where(iog > SIGMA_REPGT,
                     (iog - SIGMA_REPGT) / (1.0 - SIGMA_REPGT) - math.log(1.0 - SIGMA_REPGT),
                     -jnp.log(jnp.maximum(1.0 - iog, 1e-12)))
    act = mx > 0
    ng = act.sum()
    repgt = jnp.where(ng > 0, jnp.where(act, term, 0.0).sum() / jnp.maximum(ng, 1), 0.0)

    total = LOSS_WEIGHT * sl + LOSS_WEIGHT * repgt + LOSS_WEIGHT * repbox
    return jnp.full((N,), total, dtype=jnp.float32)


def _make_boxes(key, n):
    """Deterministic valid boxes (x1, y1, x2, y2) with x2 > x1, y2 > y1."""
    k1, k2 = jax.random.split(key)
    xy = jax.random.uniform(k1, (n, 2), minval=0.0, maxval=64.0)
    wh = jax.random.uniform(k2, (n, 2), minval=4.0, maxval=32.0)
    return jnp.concatenate([xy, xy + wh], axis=-1).astype(jnp.float32)


def _check(n, key):
    kp, kt = jax.random.split(key)
    pred = _make_boxes(kp, n)
    target = _make_boxes(kt, n)
    loss = repulsion_loss(pred, target)
    jax.block_until_ready(loss)
    ref = _reference(pred, target)
    assert loss.shape == (n,)
    assert bool(jnp.all(jnp.isfinite(loss)))
    # Loose tolerance: the kernel uses approx EUP reciprocals (~2^-12 relative).
    assert bool(jnp.allclose(loss, ref, rtol=1e-2, atol=1e-2)), (
        n, float(loss[0]), float(ref[0]))


if __name__ == "__main__":
    key = jax.random.PRNGKey(0)
    k1, k2 = jax.random.split(key)
    # N=200: not a multiple of 128 -> exercises validity masking, 2 row blocks.
    _check(200, k1)
    # N=50: n_pad=128 -> tm shrinks to 64 so both v7x TensorCores get a block.
    _check(50, k2)
    print("KERNEL_OK")
</pallas_src>

<mosaic_0001>
module attributes {stable_mosaic.version = 11 : i64} {
  func.func @kernel(%arg0: i32, %arg1: i32, %arg2: memref<128x8xf32, #tpu.memory_space<vmem>>, %arg3: memref<4x256xf32, #tpu.memory_space<vmem>>, %arg4: memref<8x128xf32, #tpu.memory_space<vmem>>, %arg5: memref<128x1xf32, #tpu.memory_space<vmem>>, %arg6: memref<128x1xf32, #tpu.memory_space<vmem>>, %arg7: memref<128x256xf32, #tpu.memory_space<vmem>>, %arg8: memref<128x256xf32, #tpu.memory_space<vmem>>) attributes {dimension_semantics = [#tpu.dimension_semantics<parallel>, #tpu.dimension_semantics<arbitrary>], iteration_bounds = array<i64: 2, 1>, scalar_prefetch = 0 : i64, scratch_operands = 4 : i64, tpu.core_type = #tpu.core_type<tc>, window_params = [{transform_indices = @transform_0, window_bounds = array<i64: 128, 8>}, {transform_indices = @transform_1, window_bounds = array<i64: 4, 256>}, {transform_indices = @transform_2, window_bounds = array<i64: 8, 128>}]} {
    %c0_i32 = arith.constant 0 : i32
    %0 = arith.cmpi eq, %arg1, %c0_i32 : i32
    %1 = arith.extui %0 : i1 to i32
    %c0_i32_0 = arith.constant 0 : i32
    %2 = arith.cmpi ne, %1, %c0_i32_0 : i32
    scf.if %2 {
      %cst_44 = arith.constant 0.000000e+00 : f32
      %152 = vector.broadcast %cst_44 : f32 to vector<128x1xf32>
      %c0_45 = arith.constant 0 : index
      %c0_46 = arith.constant 0 : index
      %153 = vector.load %arg5[%c0_45, %c0_46] : memref<128x1xf32, #tpu.memory_space<vmem>>, vector<128x1xf32>
      tpu.vector_store %arg5[%c0_45, %c0_46], %152 {strides = array<i32>} : memref<128x1xf32, #tpu.memory_space<vmem>>, vector<128x1xf32>,
      %cst_47 = arith.constant 0.000000e+00 : f32
      %154 = vector.broadcast %cst_47 : f32 to vector<128x1xf32>
      %c0_48 = arith.constant 0 : index
      %c0_49 = arith.constant 0 : index
      %155 = vector.load %arg6[%c0_48, %c0_49] : memref<128x1xf32, #tpu.memory_space<vmem>>, vector<128x1xf32>
      tpu.vector_store %arg6[%c0_48, %c0_49], %154 {strides = array<i32>} : memref<128x1xf32, #tpu.memory_space<vmem>>, vector<128x1xf32>,
      %cst_50 = arith.constant 0.000000e+00 : f32
      %156 = vector.broadcast %cst_50 : f32 to vector<128x256xf32>
      %c0_51 = arith.constant 0 : index
      %c0_52 = arith.constant 0 : index
      %157 = vector.load %arg7[%c0_51, %c0_52] : memref<128x256xf32, #tpu.memory_space<vmem>>, vector<128x256xf32>
      tpu.vector_store %arg7[%c0_51, %c0_52], %156 {strides = array<i32>} : memref<128x256xf32, #tpu.memory_space<vmem>>, vector<128x256xf32>,
      %cst_53 = arith.constant 0.000000e+00 : f32
      %158 = vector.broadcast %cst_53 : f32 to vector<128x256xf32>
      %c0_54 = arith.constant 0 : index
      %c0_55 = arith.constant 0 : index
      %159 = vector.load %arg8[%c0_54, %c0_55] : memref<128x256xf32, #tpu.memory_space<vmem>>, vector<128x256xf32>
      tpu.vector_store %arg8[%c0_54, %c0_55], %158 {strides = array<i32>} : memref<128x256xf32, #tpu.memory_space<vmem>>, vector<128x256xf32>,
    } else {
    }
    %c0 = arith.constant 0 : index
    %c0_1 = arith.constant 0 : index
    %3 = vector.load %arg2[%c0, %c0_1] : memref<128x8xf32, #tpu.memory_space<vmem>>, vector<128x8xf32>
    %c0_2 = arith.constant 0 : index
    %c0_3 = arith.constant 0 : index
    %4 = vector.load %arg3[%c0_2, %c0_3] : memref<4x256xf32, #tpu.memory_space<vmem>>, vector<4x256xf32>
    %5 = vector.extract_strided_slice %3 {offsets = [0, 0], sizes = [128, 1], strides = [1, 1]} : vector<128x8xf32> to vector<128x1xf32>
    %6 = vector.extract_strided_slice %3 {offsets = [0, 1], sizes = [128, 1], strides = [1, 1]} : vector<128x8xf32> to vector<128x1xf32>
    %7 = vector.extract_strided_slice %3 {offsets = [0, 2], sizes = [128, 1], strides = [1, 1]} : vector<128x8xf32> to vector<128x1xf32>
    %8 = vector.extract_strided_slice %3 {offsets = [0, 3], sizes = [128, 1], strides = [1, 1]} : vector<128x8xf32> to vector<128x1xf32>
    %9 = vector.extract_strided_slice %3 {offsets = [0, 4], sizes = [128, 1], strides = [1, 1]} : vector<128x8xf32> to vector<128x1xf32>
    %10 = vector.extract_strided_slice %3 {offsets = [0, 5], sizes = [128, 1], strides = [1, 1]} : vector<128x8xf32> to vector<128x1xf32>
    %11 = vector.extract_strided_slice %3 {offsets = [0, 6], sizes = [128, 1], strides = [1, 1]} : vector<128x8xf32> to vector<128x1xf32>
    %12 = vector.extract_strided_slice %3 {offsets = [0, 7], sizes = [128, 1], strides = [1, 1]} : vector<128x8xf32> to vector<128x1xf32>
    %13 = vector.extract_strided_slice %4 {offsets = [0, 0], sizes = [1, 256], strides = [1, 1]} : vector<4x256xf32> to vector<1x256xf32>
    %14 = vector.extract_strided_slice %4 {offsets = [1, 0], sizes = [1, 256], strides = [1, 1]} : vector<4x256xf32> to vector<1x256xf32>
    %15 = vector.extract_strided_slice %4 {offsets = [2, 0], sizes = [1, 256], strides = [1, 1]} : vector<4x256xf32> to vector<1x256xf32>
    %16 = vector.extract_strided_slice %4 {offsets = [3, 0], sizes = [1, 256], strides = [1, 1]} : vector<4x256xf32> to vector<1x256xf32>
    %17 = tpu.iota {dimensions = array<i32: 0>} : vector<128x1xi32>
    %c128_i32 = arith.constant 128 : i32
    %18 = arith.muli %arg0, %c128_i32 : i32
    %19 = vector.broadcast %18 : i32 to vector<128x1xi32>
    %20 = arith.addi %17, %19 : vector<128x1xi32>
    %21 = tpu.iota {dimensions = array<i32: 1>} : vector<1x256xi32>
    %c256_i32 = arith.constant 256 : i32
    %22 = arith.muli %arg1, %c256_i32 : i32
    %23 = vector.broadcast %22 : i32 to vector<1x256xi32>
    %24 = arith.addi %21, %23 : vector<1x256xi32>
    %c200_i32 = arith.constant 200 : i32
    %25 = vector.broadcast %c200_i32 : i32 to vector<128x1xi32>
    %26 = arith.cmpi slt, %20, %25 : vector<128x1xi32>
    %c200_i32_4 = arith.constant 200 : i32
    %27 = vector.broadcast %c200_i32_4 : i32 to vector<1x256xi32>
    %28 = arith.cmpi slt, %24, %27 : vector<1x256xi32>
    %29 = vector.broadcast %5 : vector<128x1xf32> to vector<128x256xf32>
    %30 = vector.broadcast %13 : vector<1x256xf32> to vector<128x256xf32>
    %31 = arith.maximumf %29, %30 : vector<128x256xf32>
    %32 = vector.broadcast %7 : vector<128x1xf32> to vector<128x256xf32>
    %33 = vector.broadcast %15 : vector<1x256xf32> to vector<128x256xf32>
    %34 = arith.minimumf %32, %33 : vector<128x256xf32>
    %35 = vector.broadcast %6 : vector<128x1xf32> to vector<128x256xf32>
    %36 = vector.broadcast %14 : vector<1x256xf32> to vector<128x256xf32>
    %37 = arith.maximumf %35, %36 : vector<128x256xf32>
    %38 = vector.broadcast %8 : vector<128x1xf32> to vector<128x256xf32>
    %39 = vector.broadcast %16 : vector<1x256xf32> to vector<128x256xf32>
    %40 = arith.minimumf %38, %39 : vector<128x256xf32>
    %41 = arith.subf %34, %31 : vector<128x256xf32>
    %cst = arith.constant 1.000000e+00 : f32
    %42 = vector.broadcast %cst : f32 to vector<128x256xf32>
    %43 = arith.addf %41, %42 : vector<128x256xf32>
    %cst_5 = arith.constant 0.000000e+00 : f32
    %44 = vector.broadcast %cst_5 : f32 to vector<128x256xf32>
    %45 = arith.maximumf %43, %44 : vector<128x256xf32>
    %46 = arith.subf %40, %37 : vector<128x256xf32>
    %cst_6 = arith.constant 1.000000e+00 : f32
    %47 = vector.broadcast %cst_6 : f32 to vector<128x256xf32>
    %48 = arith.addf %46, %47 : vector<128x256xf32>
    %cst_7 = arith.constant 0.000000e+00 : f32
    %49 = vector.broadcast %cst_7 : f32 to vector<128x256xf32>
    %50 = arith.maximumf %48, %49 : vector<128x256xf32>
    %51 = arith.mulf %45, %50 : vector<128x256xf32>
    %52 = arith.subf %7, %5 : vector<128x1xf32>
    %cst_8 = arith.constant 1.000000e+00 : f32
    %53 = vector.broadcast %cst_8 : f32 to vector<128x1xf32>
    %54 = arith.addf %52, %53 : vector<128x1xf32>
    %55 = arith.subf %8, %6 : vector<128x1xf32>
    %cst_9 = arith.constant 1.000000e+00 : f32
    %56 = vector.broadcast %cst_9 : f32 to vector<128x1xf32>
    %57 = arith.addf %55, %56 : vector<128x1xf32>
    %58 = arith.mulf %54, %57 : vector<128x1xf32>
    %59 = arith.subf %15, %13 : vector<1x256xf32>
    %cst_10 = arith.constant 1.000000e+00 : f32
    %60 = vector.broadcast %cst_10 : f32 to vector<1x256xf32>
    %61 = arith.addf %59, %60 : vector<1x256xf32>
    %62 = arith.subf %16, %14 : vector<1x256xf32>
    %cst_11 = arith.constant 1.000000e+00 : f32
    %63 = vector.broadcast %cst_11 : f32 to vector<1x256xf32>
    %64 = arith.addf %62, %63 : vector<1x256xf32>
    %65 = arith.mulf %61, %64 : vector<1x256xf32>
    %66 = vector.broadcast %58 : vector<128x1xf32> to vector<128x256xf32>
    %67 = vector.broadcast %65 : vector<1x256xf32> to vector<128x256xf32>
    %68 = arith.addf %66, %67 : vector<128x256xf32>
    %69 = arith.subf %68, %51 : vector<128x256xf32>
    %70 = tpu.reciprocal %69 {approx = true} : vector<128x256xf32> -> vector<128x256xf32>
    %71 = arith.mulf %51, %70 : vector<128x256xf32>
    %72 = vector.broadcast %9 : vector<128x1xf32> to vector<128x256xf32>
    %73 = vector.broadcast %13 : vector<1x256xf32> to vector<128x256xf32>
    %74 = arith.cmpf oeq, %72, %73 : vector<128x256xf32>
    %75 = vector.broadcast %10 : vector<128x1xf32> to vector<128x256xf32>
    %76 = vector.broadcast %14 : vector<1x256xf32> to vector<128x256xf32>
    %77 = arith.cmpf oeq, %75, %76 : vector<128x256xf32>
    %78 = arith.andi %74, %77 : vector<128x256xi1>
    %79 = vector.broadcast %11 : vector<128x1xf32> to vector<128x256xf32>
    %80 = vector.broadcast %15 : vector<1x256xf32> to vector<128x256xf32>
    %81 = arith.cmpf oeq, %79, %80 : vector<128x256xf32>
    %82 = arith.andi %78, %81 : vector<128x256xi1>
    %83 = vector.broadcast %12 : vector<128x1xf32> to vector<128x256xf32>
    %84 = vector.broadcast %16 : vector<1x256xf32> to vector<128x256xf32>
    %85 = arith.cmpf oeq, %83, %84 : vector<128x256xf32>
    %86 = arith.andi %82, %85 : vector<128x256xi1>
    %87 = vector.broadcast %26 : vector<128x1xi1> to vector<128x256xi1>
    %88 = vector.broadcast %28 : vector<1x256xi1> to vector<128x256xi1>
    %89 = arith.andi %87, %88 : vector<128x256xi1>
    %cst_12 = arith.constant dense<true> : vector<128x256xi1>
    %90 = arith.xori %86, %cst_12 : vector<128x256xi1>
    %91 = arith.andi %89, %90 : vector<128x256xi1>
    %cst_13 = arith.constant 0.000000e+00 : f32
    %92 = vector.broadcast %cst_13 : f32 to vector<128x256xf32>
    %93 = arith.select %91, %71, %92 : vector<128x256xi1>, vector<128x256xf32>
    %94 = vector.broadcast %24 : vector<1x256xi32> to vector<128x256xi32>
    %95 = vector.broadcast %20 : vector<128x1xi32> to vector<128x256xi32>
    %96 = arith.cmpi slt, %94, %95 : vector<128x256xi32>
    %cst_14 = arith.constant 0.000000e+00 : f32
    %97 = vector.broadcast %cst_14 : f32 to vector<128x256xf32>
    %98 = arith.select %96, %93, %97 : vector<128x256xi1>, vector<128x256xf32>
    %c0_15 = arith.constant 0 : index
    %c0_16 = arith.constant 0 : index
    %99 = vector.load %arg7[%c0_15, %c0_16] : memref<128x256xf32, #tpu.memory_space<vmem>>, vector<128x256xf32>
    %100 = arith.addf %99, %98 : vector<128x256xf32>
    %c0_17 = arith.constant 0 : index
    %c0_18 = arith.constant 0 : index
    %101 = vector.load %arg7[%c0_17, %c0_18] : memref<128x256xf32, #tpu.memory_space<vmem>>, vector<128x256xf32>
    tpu.vector_store %arg7[%c0_17, %c0_18], %100 {strides = array<i32>} : memref<128x256xf32, #tpu.memory_space<vmem>>, vector<128x256xf32>,
    %c0_19 = arith.constant 0 : index
    %c0_20 = arith.constant 0 : index
    %102 = vector.load %arg8[%c0_19, %c0_20] : memref<128x256xf32, #tpu.memory_space<vmem>>, vector<128x256xf32>
    %cst_21 = arith.constant 0.000000e+00 : f32
    %103 = vector.broadcast %cst_21 : f32 to vector<128x256xf32>
    %104 = arith.cmpf ogt, %98, %103 : vector<128x256xf32>
    %105 = arith.extui %104 : vector<128x256xi1> to vector<128x256xi32>
    %106 = arith.sitofp %105 : vector<128x256xi32> to vector<128x256xf32>
    %107 = arith.addf %102, %106 : vector<128x256xf32>
    %c0_22 = arith.constant 0 : index
    %c0_23 = arith.constant 0 : index
    %108 = vector.load %arg8[%c0_22, %c0_23] : memref<128x256xf32, #tpu.memory_space<vmem>>, vector<128x256xf32>
    tpu.vector_store %arg8[%c0_22, %c0_23], %107 {strides = array<i32>} : memref<128x256xf32, #tpu.memory_space<vmem>>, vector<128x256xf32>,
    %cst_24 = arith.constant dense<0xFF800000> : vector<128xf32>
    %109 = vector.multi_reduction <maximumf>, %93, %cst_24 [1] : vector<128x256xf32> to vector<128xf32>
    %110 = vector.shape_cast %109 : vector<128xf32> to vector<128x1xf32>
    %111 = vector.broadcast %110 : vector<128x1xf32> to vector<128x256xf32>
    %112 = arith.cmpf oeq, %93, %111 : vector<128x256xf32>
    %c256_i32_25 = arith.constant 256 : i32
    %113 = vector.shape_cast %24 : vector<1x256xi32> to vector<1x256xi32>
    %114 = vector.broadcast %113 : vector<1x256xi32> to vector<128x256xi32>
    %115 = vector.broadcast %c256_i32_25 : i32 to vector<128x256xi32>
    %116 = arith.select %112, %114, %115 : vector<128x256xi1>, vector<128x256xi32>
    %cst_26 = arith.constant dense<2147483647> : vector<128xi32>
    %117 = vector.multi_reduction <minsi>, %116, %cst_26 [1] : vector<128x256xi32> to vector<128xi32>
    %118 = vector.shape_cast %117 : vector<128xi32> to vector<128x1xi32>
    %119 = vector.broadcast %24 : vector<1x256xi32> to vector<128x256xi32>
    %120 = vector.broadcast %118 : vector<128x1xi32> to vector<128x256xi32>
    %121 = arith.cmpi eq, %119, %120 : vector<128x256xi32>
    %122 = arith.subf %34, %31 : vector<128x256xf32>
    %cst_27 = arith.constant 0.000000e+00 : f32
    %123 = vector.broadcast %cst_27 : f32 to vector<128x256xf32>
    %124 = arith.maximumf %122, %123 : vector<128x256xf32>
    %125 = arith.subf %40, %37 : vector<128x256xf32>
    %cst_28 = arith.constant 0.000000e+00 : f32
    %126 = vector.broadcast %cst_28 : f32 to vector<128x256xf32>
    %127 = arith.maximumf %125, %126 : vector<128x256xf32>
    %128 = arith.subf %15, %13 : vector<1x256xf32>
    %129 = arith.subf %16, %14 : vector<1x256xf32>
    %130 = arith.mulf %128, %129 : vector<1x256xf32>
    %cst_29 = arith.constant 9.99999996E-13 : f32
    %131 = vector.broadcast %cst_29 : f32 to vector<1x256xf32>
    %132 = arith.maximumf %130, %131 : vector<1x256xf32>
    %133 = tpu.reciprocal %132 {approx = true} : vector<1x256xf32> -> vector<1x256xf32>
    %134 = arith.mulf %124, %127 : vector<128x256xf32>
    %135 = vector.broadcast %133 : vector<1x256xf32> to vector<128x256xf32>
    %136 = arith.mulf %134, %135 : vector<128x256xf32>
    %cst_30 = arith.constant 0.000000e+00 : f32
    %137 = vector.broadcast %cst_30 : f32 to vector<128x256xf32>
    %138 = arith.select %121, %136, %137 : vector<128x256xi1>, vector<128x256xf32>
    %cst_31 = arith.constant dense<0.000000e+00> : vector<128xf32>
    %139 = vector.multi_reduction <add>, %138, %cst_31 [1] : vector<128x256xf32> to vector<128xf32>
    %140 = vector.shape_cast %139 : vector<128xf32> to vector<128x1xf32>
    %c0_32 = arith.constant 0 : index
    %c0_33 = arith.constant 0 : index
    %141 = vector.load %arg5[%c0_32, %c0_33] : memref<128x1xf32, #tpu.memory_space<vmem>>, vector<128x1xf32>
    %142 = arith.cmpf ogt, %110, %141 : vector<128x1xf32>
    %c0_34 = arith.constant 0 : index
    %c0_35 = arith.constant 0 : index
    %143 = vector.load %arg6[%c0_34, %c0_35] : memref<128x1xf32, #tpu.memory_space<vmem>>, vector<128x1xf32>
    %144 = arith.select %142, %140, %143 : vector<128x1xi1>, vector<128x1xf32>
    %c0_36 = arith.constant 0 : index
    %c0_37 = arith.constant 0 : index
    %145 = vector.load %arg6[%c0_36, %c0_37] : memref<128x1xf32, #tpu.memory_space<vmem>>, vector<128x1xf32>
    tpu.vector_store %arg6[%c0_36, %c0_37], %144 {strides = array<i32>} : memref<128x1xf32, #tpu.memory_space<vmem>>, vector<128x1xf32>,
    %c0_38 = arith.constant 0 : index
    %c0_39 = arith.constant 0 : index
    %146 = vector.load %arg5[%c0_38, %c0_39] : memref<128x1xf32, #tpu.memory_space<vmem>>, vector<128x1xf32>
    %147 = arith.select %142, %110, %146 : vector<128x1xi1>, vector<128x1xf32>
    %c0_40 = arith.constant 0 : index
    %c0_41 = arith.constant 0 : index
    %148 = vector.load %arg5[%c0_40, %c0_41] : memref<128x1xf32, #tpu.memory_space<vmem>>, vector<128x1xf32>
    tpu.vector_store %arg5[%c0_40, %c0_41], %147 {strides = array<i32>} : memref<128x1xf32, #tpu.memory_space<vmem>>, vector<128x1xf32>,
    %c0_i32_42 = arith.constant 0 : i32
    %149 = arith.cmpi eq, %arg1, %c0_i32_42 : i32
    %150 = arith.extui %149 : i1 to i32
    %c0_i32_43 = arith.constant 0 : i32
    %151 = arith.cmpi ne, %150, %c0_i32_43 : i32
    scf.if %151 {
      %152 = vector.extract_strided_slice %3 {offsets = [0, 0], sizes = [128, 4], strides = [1, 1]} : vector<128x8xf32> to vector<128x4xf32>
      %153 = vector.extract_strided_slice %3 {offsets = [0, 4], sizes = [128, 4], strides = [1, 1]} : vector<128x8xf32> to vector<128x4xf32>
      %154 = arith.subf %152, %153 : vector<128x4xf32>
      %155 = math.absf %154 : vector<128x4xf32>
      %cst_44 = arith.constant 1.000000e+00 : f32
      %156 = vector.broadcast %cst_44 : f32 to vector<128x4xf32>
      %157 = arith.cmpf olt, %155, %156 : vector<128x4xf32>
      %cst_45 = arith.constant 5.000000e-01 : f32
      %158 = vector.broadcast %cst_45 : f32 to vector<128x4xf32>
      %159 = arith.mulf %158, %155 : vector<128x4xf32>
      %160 = arith.mulf %159, %155 : vector<128x4xf32>
      %cst_46 = arith.constant 1.000000e+00 : f32
      %161 = vector.broadcast %cst_46 : f32 to vector<128x4xf32>
      %162 = arith.mulf %160, %161 : vector<128x4xf32>
      %cst_47 = arith.constant 5.000000e-01 : f32
      %163 = vector.broadcast %cst_47 : f32 to vector<128x4xf32>
      %164 = arith.subf %155, %163 : vector<128x4xf32>
      %165 = arith.select %157, %162, %164 : vector<128x4xi1>, vector<128x4xf32>
      %166 = vector.shape_cast %165 : vector<128x4xf32> to vector<1x128x4xf32>
      %cst_48 = arith.constant dense<0.000000e+00> : vector<1xf32>
      %167 = vector.multi_reduction <add>, %166, %cst_48 [1, 2] : vector<1x128x4xf32> to vector<1xf32>
      %168 = vector.shape_cast %167 : vector<1xf32> to vector<1x1x1xf32>
      %169 = vector.extract %168[0, 0, 0] : f32 from vector<1x1x1xf32>
      %c0_49 = arith.constant 0 : index
      %c0_50 = arith.constant 0 : index
      %170 = vector.load %arg6[%c0_49, %c0_50] : memref<128x1xf32, #tpu.memory_space<vmem>>, vector<128x1xf32>
      %c0_51 = arith.constant 0 : index
      %c0_52 = arith.constant 0 : index
      %171 = vector.load %arg5[%c0_51, %c0_52] : memref<128x1xf32, #tpu.memory_space<vmem>>, vector<128x1xf32>
      %cst_53 = arith.constant 0.000000e+00 : f32
      %172 = vector.broadcast %cst_53 : f32 to vector<128x1xf32>
      %173 = arith.cmpf ogt, %171, %172 : vector<128x1xf32>
      %174 = arith.andi %173, %26 : vector<128x1xi1>
      %cst_54 = arith.constant 0.99999988 : f32
      %175 = vector.broadcast %cst_54 : f32 to vector<128x1xf32>
      %176 = arith.minimumf %170, %175 : vector<128x1xf32>
      %cst_55 = arith.constant 0.899999976 : f32
      %177 = vector.broadcast %cst_55 : f32 to vector<128x1xf32>
      %178 = arith.cmpf ogt, %170, %177 : vector<128x1xf32>
      %cst_56 = arith.constant 0.899999976 : f32
      %179 = vector.broadcast %cst_56 : f32 to vector<128x1xf32>
      %180 = arith.subf %170, %179 : vector<128x1xf32>
      %cst_57 = arith.constant 1.000000e+01 : f32
      %181 = vector.broadcast %cst_57 : f32 to vector<128x1xf32>
      %182 = arith.mulf %180, %181 : vector<128x1xf32>
      %cst_58 = arith.constant -2.30258512 : f32
      %183 = vector.broadcast %cst_58 : f32 to vector<128x1xf32>
      %184 = arith.subf %182, %183 : vector<128x1xf32>
      %cst_59 = arith.constant 1.000000e+00 : f32
      %185 = vector.broadcast %cst_59 : f32 to vector<128x1xf32>
      %186 = arith.subf %185, %176 : vector<128x1xf32>
      %187 = math.log %186 : vector<128x1xf32>
      %cst_60 = arith.constant 0.000000e+00 : f32
      %188 = vector.broadcast %cst_60 : f32 to vector<128x1xf32>
      %189 = arith.subf %188, %187 : vector<128x1xf32>
      %190 = arith.select %178, %184, %189 : vector<128x1xi1>, vector<128x1xf32>
      %cst_61 = arith.constant 0.000000e+00 : f32
      %191 = vector.broadcast %cst_61 : f32 to vector<128x1xf32>
      %192 = arith.select %174, %190, %191 : vector<128x1xi1>, vector<128x1xf32>
      %193 = vector.shape_cast %192 : vector<128x1xf32> to vector<1x128x1xf32>
      %cst_62 = arith.constant dense<0.000000e+00> : vector<1xf32>
      %194 = vector.multi_reduction <add>, %193, %cst_62 [1, 2] : vector<1x128x1xf32> to vector<1xf32>
      %195 = vector.shape_cast %194 : vector<1xf32> to vector<1x1x1xf32>
      %196 = vector.extract %195[0, 0, 0] : f32 from vector<1x1x1xf32>
      %197 = arith.extui %174 : vector<128x1xi1> to vector<128x1xi32>
      %198 = arith.sitofp %197 : vector<128x1xi32> to vector<128x1xf32>
      %199 = vector.shape_cast %198 : vector<128x1xf32> to vector<1x128x1xf32>
      %cst_63 = arith.constant dense<0.000000e+00> : vector<1xf32>
      %200 = vector.multi_reduction <add>, %199, %cst_63 [1, 2] : vector<1x128x1xf32> to vector<1xf32>
      %201 = vector.shape_cast %200 : vector<1xf32> to vector<1x1x1xf32>
      %202 = vector.extract %201[0, 0, 0] : f32 from vector<1x1x1xf32>
      %c0_64 = arith.constant 0 : index
      %c0_65 = arith.constant 0 : index
      %203 = vector.load %arg7[%c0_64, %c0_65] : memref<128x256xf32, #tpu.memory_space<vmem>>, vector<128x256xf32>
      %204 = vector.shape_cast %203 : vector<128x256xf32> to vector<1x128x256xf32>
      %cst_66 = arith.constant dense<0.000000e+00> : vector<1xf32>
      %205 = vector.multi_reduction <add>, %204, %cst_66 [1, 2] : vector<1x128x256xf32> to vector<1xf32>
      %206 = vector.shape_cast %205 : vector<1xf32> to vector<1x1x1xf32>
      %207 = vector.extract %206[0, 0, 0] : f32 from vector<1x1x1xf32>
      %c0_67 = arith.constant 0 : index
      %c0_68 = arith.constant 0 : index
      %208 = vector.load %arg8[%c0_67, %c0_68] : memref<128x256xf32, #tpu.memory_space<vmem>>, vector<128x256xf32>
      %209 = vector.shape_cast %208 : vector<128x256xf32> to vector<1x128x256xf32>
      %cst_69 = arith.constant dense<0.000000e+00> : vector<1xf32>
      %210 = vector.multi_reduction <add>, %209, %cst_69 [1, 2] : vector<1x128x256xf32> to vector<1xf32>
      %211 = vector.shape_cast %210 : vector<1xf32> to vector<1x1x1xf32>
      %212 = vector.extract %211[0, 0, 0] : f32 from vector<1x1x1xf32>
      %213 = tpu.iota {dimensions = array<i32: 1>} : vector<1x128xi32>
      %c0_i32_70 = arith.constant 0 : i32
      %214 = vector.broadcast %c0_i32_70 : i32 to vector<1x128xi32>
      %215 = arith.cmpi eq, %213, %214 : vector<1x128xi32>
      %cst_71 = arith.constant 0.000000e+00 : f32
      %216 = vector.broadcast %169 : f32 to vector<1x128xf32>
      %217 = vector.broadcast %cst_71 : f32 to vector<1x128xf32>
      %218 = arith.select %215, %216, %217 : vector<1x128xi1>, vector<1x128xf32>
      %c1_i32 = arith.constant 1 : i32
      %219 = vector.broadcast %c1_i32 : i32 to vector<1x128xi32>
      %220 = arith.cmpi eq, %213, %219 : vector<1x128xi32>
      %cst_72 = arith.constant 0.000000e+00 : f32
      %221 = vector.broadcast %196 : f32 to vector<1x128xf32>
      %222 = vector.broadcast %cst_72 : f32 to vector<1x128xf32>
      %223 = arith.select %220, %221, %222 : vector<1x128xi1>, vector<1x128xf32>
      %224 = arith.addf %218, %223 : vector<1x128xf32>
      %c2_i32 = arith.constant 2 : i32
      %225 = vector.broadcast %c2_i32 : i32 to vector<1x128xi32>
      %226 = arith.cmpi eq, %213, %225 : vector<1x128xi32>
      %cst_73 = arith.constant 0.000000e+00 : f32
      %227 = vector.broadcast %202 : f32 to vector<1x128xf32>
      %228 = vector.broadcast %cst_73 : f32 to vector<1x128xf32>
      %229 = arith.select %226, %227, %228 : vector<1x128xi1>, vector<1x128xf32>
      %230 = arith.addf %224, %229 : vector<1x128xf32>
      %c3_i32 = arith.constant 3 : i32
      %231 = vector.broadcast %c3_i32 : i32 to vector<1x128xi32>
      %232 = arith.cmpi eq, %213, %231 : vector<1x128xi32>
      %cst_74 = arith.constant 0.000000e+00 : f32
      %233 = vector.broadcast %207 : f32 to vector<1x128xf32>
      %234 = vector.broadcast %cst_74 : f32 to vector<1x128xf32>
      %235 = arith.select %232, %233, %234 : vector<1x128xi1>, vector<1x128xf32>
      %236 = arith.addf %230, %235 : vector<1x128xf32>
      %c4_i32 = arith.constant 4 : i32
      %237 = vector.broadcast %c4_i32 : i32 to vector<1x128xi32>
      %238 = arith.cmpi eq, %213, %237 : vector<1x128xi32>
      %cst_75 = arith.constant 0.000000e+00 : f32
      %239 = vector.broadcast %212 : f32 to vector<1x128xf32>
      %240 = vector.broadcast %cst_75 : f32 to vector<1x128xf32>
      %241 = arith.select %238, %239, %240 : vector<1x128xi1>, vector<1x128xf32>
      %242 = arith.addf %236, %241 : vector<1x128xf32>
      %243 = vector.shape_cast %242 : vector<1x128xf32> to vector<1x128xf32>
      %244 = vector.broadcast %243 : vector<1x128xf32> to vector<8x128xf32>
      %c0_76 = arith.constant 0 : index
      %c0_77 = arith.constant 0 : index
      %245 = vector.load %arg4[%c0_76, %c0_77] : memref<8x128xf32, #tpu.memory_space<vmem>>, vector<8x128xf32>
      tpu.vector_store %arg4[%c0_76, %c0_77], %244 {strides = array<i32>} : memref<8x128xf32, #tpu.memory_space<vmem>>, vector<8x128xf32>,
    } else {
    }
    return
  }
  func.func @transform_0(%arg0: i32, %arg1: i32) -> (i32, i32) {
    %c0_i32 = arith.constant 0 : i32
    %c0_i32_0 = arith.constant 0 : i32
    return %arg0, %c0_i32 : i32, i32
  }
  func.func @transform_1(%arg0: i32, %arg1: i32) -> (i32, i32) {
    %c0_i32 = arith.constant 0 : i32
    %c0_i32_0 = arith.constant 0 : i32
    return %c0_i32, %arg1 : i32, i32
  }
  func.func @transform_2(%arg0: i32, %arg1: i32) -> (i32, i32) {
    %c0_i32 = arith.constant 0 : i32
    %c0_i32_0 = arith.constant 0 : i32
    return %arg0, %c0_i32 : i32, i32
  }
}

</mosaic_0001>

<bundles_post_ra>
// kernel: tpu_custom_call.1
= control target key start
LH: loop header
LB: loop body
LE: loop exit
PB: predicated region body
PF: predicated region fallthrough
CT: control target
= control target key end

     0   :  { %7 = vsyncpa [#allocation7], 0  ;;  %s9241_s0 = inlined_call_operand.vmem [shape: f32[256,8], index: 0, kind: input, shape index: {}]   ;;  %s9242_s1 = inlined_call_operand.vmem [shape: f32[4,256], index: 1, kind: input, shape index: {}]   ;;  %s9243_s2 = inlined_call_operand.hbm [shape: f32[16,128], index: 2, kind: output, shape index: {}]  }
   0x1   :  { %9 = vsyncpa [#allocation7 + $0x1], 0  ;;  %s4507_s9 = smov 0   ;;  %s4509_s10 = smov 0  }
   0x2   :  { %s4511_s11 = smov 0   ;;  %s4513_s12 = smov 0  }
   0x3   :  { %s4515_s13 = smov 0   ;;  %s4517_s14 = smov 0  }
   0x4 LB: > { %s4024_s15 = sadd.s32 4294967295, %s4476_s14   ;;  %s4025_s16 = sadd.s32 4294967294, %s4476_s14   ;;  %s4476_s14 = sphi %s4517_s14, %s15_s14   ;;  %s4472_s13 = sphi %s4515_s13, %s10460_s13   ;;  %s4468_s12 = sphi %s4513_s12, %s10459_s12   ;;  %s4464_s11 = sphi %s4511_s11, %s10458_s11   ;;  %s4460_s10 = sphi %s4509_s10, %s10457_s10   ;;  %s4456_s9 = sphi %s4507_s9, %s10456_s9  }
   0x5   : > { %s27_s17 = sadd.s32 1, %s4472_s13  ;;  %s86_s18 = sadd.s32 1, %s4464_s11 }
   0x6   : > { %p29_p0 = scmp.ge.s32.totalorder %s27_s17, 2  ;;  %p96_p1 = scmp.ne.s32.totalorder %s4464_s11, %s4460_s10 }
   0x7   : > { %p97_p2 = scmp.eq.s32.totalorder %s4024_s15, 1  ;;  %p102_p3 = scmp.ne.s32.totalorder %s4460_s10, %s4456_s9 }
   0x8   : > { %s10462_s17 = smov (%p29_p0, %s27_s17), 0  ;;  %p103_p5 = scmp.eq.s32.totalorder %s4025_s16, 1 }
   0x9   : > { %p4547_p4 = por %p97_p2, %p96_p1  ;;  %s83_s20 = ssub.s32 %s4472_s13, %s10462_s17 }
   0xa   : > { %p4029_p6 = scmp.ge.s32.totalorder %s4476_s14, 1  ;;  %p84_p7 = scmp.eq.s32.totalorder %s83_s20, 0 }
   0xb   : > { %p4554_p8 = por %p103_p5, %p102_p3  ;;  %p139_p9 = scmp.lt.s32.totalorder %s4476_s14, 3 }
   0xc   : > { %s4560_s22 = scalar_select %p84_p7, %s4464_s11, %s86_s18  }
   0xd   : > { %p140_p10 = pnand %p4029_p6, %p139_p9 }
   0xf   : > { %143 = sbr.rel (%p140_p10) target bundleno = 1608 (0x648), region = 28 }
  0x16   : > { %s4031_s23 = sshll.u32 %s4468_s12, 4  ;;  %v4478_v0 = vmov 0   ;;  %v9259_v17 = vmov 2   ;;  %s4480_s28 = smov 2   ;;  %v9244_v18 = vmov 1   ;;  %v9248_v19 = vmov 3  }
  0x17   : > { %4215 = vset.pattern.permute.xlu1 %v4478_v0  ;;  %4214 = vset.pattern.permute.xlu0 %v4478_v0  ;;  %p167_p11 = scmp.lt.s32.totalorder %s4031_s23, 31  ;;  %s4483_s29 = smov 127  }
  0x18   : > { %s4033_s4 = sshll.u32 %s4468_s12, 7  ;;  %s4490_s5 = smov 124  }
  0x19   : > { %s10464_s23 = smov (!%p167_p11, %s4031_s23), 31  ;;  %s163_s7 = sand.u32 1, %s4460_s10  }
  0x1a   : > { %s4032_s24 = sshll.u32 %s10464_s23, 3  ;;  %s4030_s15 = sshll.u32 %s163_s7, 3 }
  0x1b   : > { %s4566_s27 = scalar_lea.vmem %s9241_s0, %s4032_s24  ;;  %s165_s23 = scalar_lea.vmem [#allocation6], %s4030_s15 }
  0x1c   : > { %v4569_v1 = vld [vmem:[%s4566_s27 + $0x10] sm:$0xff]  ;;  %v4572_v2 = vld [vmem:[%s4566_s27] sm:$0xff]  ;;  %v4577_v3 = vld [vmem:[%s4566_s27 + $0x18] sm:$0xff]  ;;  %s3942_s24 = sshll.u32 %s165_s23, 4  ;;  %s4491_s30 = smov [#allocation6]   ;;  %s9196_s24 = int_to_ptr.vmem [resolvable:$true] %s3942_s24 }
  0x1d   : > { %368 = vperm.xlu1 %4215, %v4569_v1   ;;  %358 = vperm.xlu0 %4214, %v4572_v2   ;;  %v4580_v4 = vld [vmem:[%s4566_s27 + $0x8] sm:$0xff]  ;;  %v4588_v6 = vld [vmem:[%s4566_s27 + $0x20] sm:$0xff]  ;;  %v4593_v7 = vld [vmem:[%s4566_s27 + $0x38] sm:$0xff]  ;;  %s4402_s3 = sshll.u32 %s4491_s30, 4  ;;  %s4403_s3 = int_to_ptr.vmem [resolvable:$false] %s4402_s3 }
  0x1e   : > { %v4585_v5 = vld [vmem:[%s4566_s27 + $0x28] sm:$0xff]  ;;  %v4596_v8 = vld [vmem:[%s4566_s27 + $0x30] sm:$0xff]  ;;  %v4604_v10 = vld [vmem:[%s4566_s27 + $0x40] sm:$0xff]  ;;  %s4404_s12 = scalar_lea.vmem %s4403_s3, 256  ;;  %p4405_p1 = scmp.lt.s32.totalorder %s9196_s24, %s4403_s3 }
  0x1f   : > { %v4601_v9 = vld [vmem:[%s4566_s27 + $0x48] sm:$0xff]  ;;  %9526 = vst [vmem:[#allocation9_spill] sm:$0xff] %v4604_v10  ;;  %v4609_v11 = vld [vmem:[%s4566_s27 + $0x58] sm:$0xff]  ;;  %v4612_v12 = vld [vmem:[%s4566_s27 + $0x50] sm:$0xff] }
  0x20   : > { %9527 = vst [vmem:[#allocation10_spill] sm:$0xff] %v4612_v12  ;;  %v4617_v13 = vld [vmem:[%s4566_s27 + $0x68] sm:$0xff]  ;;  %v4620_v14 = vld [vmem:[%s4566_s27 + $0x60] sm:$0xff]  ;;  %v4625_v15 = vld [vmem:[%s4566_s27 + $0x78] sm:$0xff] }
  0x21   : > { %373 = vperm.xlu1 %4215, %v4577_v3   ;;  %363 = vperm.xlu0 %4214, %v4580_v4   ;;  %v4628_v16 = vld [vmem:[%s4566_s27 + $0x70] sm:$0xff] }
  0x25   : > { %383 = vperm.xlu1 %4215, %v4585_v5   ;;  %378 = vperm.xlu0 %4214, %v4588_v6  }
  0x29   : > { %393 = vperm.xlu1 %4215, %v4593_v7   ;;  %388 = vperm.xlu0 %4214, %v4596_v8  }
  0x2d   : > { %403 = vperm.xlu1 %4215, %v4601_v9   ;;  %398 = vperm.xlu0 %4214, %v4604_v10  }
  0x31   : > { %413 = vperm.xlu1 %4215, %v4609_v11   ;;  %408 = vperm.xlu0 %4214, %v4612_v12  }
  0x35   : > { %423 = vperm.xlu1 %4215, %v4617_v13   ;;  %418 = vperm.xlu0 %4214, %v4620_v14  }
  0x39   : > { %433 = vperm.xlu1 %4215, %v4625_v15   ;;  %428 = vperm.xlu0 %4214, %v4628_v16  }
  0x3d   : > { %4216 = vset.pattern.permute.xlu1 %v9259_v17  ;;  %1055 = vrot.lane.b32.xlu0 %v4580_v4, %s4480_s28 }
  0x3e   : > { %492 = vperm.xlu1 %4216, %v4580_v4   ;;  %4219 = vset.pattern.permute.xlu0 %v9248_v19 }
  0x41   : > { %1059 = vrot.lane.b32.xlu0 %v4577_v3, %s4480_s28 }
  0x42   : > { %496 = vperm.xlu1 %4216, %v4569_v1  }
  0x45   : > { %1063 = vrot.lane.b32.xlu0 %v4585_v5, %s4480_s28 }
  0x46   : > { %504 = vperm.xlu1 %4216, %v4588_v6  }
  0x49   : > { %1067 = vrot.lane.b32.xlu0 %v4593_v7, %s4480_s28 }
  0x4a   : > { %512 = vperm.xlu1 %4216, %v4596_v8  }
  0x4d   : > { %1071 = vrot.lane.b32.xlu0 %v4601_v9, %s4480_s28 }
  0x4e   : > { %520 = vperm.xlu1 %4216, %v4604_v10  }
  0x51   : > { %1075 = vrot.lane.b32.xlu0 %v4609_v11, %s4480_s28 }
  0x52   : > { %528 = vperm.xlu1 %4216, %v4612_v12  }
  0x55   : > { %1079 = vrot.lane.b32.xlu0 %v4617_v13, %s4480_s28 }
  0x56   : > { %536 = vperm.xlu1 %4216, %v4620_v14  }
  0x59   : > { %1083 = vrot.lane.b32.xlu0 %v4625_v15, %s4480_s28 }
  0x5a   : > { %544 = vperm.xlu1 %4216, %v4628_v16  }
  0x5e   : > { %1053 = vrot.lane.b32.xlu1 %v4572_v2, %s4480_s28 }
  0x5f   : > { %4217 = vset.pattern.permute.xlu1 %v9244_v18 }
  0x62   : > { %1057 = vrot.lane.b32.xlu1 %v4569_v1, %s4480_s28 }
  0x66   : > { %1061 = vrot.lane.b32.xlu1 %v4588_v6, %s4480_s28 }
  0x6a   : > { %1065 = vrot.lane.b32.xlu1 %v4596_v8, %s4480_s28 }
  0x6e   : > { %1069 = vrot.lane.b32.xlu1 %v4604_v10, %s4480_s28 }
  0x72   : > { %1073 = vrot.lane.b32.xlu1 %v4612_v12, %s4480_s28 }
  0x76   : > { %1077 = vrot.lane.b32.xlu1 %v4620_v14, %s4480_s28 }
  0x7a   : > { %1081 = vrot.lane.b32.xlu1 %v4628_v16, %s4480_s28  ;;  %s3929_s28 = scalar_lea.sflag [#allocation7], %s163_s7 }
  0x7e   : > { %602 = vperm.xlu1 %4217, %v4572_v2  }
  0x82   : > { %610 = vperm.xlu1 %4217, %v4569_v1  }
  0x86   : > { %614 = vperm.xlu1 %4217, %v4577_v3  }
  0x8a   : > { %622 = vperm.xlu1 %4217, %v4585_v5  }
  0x8e   : > { %630 = vperm.xlu1 %4217, %v4593_v7  }
  0x9c   : > { %v4664_v20 = vpop.permute.xlu1 %368  ;;  %v4666_v21 = vpop.permute.xlu0 %358 }
  0x9d   : > { %9528 = vst [vmem:[#allocation11_spill] sm:$0xff] %v4666_v21 }
  0xa0   : > { %v4668_v22 = vpop.permute.xlu1 %373  ;;  %v4670_v23 = vpop.permute.xlu0 %363 }
  0xa1   : > { %9529 = vst [vmem:[#allocation12_spill] sm:$0xff] %v4668_v22 }
  0xa4   : > { %v4672_v24 = vpop.permute.xlu1 %383  ;;  %v4674_v25 = vpop.permute.xlu0 %378 }
  0xa5   : > { %9530 = vst [vmem:[#allocation13_spill] sm:$0xff] %v4672_v24 }
  0xa8   : > { %v4676_v26 = vpop.permute.xlu1 %393  ;;  %v4678_v27 = vpop.permute.xlu0 %388 }
  0xa9   : > { %9531 = vst [vmem:[#allocation14_spill] sm:$0xff] %v4676_v26 }
  0xac   : > { %v4680_v28 = vpop.permute.xlu1 %403  ;;  %v4682_v29 = vpop.permute.xlu0 %398 }
  0xad   : > { %9532 = vst [vmem:[#allocation15_spill] sm:$0xff] %v4680_v28 }
  0xb0   : > { %v4684_v30 = vpop.permute.xlu1 %413  ;;  %v4686_v31 = vpop.permute.xlu0 %408 }
  0xb1   : > { %9533 = vst [vmem:[#allocation16_spill] sm:$0xff] %v4684_v30 }
  0xb4   : > { %v4688_v32 = vpop.permute.xlu1 %423  ;;  %v4690_v33 = vpop.permute.xlu0 %418 }
  0xb5   : > { %9534 = vst [vmem:[#allocation17_spill] sm:$0xff] %v4688_v32  ;;  %9535 = vst [vmem:[#allocation18_spill] sm:$0xff] %v4690_v33  ;;  %v9550_v33 = vmov 2  }
  0xb8   : > { %v4692_v34 = vpop.permute.xlu1 %433  ;;  %v4694_v35 = vpop.permute.xlu0 %428 }
  0xb9   : > { %9536 = vst [vmem:[#allocation19_spill] sm:$0xff] %v4692_v34  ;;  %9537 = vst [vmem:[#allocation20_spill] sm:$0xff] %v4694_v35  ;;  %v9549_v35 = vmov 1  }
  0xbc   : > { %v1056_v36 = vpop.permute.xlu0 %1055 }
  0xbd   : > { %v1102_v37 = vsub.f32 %v4580_v4, %v1056_v36  ;;  %v4697_v38 = vpop.permute.xlu1 %492 }
  0xbf   : > { %v4699_v39 = vadd.f32 1.0, %v1102_v37 }
  0xc0   : > { %v1060_v40 = vpop.permute.xlu0 %1059 }
  0xc1   : > { %v1104_v41 = vsub.f32 %v4577_v3, %v1060_v40  ;;  %v4702_v42 = vpop.permute.xlu1 %496  ;;  %1151 = vrot.lane.b32.xlu1 %v4699_v39, %s4483_s29 }
  0xc3   : > { %v4706_v43 = vadd.f32 1.0, %v1104_v41 }
  0xc4   : > { %v1064_v44 = vpop.permute.xlu0 %1063 }
  0xc5   : > { %v1106_v45 = vsub.f32 %v4585_v5, %v1064_v44  ;;  %v4709_v46 = vpop.permute.xlu1 %504  ;;  %1155 = vrot.lane.b32.xlu1 %v4706_v43, %s4483_s29 }
  0xc7   : > { %v4713_v47 = vadd.f32 1.0, %v1106_v45 }
  0xc8   : > { %v1068_v48 = vpop.permute.xlu0 %1067 }
  0xc9   : > { %v1108_v49 = vsub.f32 %v4593_v7, %v1068_v48  ;;  %v4716_v50 = vpop.permute.xlu1 %512  ;;  %1159 = vrot.lane.b32.xlu1 %v4713_v47, %s4483_s29 }
  0xcb   : > { %v4720_v51 = vadd.f32 1.0, %v1108_v49 }
  0xcc   : > { %v1072_v52 = vpop.permute.xlu0 %1071 }
  0xcd   : > { %v1110_v53 = vsub.f32 %v4601_v9, %v1072_v52  ;;  %v4723_v54 = vpop.permute.xlu1 %520  ;;  %1163 = vrot.lane.b32.xlu1 %v4720_v51, %s4483_s29 }
  0xcf   : > { %v4727_v55 = vadd.f32 1.0, %v1110_v53 }
  0xd0   : > { %v1076_v56 = vpop.permute.xlu0 %1075 }
  0xd1   : > { %v1112_v57 = vsub.f32 %v4609_v11, %v1076_v56  ;;  %v4730_v58 = vpop.permute.xlu1 %528  ;;  %1167 = vrot.lane.b32.xlu1 %v4727_v55, %s4483_s29 }
  0xd3   : > { %v4734_v59 = vadd.f32 1.0, %v1112_v57 }
  0xd4   : > { %v1080_v60 = vpop.permute.xlu0 %1079 }
  0xd5   : > { %v1114_v61 = vsub.f32 %v4617_v13, %v1080_v60  ;;  %v4737_v62 = vpop.permute.xlu1 %536  ;;  %1171 = vrot.lane.b32.xlu1 %v4734_v59, %s4483_s29 }
  0xd6   : > { %9538 = vst [vmem:[#allocation21_spill] sm:$0xff] %v4737_v62 }
  0xd7   : > { %v4741_v63 = vadd.f32 1.0, %v1114_v61 }
  0xd8   : > { %v1084_v0 = vpop.permute.xlu0 %1083 }
  0xd9   : > { %v1116_v36 = vsub.f32 %v4625_v15, %v1084_v0  ;;  %v4744_v37 = vpop.permute.xlu1 %544  ;;  %1175 = vrot.lane.b32.xlu1 %v4741_v63, %s4483_s29 }
  0xda   : > { %9539 = vst [vmem:[#allocation22_spill] sm:$0xff] %v4744_v37 }
  0xdb   : > { %v4748_v40 = vadd.f32 1.0, %v1116_v36 }
  0xdd   : > { %9540 = vst [vmem:[#allocation23_spill] sm:$0xff] %v4748_v40  ;;  %v1054_v41 = vpop.permute.xlu1 %1053  ;;  %1179 = vrot.lane.b32.xlu1 %v4748_v40, %s4483_s29 }
  0xde   : > { %v1101_v44 = vsub.f32 %v4572_v2, %v1054_v41 }
  0xe0   : > { %v4753_v45 = vadd.f32 1.0, %v1101_v44 }
  0xe1   : > { %v1058_v48 = vpop.permute.xlu1 %1057  ;;  %638 = vperm.xlu1 %4217, %v4601_v9  }
  0xe2   : > { %v1103_v49 = vsub.f32 %v4569_v1, %v1058_v48  ;;  %1149 = vrot.lane.b32.xlu0 %v4753_v45, %s4483_s29 }
  0xe4   : > { %v4759_v52 = vadd.f32 1.0, %v1103_v49 }
  0xe5   : > { %v1062_v53 = vpop.permute.xlu1 %1061  ;;  %646 = vperm.xlu1 %4217, %v4609_v11  }
  0xe6   : > { %v1105_v56 = vsub.f32 %v4588_v6, %v1062_v53  ;;  %1153 = vrot.lane.b32.xlu0 %v4759_v52, %s4483_s29 }
  0xe8   : > { %v4765_v57 = vadd.f32 1.0, %v1105_v56 }
  0xe9   : > { %v1066_v60 = vpop.permute.xlu1 %1065  ;;  %4218 = vset.pattern.permute.xlu1 %v9248_v19  ;;  %v9256_v19 = vmov 7  }
  0xea   : > { %v1107_v61 = vsub.f32 %v4596_v8, %v1066_v60  ;;  %1157 = vrot.lane.b32.xlu0 %v4765_v57, %s4483_s29  ;;  %716 = vperm.xlu1 %4218, %v4572_v2  }
  0xec   : > { %v4772_v0 = vadd.f32 1.0, %v1107_v61 }
  0xed   : > { %v1070_v36 = vpop.permute.xlu1 %1069 }
  0xee   : > { %v1109_v41 = vsub.f32 %v4604_v10, %v1070_v36  ;;  %1161 = vrot.lane.b32.xlu0 %v4772_v0, %s4483_s29  ;;  %724 = vperm.xlu1 %4218, %v4569_v1  }
  0xf0   : > { %v4778_v44 = vadd.f32 1.0, %v1109_v41 }
  0xf1   : > { %v1074_v48 = vpop.permute.xlu1 %1073 }
  0xf2   : > { %v1111_v49 = vsub.f32 %v4612_v12, %v1074_v48  ;;  %1165 = vrot.lane.b32.xlu0 %v4778_v44, %s4483_s29  ;;  %728 = vperm.xlu1 %4218, %v4577_v3  }
  0xf4   : > { %v4784_v53 = vadd.f32 1.0, %v1111_v49  ;;  %v9250_v49 = vmov 4  }
  0xf5   : > { %v1078_v56 = vpop.permute.xlu1 %1077 }
  0xf6   : > { %v1113_v60 = vsub.f32 %v4620_v14, %v1078_v56  ;;  %1169 = vrot.lane.b32.xlu0 %v4784_v53, %s4483_s29  ;;  %736 = vperm.xlu1 %4218, %v4585_v5   ;;  %v9252_v56 = vmov 5  }
  0xf8   : > { %v4790_v61 = vadd.f32 1.0, %v1113_v60 }
  0xf9   : > { %v1082_v36 = vpop.permute.xlu1 %1081 }
  0xfa   : > { %v1115_v41 = vsub.f32 %v4628_v16, %v1082_v36  ;;  %1173 = vrot.lane.b32.xlu0 %v4790_v61, %s4483_s29  ;;  %740 = vperm.xlu1 %4218, %v4596_v8   ;;  %v9246_v36 = vmov 6  }
  0xfc   : > { %v4796_v48 = vadd.f32 1.0, %v1115_v41 }
  0xfd   : > { %v4815_v60 = vpop.permute.xlu1 %602 }
  0xfe   : > { %1177 = vrot.lane.b32.xlu0 %v4796_v48, %s4483_s29  ;;  %744 = vperm.xlu1 %4218, %v4593_v7   ;;  %9541 = vst [vmem:[#allocation24_spill] sm:$0xff] %v4815_v60  ;;  %s4398_s29 = scalar_lea.vmem %s9196_s24, 128 }
  0xff   : > { %p4399_p12 = scmp.ne.s32.totalorder %s9196_s24, %s4398_s29  ;;  %p4406_p2 = scmp.lt.s32.totalorder %s4404_s12, %s4398_s29 }
 0x101   : > { %v4820_v41 = vpop.permute.xlu1 %610  ;;  %p4400_p13 = pnand %p4399_p12, %p4547_p4  ;;  %p4407_p3 = por %p4406_p2, %p4405_p1 }
 0x102   : > { %720 = vperm.xlu0 %4219, %v4580_v4   ;;  %748 = vperm.xlu1 %4218, %v4604_v10  }
 0x103   : > { %p4401_p0 = pneg %p4400_p13 }
 0x105   : > { %p4408_p5 = pnand %p4407_p3, %p4401_p0 }
 0x106   : > { %732 = vperm.xlu0 %4219, %v4588_v6   ;;  %752 = vperm.xlu1 %4218, %v4601_v9  }
 0x10a   : > { %760 = vperm.xlu0 %4219, %v4609_v11   ;;  %756 = vperm.xlu1 %4218, %v4612_v12  }
 0x10e   : > { %768 = vperm.xlu0 %4219, %v4617_v13   ;;  %4220 = vset.pattern.permute.xlu1 %v9250_v49 }
 0x10f   : > { %1450 = vperm.xlu1 %4220, %v4572_v2  }
 0x112   : > { %4231 = vset.pattern.permute.xlu0 %v9244_v18  ;;  %v4826_v18 = vpop.permute.xlu1 %614 }
 0x113   : > { %606 = vperm.xlu0 %4231, %v4580_v4   ;;  %4221 = vset.pattern.permute.xlu1 %v9252_v56  ;;  %9542 = vst [vmem:[#allocation25_spill] sm:$0xff] %v4826_v18  ;;  %v9547_v18 = vmov 4  }
 0x114   : > { %1546 = vperm.xlu1 %4221, %v4572_v2  }
 0x117   : > { %618 = vperm.xlu0 %4231, %v4588_v6  }
 0x118   : > { %1550 = vperm.xlu1 %4221, %v4580_v4  }
 0x11b   : > { %626 = vperm.xlu0 %4231, %v4596_v8  }
 0x11c   : > { %4222 = vset.pattern.permute.xlu1 %v9246_v36  ;;  %v4832_v36 = vpop.permute.xlu1 %622 }
 0x11d   : > { %1674 = vperm.xlu1 %4222, %v4572_v2   ;;  %9543 = vst [vmem:[#allocation26_spill] sm:$0xff] %v4832_v36  ;;  %v9546_v36 = vmov 6  }
 0x11f   : > { %634 = vperm.xlu0 %4231, %v4604_v10  }
 0x121   : > { %4223 = vset.pattern.permute.xlu1 %v9250_v49  ;;  %v4837_v49 = vpop.permute.xlu1 %630 }
 0x122   : > { %1458 = vperm.xlu1 %4223, %v4569_v1   ;;  %9544 = vst [vmem:[#allocation27_spill] sm:$0xff] %v4837_v49  ;;  %v9548_v49 = vmov 7  }
 0x123   : > { %642 = vperm.xlu0 %4231, %v4612_v12  }
 0x126   : > { %4224 = vset.pattern.permute.xlu1 %v9252_v56  ;;  %v9545_v56 = vmov 3  }
 0x127   : > { %650 = vperm.xlu0 %4231, %v4620_v14   ;;  %1554 = vperm.xlu1 %4224, %v4569_v1  }
 0x12b   : > { %658 = vperm.xlu0 %4231, %v4628_v16   ;;  %4225 = vset.pattern.permute.xlu1 %v9256_v19 }
 0x12c   : > { %1806 = vperm.xlu1 %4225, %v4580_v4  }
 0x12f   : > { %4236 = vset.pattern.permute.xlu0 %v9259_v17 }
 0x130   : > { %488 = vperm.xlu0 %4236, %v4572_v2   ;;  %4226 = vset.pattern.permute.xlu1 %v9545_v56 }
 0x131   : > { %764 = vperm.xlu1 %4226, %v4620_v14  }
 0x133   : > { %v1152_v37 = vpop.permute.xlu1 %1151 }
 0x134   : > { %500 = vperm.xlu0 %4236, %v4577_v3   ;;  %v1198_v34 = vmul.f32 %v1152_v37, %v4699_v39  ;;  %v9271_v39 = vlaneseq }
 0x135   : > { %4227 = vset.pattern.permute.xlu1 %v9546_v36 }
 0x136   : > { %1682 = vperm.xlu1 %4227, %v4569_v1  }
 0x137   : > { %v1156_v19 = vpop.permute.xlu1 %1155 }
 0x138   : > { %508 = vperm.xlu0 %4236, %v4585_v5  }
 0x13a   : > { %4228 = vset.pattern.permute.xlu1 %v9547_v18 }
 0x13b   : > { %1462 = vperm.xlu1 %4228, %v4577_v3   ;;  %v1160_v17 = vpop.permute.xlu1 %1159 }
 0x13c   : > { %516 = vperm.xlu0 %4236, %v4593_v7  }
 0x13f   : > { %4229 = vset.pattern.permute.xlu1 %v9548_v49  ;;  %v1164_v62 = vpop.permute.xlu1 %1163 }
 0x140   : > { %524 = vperm.xlu0 %4236, %v4601_v9   ;;  %1810 = vperm.xlu1 %4229, %v4569_v1   ;;  %v1204_v30 = vmul.f32 %v1164_v62, %v4720_v51 }
 0x143   : > { %v1168_v32 = vpop.permute.xlu1 %1167 }
 0x144   : > { %532 = vperm.xlu0 %4236, %v4609_v11   ;;  %4230 = vset.pattern.permute.xlu1 %v9549_v35  ;;  %v1206_v1 = vmul.f32 %v1168_v32, %v4727_v55  ;;  %v9552_v32 = vmov 5  }
 0x145   : > { %654 = vperm.xlu1 %4230, %v4617_v13  }
 0x147   : > { %v4862_v28 = vpop.permute.xlu1 %1171 }
 0x148   : > { %540 = vperm.xlu0 %4236, %v4617_v13  }
 0x149   : > { %4232 = vset.pattern.permute.xlu1 %v9550_v33 }
 0x14a   : > { %1229 = vperm.xlu1 %4232, %v1198_v34  }
 0x14b   : > { %v4865_v13 = vpop.permute.xlu1 %1175 }
 0x14c   : > { %548 = vperm.xlu0 %4236, %v4625_v15  }
 0x14e   : > { %1259 = vperm.xlu1 %4232, %v1204_v30   ;;  %v4871_v30 = vshrl.u32 %v9271_v39, 7 }
 0x14f   : > { %v4875_v62 = vpop.permute.xlu1 %1179 }
 0x150   : > { %9551 = vst [vmem:[#allocation28_spill] sm:$0xff] %v4871_v30  ;;  %9553 = vst [vmem:[#allocation29_spill] sm:$0xff] %v4875_v62  ;;  %v443_v37 = vsub.s32 4, %v4871_v30  ;;  %v667_v39 = vsub.s32 1, %v4871_v30  ;;  %v671_v22 = vsub.s32 5, %v4871_v30 }
 0x152   : > { %1269 = vperm.xlu1 %4232, %v1206_v1   ;;  %v4886_v1 = vsub.s32 2, %v4871_v30 }
 0x154   : > { %v1150_v26 = vpop.permute.xlu0 %1149  ;;  %9554 = vst [vmem:[#allocation30_spill] sm:$0xff] %v4886_v1 }
 0x155   : > { %v1197_v24 = vmul.f32 %v1150_v26, %v4753_v45  ;;  %v1200_v26 = vmul.f32 %v1156_v19, %v4706_v43  ;;  %v4889_v19 = vsub.s32 6, %v4871_v30 }
 0x156   : > { %4233 = vset.pattern.permute.xlu1 %v9546_v36 }
 0x157   : > { %1224 = vperm.xlu0 %4236, %v1197_v24   ;;  %1686 = vperm.xlu1 %4233, %v4577_v3   ;;  %v439_v24 = vsub.s32 0, %v4871_v30  ;;  %9555 = vst [vmem:[#allocation31_spill] sm:$0xff] %v4889_v19 }
 0x158   : > { %v1154_v34 = vpop.permute.xlu0 %1153 }
 0x159   : > { %v1199_v51 = vmul.f32 %v1154_v34, %v4759_v52  ;;  %v4883_v52 = vld [vmem:[%s9242_s1] sm:$0xff] }
 0x15a   : > { %v554_v62 = vrot.slane %v4883_v52, %v4886_v1  ;;  %v668_v60 = vrot.slane %v4883_v52, %v667_v39 }
 0x15b   : > { %1234 = vperm.xlu0 %4236, %v1199_v51   ;;  %4234 = vset.pattern.permute.xlu1 %v9552_v32  ;;  %v440_v51 = vrot.slane %v4883_v52, %v439_v24 }
 0x15c   : > { %v1158_v55 = vpop.permute.xlu0 %1157  ;;  %1562 = vperm.xlu1 %4234, %v4588_v6  }
 0x15d   : > { %v1201_v43 = vmul.f32 %v1158_v55, %v4765_v57  ;;  %v558_v57 = vrot.slane %v4883_v52, %v4889_v19  ;;  %v1202_v55 = vmul.f32 %v1160_v17, %v4713_v47  ;;  %v4911_v40 = vrot.slane %v440_v51, %v439_v24 }
 0x15e   : > { %v672_v19 = vrot.slane %v4883_v52, %v671_v22  ;;  %v4918_v47 = vrot.slane %v554_v62, %v4886_v1 }
 0x15f   : > { %1239 = vperm.xlu0 %4236, %v1200_v26   ;;  %v444_v26 = vrot.slane %v4883_v52, %v443_v37  ;;  %v785_v37 = vsub.s32 7, %v4871_v30 }
 0x160   : > { %v1162_v45 = vpop.permute.xlu0 %1161  ;;  %4235 = vset.pattern.permute.xlu1 %v9548_v49  ;;  %v4893_v34 = vpop.permute.xlu1 %638  ;;  %v573_v22 = vmin.f32 %v4702_v42, %v4918_v47 }
 0x161   : > { %9556 = vst [vmem:[#allocation32_spill] sm:$0xff] %v4893_v34  ;;  %1814 = vperm.xlu1 %4235, %v4577_v3   ;;  %v4913_v21 = vrot.slane %v444_v26, %v439_v24  ;;  %v786_v24 = vrot.slane %v4883_v52, %v785_v37 }
 0x163   : > { %1244 = vperm.xlu0 %4236, %v1201_v43   ;;  %v781_v43 = vsub.s32 3, %v4871_v30  ;;  %v1203_v30 = vmul.f32 %v1162_v45, %v4772_v0  ;;  %v4936_v0 = vrot.slane %v672_v19, %v667_v39  ;;  %v459_v45 = vmax.f32 %v4664_v20, %v4911_v40 }
 0x164   : > { %v1166_v12 = vpop.permute.xlu0 %1165  ;;  %v4905_v34 = vpop.permute.xlu1 %646 }
 0x165   : > { %9557 = vst [vmem:[#allocation33_spill] sm:$0xff] %v4905_v34  ;;  %4237 = vset.pattern.permute.xlu1 %v9545_v56  ;;  %v4921_v34 = vrot.slane %v558_v57, %v4886_v1  ;;  %v782_v51 = vrot.slane %v4883_v52, %v781_v43  ;;  %v4934_v57 = vrot.slane %v668_v60, %v667_v39 }
 0x166   : > { %772 = vperm.xlu1 %4237, %v4628_v16   ;;  %v1205_v37 = vmul.f32 %v1166_v12, %v4778_v44  ;;  %v4949_v60 = vsub.f32 %v573_v22, %v459_v45  ;;  %v688_v19 = vmax.f32 %v4820_v41, %v4936_v0  ;;  %v1208_v44 = vmul.f32 %v4862_v28, %v4734_v59 }
 0x167   : > { %1249 = vperm.xlu0 %4236, %v1202_v55   ;;  %v574_v62 = vmin.f32 %v4702_v42, %v4921_v34  ;;  %v460_v55 = vmax.f32 %v4664_v20, %v4913_v21  ;;  %v4947_v42 = vrot.slane %v786_v24, %v781_v43 }
 0x168   : > { %v1170_v17 = vpop.permute.xlu0 %1169 }
 0x169   : > { %v1207_v10 = vmul.f32 %v1170_v17, %v4784_v53  ;;  %v4927_v26 = vpop.permute.xlu1 %716  ;;  %v4945_v17 = vrot.slane %v782_v51, %v781_v43  ;;  %v4951_v39 = vsub.f32 %v574_v62, %v460_v55 }
 0x16a   : > { %4238 = vset.pattern.permute.xlu1 %v9550_v33 }
 0x16b   : > { %1254 = vperm.xlu0 %4236, %v1203_v30   ;;  %1274 = vperm.xlu1 %4238, %v1207_v10   ;;  %v687_v10 = vmax.f32 %v4820_v41, %v4934_v57  ;;  %v2849_v41 = vmax.f32 %v4949_v60, 0.0  ;;  %v2850_v62 = vmax.f32 %v4951_v39, 0.0 }
 0x16c   : > { %v4938_v53 = vpop.permute.xlu0 %1173 }
 0x16d   : > { %v725_v30 = vpop.permute.xlu1 %724 }
 0x16e   : > { %v801_v20 = vmin.f32 %v725_v30, %v4945_v17  ;;  %v802_v12 = vmin.f32 %v725_v30, %v4947_v42 }
 0x16f   : > { %1264 = vperm.xlu0 %4236, %v1205_v37   ;;  %4239 = vset.pattern.permute.xlu1 %v9547_v18 }
 0x170   : > { %1470 = vperm.xlu1 %4239, %v4585_v5   ;;  %v4963_v43 = vsub.f32 %v801_v20, %v687_v10  ;;  %v4965_v51 = vsub.f32 %v802_v12, %v688_v19  ;;  %v1178_v24 = vpop.permute.xlu0 %1177 }
 0x171   : > { %v4967_v22 = vpop.permute.xlu1 %728  ;;  %v1211_v28 = vmul.f32 %v1178_v24, %v4796_v48 }
 0x172   : > { %9558 = vst [vmem:[#allocation34_spill] sm:$0xff] %v4965_v51  ;;  %v2881_v45 = vmax.f32 %v4963_v43, 0.0  ;;  %v2882_v55 = vmax.f32 %v4965_v51, 0.0 }
 0x173   : > { %1279 = vperm.xlu0 %4236, %v1208_v44  }
 0x174   : > { %4240 = vset.pattern.permute.xlu1 %v9552_v32  ;;  %v4978_v37 = vmul.f32 %v2881_v45, %v2849_v41  ;;  %v4980_v30 = vmul.f32 %v2882_v55, %v2850_v62  ;;  %v571_v41 = vmin.f32 %v4697_v38, %v4918_v47  ;;  %v572_v62 = vmin.f32 %v4697_v38, %v4921_v34 }
 0x175   : > { %v4975_v59 = vpop.permute.xlu1 %736  ;;  %1566 = vperm.xlu1 %4240, %v4585_v5  }
 0x176   : > { %9559 = vst [vmem:[#allocation35_spill] sm:$0xff] %v4978_v37  ;;  %9560 = vst [vmem:[#allocation36_spill] sm:$0xff] %v4980_v30  ;;  %v1209_v30 = vmul.f32 %v4938_v53, %v4790_v61 }
 0x177   : > { %1294 = vperm.xlu0 %4236, %v1211_v28   ;;  %v457_v28 = vmax.f32 %v4670_v23, %v4911_v40 }
 0x179   : > { %v4982_v10 = vpop.permute.xlu1 %740  ;;  %4241 = vset.pattern.permute.xlu1 %v9549_v35 }
 0x17a   : > { %662 = vperm.xlu1 %4241, %v4625_v15  }
 0x17b   : > { %4253 = vset.pattern.permute.xlu0 %v9548_v49 }
 0x17c   : > { %1802 = vperm.xlu0 %4253, %v4572_v2  }
 0x17d   : > { %v4988_v48 = vpop.permute.xlu1 %744 }
 0x17e   : > { %9561 = vst [vmem:[#allocation37_spill] sm:$0xff] %v4988_v48  ;;  %4242 = vset.pattern.permute.xlu1 %v9545_v56 }
 0x17f   : > { %776 = vperm.xlu1 %4242, %v4625_v15  }
 0x180   : > { %1818 = vperm.xlu0 %4253, %v4588_v6  }
 0x181   : > { %v721_v19 = vpop.permute.xlu0 %720  ;;  %v4993_v20 = vpop.permute.xlu1 %748 }
 0x182   : > { %v799_v45 = vmin.f32 %v721_v19, %v4945_v17  ;;  %v800_v55 = vmin.f32 %v721_v19, %v4947_v42 }
 0x183   : > { %4243 = vset.pattern.permute.xlu1 %v9546_v36 }
 0x184   : > { %1826 = vperm.xlu0 %4253, %v4596_v8   ;;  %1694 = vperm.xlu1 %4243, %v4585_v5  }
 0x185   : > { %v733_v35 = vpop.permute.xlu0 %732  ;;  %v4998_v12 = vpop.permute.xlu1 %752 }
 0x186   : > { %9562 = vst [vmem:[#allocation38_spill] sm:$0xff] %v4998_v12  ;;  %v805_v53 = vmin.f32 %v733_v35, %v4945_v17 }
 0x188   : > { %1838 = vperm.xlu0 %4253, %v4601_v9   ;;  %4244 = vset.pattern.permute.xlu1 %v9547_v18 }
 0x189   : > { %v5002_v2 = vpop.permute.xlu0 %760  ;;  %v5004_v56 = vpop.permute.xlu1 %756  ;;  %1474 = vperm.xlu1 %4244, %v4596_v8  }
 0x18a   : > { %9563 = vst [vmem:[#allocation39_spill] sm:$0xff] %v5002_v2 }
 0x18c   : > { %1850 = vperm.xlu0 %4253, %v4620_v14  }
 0x18d   : > { %v5008_v44 = vpop.permute.xlu0 %768  ;;  %4245 = vset.pattern.permute.xlu1 %v9548_v49 }
 0x18e   : > { %9564 = vst [vmem:[#allocation40_spill] sm:$0xff] %v5008_v44  ;;  %v5011_v24 = vpop.permute.xlu1 %1450  ;;  %1822 = vperm.xlu1 %4245, %v4585_v5   ;;  %v458_v5 = vmax.f32 %v4670_v23, %v4913_v21  ;;  %v5031_v44 = vsub.f32 %v571_v41, %v457_v28  ;;  %v577_v23 = vmin.f32 %v4709_v46, %v4918_v47 }
 0x18f   : > { %9565 = vst [vmem:[#allocation41_spill] sm:$0xff] %v5011_v24 }
 0x190   : > { %4268 = vset.pattern.permute.xlu0 %v9552_v32  ;;  %v5033_v19 = vsub.f32 %v572_v62, %v458_v5  ;;  %v463_v62 = vmax.f32 %v4674_v25, %v4911_v40 }
 0x191   : > { %1558 = vperm.xlu0 %4268, %v4577_v3  }
 0x192   : > { %v607_v37 = vpop.permute.xlu0 %606  ;;  %4246 = vset.pattern.permute.xlu1 %v9550_v33 }
 0x193   : > { %v685_v38 = vmax.f32 %v607_v37, %v4934_v57  ;;  %v686_v24 = vmax.f32 %v607_v37, %v4936_v0  ;;  %v5035_v3 = vpop.permute.xlu1 %1546  ;;  %1284 = vperm.xlu1 %4246, %v1209_v30   ;;  %v806_v37 = vmin.f32 %v733_v35, %v4947_v42  ;;  %v578_v30 = vmin.f32 %v4709_v46, %v4921_v34 }
 0x194   : > { %9566 = vst [vmem:[#allocation42_spill] sm:$0xff] %v5035_v3  ;;  %v464_v3 = vmax.f32 %v4674_v25, %v4913_v21  ;;  %v5061_v46 = vsub.f32 %v577_v23, %v463_v62  ;;  %v467_v25 = vmax.f32 %v4678_v27, %v4911_v40  ;;  %v468_v23 = vmax.f32 %v4678_v27, %v4913_v21 }
 0x195   : > { %v5039_v2 = vsub.f32 %v799_v45, %v685_v38  ;;  %v5041_v61 = vsub.f32 %v800_v55, %v686_v24  ;;  %1570 = vperm.xlu0 %4268, %v4596_v8   ;;  %v2847_v24 = vmax.f32 %v5031_v44, 0.0  ;;  %v2848_v55 = vmax.f32 %v5033_v19, 0.0 }
 0x196   : > { %v619_v41 = vpop.permute.xlu0 %618  ;;  %v471_v62 = vmax.f32 %v4682_v29, %v4911_v40 }
 0x197   : > { %9567 = vst [vmem:[#allocation43_spill] sm:$0xff] %v5039_v2  ;;  %9568 = vst [vmem:[#allocation44_spill] sm:$0xff] %v5041_v61  ;;  %v2879_v28 = vmax.f32 %v5039_v2, 0.0  ;;  %v2880_v45 = vmax.f32 %v5041_v61, 0.0  ;;  %v691_v5 = vmax.f32 %v619_v41, %v4934_v57  ;;  %v692_v38 = vmax.f32 %v619_v41, %v4936_v0  ;;  %v5056_v35 = vpop.permute.xlu1 %1550  ;;  %4247 = vset.pattern.permute.xlu1 %v9547_v18 }
 0x198   : > { %9569 = vst [vmem:[#allocation45_spill] sm:$0xff] %v5056_v35  ;;  %1478 = vperm.xlu1 %4247, %v4593_v7   ;;  %v5073_v35 = vsub.f32 %v578_v30, %v464_v3  ;;  %v2853_v3 = vmax.f32 %v5061_v46, 0.0 }
 0x199   : > { %1582 = vperm.xlu0 %4268, %v4601_v9   ;;  %v5065_v61 = vsub.f32 %v805_v53, %v691_v5  ;;  %v5067_v2 = vsub.f32 %v806_v37, %v692_v38  ;;  %v5069_v48 = vmul.f32 %v2879_v28, %v2847_v24  ;;  %v5071_v41 = vmul.f32 %v2880_v45, %v2848_v55 }
 0x19a   : > { %v627_v12 = vpop.permute.xlu0 %626  ;;  %v472_v37 = vmax.f32 %v4682_v29, %v4913_v21  ;;  %v2854_v45 = vmax.f32 %v5073_v35, 0.0  ;;  %v581_v24 = vmin.f32 %v4716_v50, %v4918_v47  ;;  %v585_v29 = vmin.f32 %v4723_v54, %v4918_v47 }
 0x19b   : > { %9570 = vst [vmem:[#allocation46_spill] sm:$0xff] %v5065_v61  ;;  %9571 = vst [vmem:[#allocation47_spill] sm:$0xff] %v5067_v2  ;;  %v2885_v30 = vmax.f32 %v5065_v61, 0.0  ;;  %v2886_v28 = vmax.f32 %v5067_v2, 0.0  ;;  %v586_v55 = vmin.f32 %v4723_v54, %v4921_v34  ;;  %v589_v5 = vmin.f32 %v4730_v58, %v4918_v47 }
 0x19c   : > { %9572 = vst [vmem:[#allocation48_spill] sm:$0xff] %v5069_v48  ;;  %9573 = vst [vmem:[#allocation49_spill] sm:$0xff] %v5071_v41  ;;  %v5081_v53 = vpop.permute.xlu1 %1674  ;;  %4248 = vset.pattern.permute.xlu1 %v9552_v32  ;;  %v695_v38 = vmax.f32 %v627_v12, %v4934_v57  ;;  %v696_v41 = vmax.f32 %v627_v12, %v4936_v0  ;;  %v590_v48 = vmin.f32 %v4730_v58, %v4921_v34 }
 0x19d   : > { %9574 = vst [vmem:[#allocation50_spill] sm:$0xff] %v5081_v53  ;;  %1590 = vperm.xlu0 %4268, %v4609_v11   ;;  %1574 = vperm.xlu1 %4248, %v4593_v7   ;;  %v582_v11 = vmin.f32 %v4716_v50, %v4921_v34  ;;  %v1210_v53 = vmul.f32 %v4865_v13, %v4741_v63 }
 0x19e   : > { %v635_v27 = vpop.permute.xlu0 %634  ;;  %v809_v54 = vmin.f32 %v4982_v10, %v4945_v17  ;;  %v810_v61 = vmin.f32 %v4982_v10, %v4947_v42  ;;  %v5118_v12 = vmul.f32 %v2885_v30, %v2853_v3  ;;  %v5120_v63 = vmul.f32 %v2886_v28, %v2854_v45 }
 0x19f   : > { %v699_v50 = vmax.f32 %v635_v27, %v4934_v57  ;;  %v700_v2 = vmax.f32 %v635_v27, %v4936_v0  ;;  %v813_v13 = vmin.f32 %v4993_v20, %v4945_v17  ;;  %v818_v3 = vmin.f32 %v5004_v56, %v4947_v42 }
 0x1a0   : > { %9576 = vst [vmem:[#allocation52_spill] sm:$0xff] %v5118_v12  ;;  %9577 = vst [vmem:[#allocation53_spill] sm:$0xff] %v5120_v63  ;;  %v5132_v30 = vsub.f32 %v809_v54, %v695_v38  ;;  %v5134_v28 = vsub.f32 %v810_v61, %v696_v41  ;;  %v475_v45 = vmax.f32 %v4686_v31, %v4911_v40 }
 0x1a1   : > { %1602 = vperm.xlu0 %4268, %v4628_v16   ;;  %v5115_v51 = vpop.permute.xlu1 %1458  ;;  %4249 = vset.pattern.permute.xlu1 %v9550_v33  ;;  %v814_v16 = vmin.f32 %v4993_v20, %v4947_v42  ;;  %v476_v20 = vmax.f32 %v4686_v31, %v4913_v21  ;;  %v5147_v12 = vsub.f32 %v582_v11, %v468_v23 }
 0x1a2   : > { %9575 = vst [vmem:[#allocation51_spill] sm:$0xff] %v5115_v51  ;;  %v643_v58 = vpop.permute.xlu0 %642  ;;  %1289 = vperm.xlu1 %4249, %v1210_v53   ;;  %v817_v51 = vmin.f32 %v5004_v56, %v4945_v17  ;;  %v5140_v53 = vsub.f32 %v813_v13, %v699_v50  ;;  %v5156_v38 = vsub.f32 %v585_v29, %v471_v62  ;;  %v2890_v23 = vmax.f32 %v5134_v28, 0.0 }
 0x1a3   : > { %v703_v27 = vmax.f32 %v643_v58, %v4934_v57  ;;  %v704_v10 = vmax.f32 %v643_v58, %v4936_v0  ;;  %v5142_v63 = vsub.f32 %v814_v16, %v700_v2  ;;  %v5145_v58 = vsub.f32 %v581_v24, %v467_v25 }
 0x1a4   : > { %v5158_v31 = vsub.f32 %v586_v55, %v472_v37  ;;  %v5160_v2 = vsub.f32 %v589_v5, %v475_v45  ;;  %v5165_v25 = vsub.f32 %v590_v48, %v476_v20  ;;  %v2893_v24 = vmax.f32 %v5140_v53, 0.0  ;;  %v9587_v20 = vld [vmem:[#allocation9_spill] sm:$0xff] }
 0x1a5   : > { %9578 = vst [vmem:[#allocation54_spill] sm:$0xff] %v5142_v63  ;;  %4271 = vset.pattern.permute.xlu0 %v9547_v18  ;;  %v5149_v56 = vsub.f32 %v817_v51, %v703_v27  ;;  %v5151_v61 = vsub.f32 %v818_v3, %v704_v10  ;;  %v2889_v51 = vmax.f32 %v5132_v30, 0.0  ;;  %v2894_v62 = vmax.f32 %v5142_v63, 0.0 }
 0x1a6   : > { %1454 = vperm.xlu0 %4271, %v4580_v4   ;;  %v5154_v41 = vpop.permute.xlu0 %650  ;;  %v5162_v50 = vpop.permute.xlu1 %1554  ;;  %4250 = vset.pattern.permute.xlu1 %v9546_v36  ;;  %v2857_v37 = vmax.f32 %v5145_v58, 0.0  ;;  %v2858_v11 = vmax.f32 %v5147_v12, 0.0  ;;  %v2861_v5 = vmax.f32 %v5156_v38, 0.0  ;;  %v2862_v54 = vmax.f32 %v5158_v31, 0.0 }
 0x1a7   : > { %9579 = vst [vmem:[#allocation55_spill] sm:$0xff] %v5149_v56  ;;  %9580 = vst [vmem:[#allocation56_spill] sm:$0xff] %v5151_v61  ;;  %1702 = vperm.xlu1 %4250, %v4593_v7   ;;  %v2897_v29 = vmax.f32 %v5149_v56, 0.0  ;;  %v2898_v55 = vmax.f32 %v5151_v61, 0.0  ;;  %v2865_v13 = vmax.f32 %v5160_v2, 0.0  ;;  %v2866_v16 = vmax.f32 %v5165_v25, 0.0 }
 0x1a8   : > { %9581 = vst [vmem:[#allocation57_spill] sm:$0xff] %v5154_v41  ;;  %9582 = vst [vmem:[#allocation58_spill] sm:$0xff] %v5162_v50  ;;  %v797_v27 = vmin.f32 %v4927_v26, %v4945_v17  ;;  %v5188_v3 = vmul.f32 %v2889_v51, %v2857_v37  ;;  %v5190_v45 = vmul.f32 %v2890_v23, %v2858_v11  ;;  %v9590_v56 = vld [vmem:[#allocation24_spill] sm:$0xff]  ;;  %v9593_v51 = vld [vmem:[#allocation11_spill] sm:$0xff] }
 0x1a9   : > { %v5193_v50 = vmul.f32 %v2893_v24, %v2861_v5  ;;  %v5195_v61 = vmul.f32 %v2894_v62, %v2862_v54  ;;  %v5200_v63 = vmul.f32 %v2897_v29, %v2865_v13  ;;  %v455_v23 = vmax.f32 %v9593_v51, %v4911_v40 }
 0x1aa   : > { %1466 = vperm.xlu0 %4271, %v4588_v6   ;;  %v5177_v48 = vpop.permute.xlu0 %658  ;;  %9585 = vst [vmem:[#allocation61_spill] sm:$0xff] %v5188_v3  ;;  %9586 = vst [vmem:[#allocation62_spill] sm:$0xff] %v5190_v45  ;;  %v5288_v3 = vadd.f32 1.0, %v5031_v44  ;;  %v5363_v45 = vadd.f32 1.0, %v5156_v38  ;;  %v803_v38 = vmin.f32 %v4967_v22, %v4945_v17 }
 0x1ab   : > { %9583 = vst [vmem:[#allocation59_spill] sm:$0xff] %v5177_v48  ;;  %v5185_v10 = vpop.permute.xlu1 %1806  ;;  %4251 = vset.pattern.permute.xlu1 %v9552_v32  ;;  %9588 = vst [vmem:[#allocation9_spill] sm:$0xff] %v5193_v50  ;;  %v683_v48 = vmax.f32 %v9590_v56, %v4934_v57  ;;  %v5315_v50 = vld [vmem:[%s4566_s27 + $0x50] sm:$0xff] }
 0x1ac   : > { %9584 = vst [vmem:[#allocation60_spill] sm:$0xff] %v5185_v10  ;;  %1578 = vperm.xlu1 %4251, %v9587_v20   ;;  %9589 = vst [vmem:[#allocation63_spill] sm:$0xff] %v5195_v61  ;;  %v5202_v10 = vmul.f32 %v2898_v55, %v2866_v16  ;;  %v9611_v61 = vld [vmem:[#allocation18_spill] sm:$0xff] }
 0x1ad   : > { %9591 = vst [vmem:[#allocation24_spill] sm:$0xff] %v5200_v63  ;;  %v5208_v37 = vsub.f32 %v797_v27, %v683_v48  ;;  %v479_v44 = vmax.f32 %v9611_v61, %v4911_v40  ;;  %9619 = vst [vmem:[#allocation18_spill] sm:$0xff] %v5363_v45 }
 0x1ae   : > { %1482 = vperm.xlu0 %4271, %v9587_v20   ;;  %9592 = vst [vmem:[#allocation64_spill] sm:$0xff] %v5202_v10 }
 0x1af   : > { %v5204_v41 = vpop.permute.xlu0 %488  ;;  %v2877_v55 = vmax.f32 %v5208_v37, 0.0 }
 0x1b0   : > { %v569_v24 = vmin.f32 %v5204_v41, %v4918_v47  ;;  %v5212_v62 = vpop.permute.xlu1 %764  ;;  %4252 = vset.pattern.permute.xlu1 %v9548_v49 }
 0x1b1   : > { %1830 = vperm.xlu1 %4252, %v4593_v7  }
 0x1b2   : > { %v5215_v11 = vsub.f32 %v569_v24, %v455_v23  ;;  %1498 = vperm.xlu0 %4271, %v4620_v14   ;;  %v9599_v23 = vld [vmem:[#allocation23_spill] sm:$0xff]  ;;  %v9600_v24 = vld [vmem:[#allocation29_spill] sm:$0xff] }
 0x1b3   : > { %v5219_v29 = vpop.permute.xlu0 %500 }
 0x1b4   : > { %9594 = vst [vmem:[#allocation11_spill] sm:$0xff] %v5215_v11  ;;  %v2845_v48 = vmax.f32 %v5215_v11, 0.0 }
 0x1b5   : > { %v5223_v5 = vpop.permute.xlu1 %1682  ;;  %4254 = vset.pattern.permute.xlu1 %v9546_v36 }
 0x1b6   : > { %9595 = vst [vmem:[#allocation65_spill] sm:$0xff] %v5223_v5  ;;  %v5226_v54 = vmul.f32 %v2877_v55, %v2845_v48  ;;  %1706 = vperm.xlu1 %4254, %v9587_v20   ;;  %1510 = vperm.xlu0 %4271, %v4625_v15   ;;  %v1212_v55 = vmul.f32 %v9600_v24, %v9599_v23  ;;  %v9605_v24 = vld [vmem:[#allocation13_spill] sm:$0xff]  ;;  %v9607_v23 = vld [vmem:[#allocation15_spill] sm:$0xff] }
 0x1b7   : > { %v5230_v13 = vpop.permute.xlu0 %508  ;;  %v575_v5 = vmin.f32 %v5219_v29, %v4918_v47 }
 0x1b8   : > { %9596 = vst [vmem:[#allocation66_spill] sm:$0xff] %v5226_v54  ;;  %v5301_v54 = vadd.f32 1.0, %v4951_v39 }
 0x1ba   : > { %v5232_v7 = vpop.permute.xlu1 %1462  ;;  %4255 = vset.pattern.permute.xlu1 %v9547_v18  ;;  %4274 = vset.pattern.permute.xlu0 %v9546_v36 }
 0x1bb   : > { %9597 = vst [vmem:[#allocation67_spill] sm:$0xff] %v5232_v7  ;;  %v5236_v16 = vpop.permute.xlu0 %516  ;;  %1486 = vperm.xlu1 %4255, %v4601_v9   ;;  %1678 = vperm.xlu0 %4274, %v4580_v4   ;;  %v5309_v7 = vadd.f32 1.0, %v5061_v46  ;;  %v5327_v46 = vadd.f32 1.0, %v5145_v58  ;;  %v576_v58 = vmin.f32 %v5219_v29, %v4921_v34 }
 0x1bf   : > { %v5240_v27 = vpop.permute.xlu1 %1810  ;;  %4256 = vset.pattern.permute.xlu1 %v9548_v49  ;;  %1690 = vperm.xlu0 %4274, %v4588_v6   ;;  %v5244_v15 = vpop.permute.xlu0 %524  ;;  %v456_v6 = vmax.f32 %v9593_v51, %v4913_v21  ;;  %v9606_v51 = vld [vmem:[#allocation14_spill] sm:$0xff] }
 0x1c0   : > { %9598 = vst [vmem:[#allocation68_spill] sm:$0xff] %v5240_v27  ;;  %1834 = vperm.xlu1 %4256, %v9587_v20   ;;  %v9603_v20 = vld [vmem:[#allocation10_spill] sm:$0xff]  ;;  %v9615_v27 = vld [vmem:[#allocation20_spill] sm:$0xff] }
 0x1c3   : > { %1698 = vperm.xlu0 %4274, %v4596_v8   ;;  %v5253_v4 = vpop.permute.xlu0 %532  ;;  %v9604_v8 = vld [vmem:[#allocation12_spill] sm:$0xff] }
 0x1c4   : > { %v5250_v48 = vpop.permute.xlu1 %654  ;;  %4257 = vset.pattern.permute.xlu1 %v9550_v33 }
 0x1c5   : > { %9601 = vst [vmem:[#allocation23_spill] sm:$0xff] %v5250_v48  ;;  %1299 = vperm.xlu1 %4257, %v1212_v55   ;;  %v5295_v55 = vadd.f32 1.0, %v5033_v19  ;;  %v5312_v19 = vadd.f32 1.0, %v5073_v35  ;;  %v5330_v35 = vadd.f32 1.0, %v5147_v12 }
 0x1c7   : > { %1710 = vperm.xlu0 %4274, %v4601_v9   ;;  %v5270_v63 = vpop.permute.xlu0 %540  ;;  %v5298_v9 = vadd.f32 1.0, %v4949_v60  ;;  %v5319_v60 = vld [vmem:[%s4566_s27 + $0x78] sm:$0xff]  ;;  %9614 = vst [vmem:[#allocation13_spill] sm:$0xff] %v5330_v35 }
 0x1c8   : > { %9612 = vst [vmem:[#allocation12_spill] sm:$0xff] %v5319_v60 }
 0x1c9   : > { %v5256_v10 = vpop.permute.xlu1 %1229  ;;  %4258 = vset.pattern.permute.xlu1 %v9547_v18 }
 0x1ca   : > { %9602 = vst [vmem:[#allocation29_spill] sm:$0xff] %v5256_v10  ;;  %1490 = vperm.xlu1 %4258, %v9603_v20   ;;  %v1213_v10 = vrot.slane %v4883_v52, 6 }
 0x1cb   : > { %1722 = vperm.xlu0 %4274, %v4620_v14   ;;  %v480_v14 = vmax.f32 %v9611_v61, %v4913_v21  ;;  %v5339_v11 = vpop.permute.xlu0 %548 }
 0x1cc   : > { %9616 = vst [vmem:[#allocation14_spill] sm:$0xff] %v5339_v11  ;;  %v5377_v11 = vadd.f32 1.0, %v5160_v2  ;;  %v5382_v48 = vsub.f32 %v4883_v52, %v1213_v10  ;;  %v9629_v52 = vmax.f32 %v9604_v8, %v4911_v40 }
 0x1cd   : > { %v5290_v20 = vpop.permute.xlu1 %1259 }
 0x1ce   : > { %9610 = vst [vmem:[#allocation10_spill] sm:$0xff] %v5290_v20  ;;  %4259 = vset.pattern.permute.xlu1 %v9552_v32  ;;  %v570_v20 = vmin.f32 %v5204_v41, %v4921_v34  ;;  %v798_v41 = vmin.f32 %v4927_v26, %v4947_v42  ;;  %v684_v26 = vmax.f32 %v9590_v56, %v4936_v0  ;;  %9623 = vst [vmem:[#allocation70_spill] sm:$0xff] %v5377_v11 }
 0x1cf   : > { %1586 = vperm.xlu1 %4259, %v5315_v50   ;;  %1734 = vperm.xlu0 %4274, %v5319_v60   ;;  %v9618_v60 = vld [vmem:[#allocation21_spill] sm:$0xff]  ;;  %9624 = vst [vmem:[#allocation71_spill] sm:$0xff] %v5382_v48  ;;  %v5402_v10 = vsub.f32 %v575_v5, %v9629_v52 }
 0x1d0   : > { %v593_v33 = vmin.f32 %v9618_v60, %v4918_v47  ;;  %v594_v12 = vmin.f32 %v9618_v60, %v4921_v34  ;;  %v5374_v60 = vadd.f32 1.0, %v5158_v31  ;;  %v804_v31 = vmin.f32 %v4967_v22, %v4947_v42 }
 0x1d1   : > { %v5341_v61 = vpop.permute.xlu1 %1269 }
 0x1d2   : > { %9617 = vst [vmem:[#allocation15_spill] sm:$0xff] %v5341_v61  ;;  %v5367_v61 = vsub.f32 %v570_v20, %v456_v6  ;;  %9622 = vst [vmem:[#allocation69_spill] sm:$0xff] %v5374_v60  ;;  %v5387_v6 = vadd.f32 1.0, %v5165_v25  ;;  %v5389_v29 = vsub.f32 %v593_v33, %v479_v44  ;;  %v5391_v20 = vsub.f32 %v798_v41, %v684_v26  ;;  %v5416_v41 = vld [vmem:[%s4566_s27 + $0x58] sm:$0xff] }
 0x1d3   : > { %4260 = vset.pattern.permute.xlu1 %v9546_v36  ;;  %4277 = vset.pattern.permute.xlu0 %v9548_v49  ;;  %v5395_v2 = vsub.f32 %v594_v12, %v480_v14  ;;  %v1216_v25 = vadd.f32 1.0, %v5382_v48  ;;  %v9631_v14 = vmax.f32 %v9604_v8, %v4913_v21  ;;  %v9634_v33 = vld [vmem:[#allocation22_spill] sm:$0xff]  ;;  %v9640_v60 = vmax.f32 %v9615_v27, %v4911_v40 }
 0x1d4   : > { %1714 = vperm.xlu1 %4260, %v5315_v50   ;;  %9620 = vst [vmem:[#allocation20_spill] sm:$0xff] %v5367_v61  ;;  %9626 = vst [vmem:[#allocation73_spill] sm:$0xff] %v5387_v6  ;;  %v2846_v22 = vmax.f32 %v5367_v61, 0.0  ;;  %v598_v8 = vmin.f32 %v9634_v33, %v4921_v34  ;;  %v5436_v26 = vadd.f32 1.0, %v5389_v29  ;;  %v808_v6 = vmin.f32 %v4975_v59, %v4947_v42 }
 0x1d5   : > { %9627 = vst [vmem:[#allocation74_spill] sm:$0xff] %v5395_v2  ;;  %v5413_v12 = vsub.f32 %v576_v58, %v9631_v14  ;;  %v2878_v58 = vmax.f32 %v5391_v20, 0.0  ;;  %v5439_v52 = vadd.f32 1.0, %v5395_v2 }
 0x1d6   : > { %v5371_v39 = vpop.permute.xlu0 %1224  ;;  %v5384_v56 = vpop.permute.xlu1 %1686  ;;  %9636 = vst [vmem:[#allocation77_spill] sm:$0xff] %v5436_v26 }
 0x1d7   : > { %9621 = vst [vmem:[#allocation21_spill] sm:$0xff] %v5371_v39  ;;  %9625 = vst [vmem:[#allocation72_spill] sm:$0xff] %v5384_v56  ;;  %v9628_v39 = vld [vmem:[#allocation25_spill] sm:$0xff]  ;;  %v2852_v56 = vmax.f32 %v5413_v12, 0.0 }
 0x1d8   : > { %v689_v35 = vmax.f32 %v9628_v39, %v4934_v57  ;;  %9630 = vst [vmem:[#allocation25_spill] sm:$0xff] %v5402_v10  ;;  %4261 = vset.pattern.permute.xlu1 %v9547_v18  ;;  %v690_v44 = vmax.f32 %v9628_v39, %v4936_v0  ;;  %9632 = vst [vmem:[#allocation75_spill] sm:$0xff] %v5413_v12  ;;  %v597_v39 = vmin.f32 %v9634_v33, %v4918_v47 }
 0x1d9   : > { %1494 = vperm.xlu1 %4261, %v5416_v41   ;;  %9637 = vst [vmem:[#allocation78_spill] sm:$0xff] %v5439_v52  ;;  %v579_v33 = vmin.f32 %v5230_v13, %v4918_v47 }
 0x1da   : > { %v5419_v5 = vpop.permute.xlu0 %1234  ;;  %v5425_v48 = vsub.f32 %v803_v38, %v689_v35  ;;  %v5431_v14 = vsub.f32 %v804_v31, %v690_v44  ;;  %v2851_v35 = vmax.f32 %v5402_v10, 0.0  ;;  %v4034_v38 = vrot.slane %v1216_v25, 9 }
 0x1db   : > { %9633 = vst [vmem:[#allocation76_spill] sm:$0xff] %v5419_v5  ;;  %v5433_v45 = vpop.permute.xlu1 %1562  ;;  %v580_v31 = vmin.f32 %v5230_v13, %v4921_v34  ;;  %v5457_v11 = vsub.f32 %v597_v39, %v9640_v60  ;;  %v9642_v13 = vmax.f32 %v9615_v27, %v4913_v21  ;;  %v9644_v39 = vld [vmem:[#allocation26_spill] sm:$0xff] }
 0x1dc   : > { %9635 = vst [vmem:[#allocation22_spill] sm:$0xff] %v5433_v45  ;;  %v5450_v45 = vmul.f32 %v2878_v58, %v2846_v22  ;;  %v2883_v12 = vmax.f32 %v5425_v48, 0.0  ;;  %v2884_v22 = vmax.f32 %v5431_v14, 0.0  ;;  %v807_v58 = vmin.f32 %v4975_v59, %v4945_v17 }
 0x1dd   : > { %4262 = vset.pattern.permute.xlu1 %v9548_v49  ;;  %9641 = vst [vmem:[#allocation81_spill] sm:$0xff] %v5457_v11  ;;  %v5464_v10 = vsub.f32 %v598_v8, %v9642_v13  ;;  %v693_v5 = vmax.f32 %v9644_v39, %v4934_v57  ;;  %v694_v8 = vmax.f32 %v9644_v39, %v4936_v0 }
 0x1de   : > { %v5448_v44 = vpop.permute.xlu0 %1239  ;;  %9639 = vst [vmem:[#allocation80_spill] sm:$0xff] %v5450_v45  ;;  %1842 = vperm.xlu1 %4262, %v5315_v50   ;;  %v1221_v50 = vmul.f32 %v4034_v38, %v1216_v25  ;;  %v5477_v27 = vmul.f32 %v2883_v12, %v2851_v35  ;;  %v9647_v13 = vmax.f32 %v9605_v24, %v4911_v40  ;;  %v5497_v35 = vadd.f32 1.0, %v5457_v11  ;;  %v9654_v38 = vld [vmem:[#allocation28_spill] sm:$0xff] }
 0x1df   : > { %9638 = vst [vmem:[#allocation79_spill] sm:$0xff] %v5448_v44  ;;  %9643 = vst [vmem:[#allocation82_spill] sm:$0xff] %v5464_v10  ;;  %v9649_v59 = vmax.f32 %v9605_v24, %v4913_v21  ;;  %v5493_v25 = vmul.f32 %v2884_v22, %v2852_v56  ;;  %v299_v39 = vadd.s32 16, %v9654_v38  ;;  %v5505_v24 = vadd.f32 1.0, %v5464_v10 }
 0x1e0   : > { %v5475_v45 = vpop.permute.xlu1 %1814  ;;  %9646 = vst [vmem:[#allocation83_spill] sm:$0xff] %v5477_v27  ;;  %v5484_v44 = vsub.f32 %v579_v33, %v9647_v13  ;;  %9653 = vst [vmem:[#allocation88_spill] sm:$0xff] %v5497_v35  ;;  %v9655_v27 = vlaneseq  ;;  %v935_v33 = vsub.f32 %v807_v58, %v693_v5  ;;  %v5509_v56 = vstv %s4033_s4 }
 0x1e1   : > { %9645 = vst [vmem:[#allocation26_spill] sm:$0xff] %v5475_v45  ;;  %v5489_v60 = vsub.f32 %v580_v31, %v9649_v59  ;;  %9652 = vst [vmem:[#allocation87_spill] sm:$0xff] %v5493_v25  ;;  %v936_v31 = vsub.f32 %v808_v6, %v694_v8  ;;  %v1306_v59 = vrot.slane %v1221_v50, %v4886_v1  ;;  %v9660_v25 = vld [vmem:[#allocation27_spill] sm:$0xff]  ;;  %v961_v13 = vadd.f32 1.0, %v4963_v43 }
 0x1e2   : > { %9648 = vst [vmem:[#allocation84_spill] sm:$0xff] %v5484_v44  ;;  %v5491_v26 = vpop.permute.xlu0 %1244  ;;  %v5501_v45 = vand.u32 127, %v9655_v27  ;;  %4263 = vset.pattern.permute.xlu1 %v9546_v36  ;;  %9657 = vst [vmem:[#allocation90_spill] sm:$0xff] %v5505_v24  ;;  %v9659_v27 = vld [vmem:[#allocation31_spill] sm:$0xff]  ;;  %v697_v35 = vmax.f32 %v9660_v25, %v4934_v57  ;;  %v698_v5 = vmax.f32 %v9660_v25, %v4936_v0  ;;  %v2855_v6 = vmax.f32 %v5484_v44, 0.0  ;;  %v9662_v24 = vld [vmem:[#allocation34_spill] sm:$0xff] }
 0x1e3   : > { %9650 = vst [vmem:[#allocation85_spill] sm:$0xff] %v5489_v60  ;;  %9651 = vst [vmem:[#allocation86_spill] sm:$0xff] %v5491_v26  ;;  %1718 = vperm.xlu1 %4263, %v5416_v41   ;;  %v1310_v12 = vrot.slane %v1221_v50, %v9659_v27  ;;  %v2856_v58 = vmax.f32 %v5489_v60, 0.0  ;;  %v962_v26 = vadd.f32 1.0, %v9662_v24  ;;  %v5529_v50 = vadd.s32 %v5509_v56, %v299_v39  ;;  %v9665_v44 = vld [vmem:[#allocation37_spill] sm:$0xff] }
 0x1e4   : > { %9656 = vst [vmem:[#allocation89_spill] sm:$0xff] %v5501_v45  ;;  %9658 = vst [vmem:[#allocation91_spill] sm:$0xff] %v5509_v56  ;;  %v5532_v27 = vadd.s32 128, %v5501_v45  ;;  %v2887_v25 = vmax.f32 %v935_v33, 0.0  ;;  %v2888_v52 = vmax.f32 %v936_v31, 0.0  ;;  %v811_v60 = vmin.f32 %v9665_v44, %v4945_v17 }
 0x1e5   : > { %v5522_v8 = vpop.permute.xlu1 %772  ;;  %9663 = vst [vmem:[#allocation34_spill] sm:$0xff] %v5529_v50  ;;  %v812_v10 = vmin.f32 %v9665_v44, %v4947_v42  ;;  %v5540_v43 = vadd.f32 1.0, %v5208_v37  ;;  %v5543_v24 = vadd.f32 1.0, %v5391_v20  ;;  %v5546_v39 = vrot.slane %v1306_v59, %v4886_v1  ;;  %v9668_v50 = vld [vmem:[#allocation32_spill] sm:$0xff] }
 0x1e6   : > { %v5524_v22 = vpop.permute.xlu0 %1249  ;;  %9664 = vst [vmem:[#allocation92_spill] sm:$0xff] %v5532_v27  ;;  %v5549_v45 = vrot.slane %v1310_v12, %v4886_v1  ;;  %v701_v27 = vmax.f32 %v9668_v50, %v4934_v57  ;;  %v702_v44 = vmax.f32 %v9668_v50, %v4936_v0  ;;  %v5558_v37 = vmul.f32 %v2887_v25, %v2855_v6  ;;  %v9672_v12 = vld [vmem:[#allocation38_spill] sm:$0xff] }
 0x1e7   : > { %9661 = vst [vmem:[#allocation27_spill] sm:$0xff] %v5524_v22  ;;  %4264 = vset.pattern.permute.xlu1 %v9552_v32  ;;  %9666 = vst [vmem:[#allocation37_spill] sm:$0xff] %v5546_v39  ;;  %v4379_v22 = vld [vmem:[%s4566_s27 + $0x60] sm:$0xff]  ;;  %v5560_v20 = vmul.f32 %v2888_v52, %v2856_v58  ;;  %v993_v11 = vmax.f32 %v961_v13, 0.0  ;;  %v994_v59 = vmax.f32 %v962_v26, 0.0  ;;  %v5563_v39 = vadd.f32 1.0, %v5425_v48 }
 0x1e8   : > { %9667 = vst [vmem:[#allocation93_spill] sm:$0xff] %v5549_v45  ;;  %1594 = vperm.xlu1 %4264, %v4379_v22   ;;  %9670 = vst [vmem:[#allocation94_spill] sm:$0xff] %v5558_v37  ;;  %v815_v22 = vmin.f32 %v9672_v12, %v4945_v17  ;;  %v9674_v45 = vld [vmem:[#allocation33_spill] sm:$0xff]  ;;  %v5573_v6 = vsub.f32 %v811_v60, %v697_v35  ;;  %v5575_v52 = vsub.f32 %v812_v10, %v698_v5 }
 0x1e9   : > { %9671 = vst [vmem:[#allocation95_spill] sm:$0xff] %v5560_v20  ;;  %v705_v2 = vmax.f32 %v9674_v45, %v4934_v57  ;;  %v706_v50 = vmax.f32 %v9674_v45, %v4936_v0  ;;  %v5580_v13 = vadd.f32 1.0, %v5431_v14  ;;  %v5582_v58 = vadd.f32 1.0, %v935_v33 }
 0x1ea   : > { %v5556_v61 = vpop.permute.xlu0 %1254  ;;  %v5567_v1 = vpop.permute.xlu1 %1274  ;;  %v5585_v25 = vadd.f32 1.0, %v936_v31  ;;  %v816_v45 = vmin.f32 %v9672_v12, %v4947_v42  ;;  %v583_v10 = vmin.f32 %v5236_v16, %v4918_v47  ;;  %v584_v60 = vmin.f32 %v5236_v16, %v4921_v34 }
 0x1eb   : > { %9669 = vst [vmem:[#allocation32_spill] sm:$0xff] %v5556_v61  ;;  %9673 = vst [vmem:[#allocation38_spill] sm:$0xff] %v5567_v1  ;;  %v5597_v33 = vsub.f32 %v815_v22, %v701_v27  ;;  %v9679_v31 = vmax.f32 %v5298_v9, 0.0  ;;  %v9681_v12 = vmax.f32 %v5301_v54, 0.0  ;;  %v5608_v26 = vadd.f32 1.0, %v5573_v6  ;;  %v9694_v61 = vld [vmem:[#allocation46_spill] sm:$0xff] }
 0x1ec   : > { %9675 = vst [vmem:[#allocation33_spill] sm:$0xff] %v5580_v13  ;;  %9676 = vst [vmem:[#allocation96_spill] sm:$0xff] %v5582_v58  ;;  %4265 = vset.pattern.permute.xlu1 %v9548_v49  ;;  %v5611_v16 = vadd.f32 1.0, %v5575_v52  ;;  %v2892_v22 = vmax.f32 %v5575_v52, 0.0  ;;  %v965_v1 = vadd.f32 1.0, %v9694_v61  ;;  %v9706_v13 = vmax.f32 %v5288_v3, 0.0 }
 0x1ed   : > { %9677 = vst [vmem:[#allocation97_spill] sm:$0xff] %v5585_v25  ;;  %1846 = vperm.xlu1 %4265, %v5416_v41   ;;  %v5601_v5 = vmul.f32 %v993_v11, %v9679_v31  ;;  %v5605_v48 = vmul.f32 %v994_v59, %v9681_v12  ;;  %9683 = vst [vmem:[#allocation101_spill] sm:$0xff] %v5608_v26  ;;  %v9685_v41 = vld [vmem:[#allocation39_spill] sm:$0xff]  ;;  %v5623_v59 = vadd.s32 %v5509_v56, %v9654_v38  ;;  %v9712_v3 = vld [vmem:[#allocation57_spill] sm:$0xff] }
 0x1ee   : > { %v5594_v35 = vpop.permute.xlu0 %1264  ;;  %9684 = vst [vmem:[#allocation102_spill] sm:$0xff] %v5611_v16  ;;  %v819_v20 = vmin.f32 %v9685_v41, %v4945_v17  ;;  %v820_v27 = vmin.f32 %v9685_v41, %v4947_v42  ;;  %v5626_v31 = vsub.f32 %v816_v45, %v702_v44  ;;  %v9688_v12 = vmax.f32 %v9606_v51, %v4911_v40 }
 0x1ef   : > { %9678 = vst [vmem:[#allocation98_spill] sm:$0xff] %v5594_v35  ;;  %9680 = vst [vmem:[#allocation99_spill] sm:$0xff] %v5601_v5  ;;  %v5617_v9 = vpop.permute.xlu1 %1470  ;;  %v9689_v41 = vmax.f32 %v9606_v51, %v4913_v21  ;;  %v2891_v11 = vmax.f32 %v5573_v6, 0.0  ;;  %v5644_v44 = vadd.f32 1.0, %v5597_v33  ;;  %v587_v45 = vmin.f32 %v5244_v15, %v4918_v47  ;;  %v9692_v6 = vld [vmem:[#allocation43_spill] sm:$0xff] }
 0x1f0   : > { %9682 = vst [vmem:[#allocation100_spill] sm:$0xff] %v5605_v48  ;;  %9686 = vst [vmem:[#allocation39_spill] sm:$0xff] %v5617_v9  ;;  %v5631_v14 = vsub.f32 %v583_v10, %v9688_v12  ;;  %v5649_v10 = vld [vmem:[%s4566_s27 + $0x68] sm:$0xff]  ;;  %v5654_v12 = vsub.f32 %v819_v20, %v705_v2  ;;  %v959_v52 = vadd.f32 1.0, %v9692_v6  ;;  %v588_v48 = vmin.f32 %v5244_v15, %v4921_v34  ;;  %v9696_v51 = vld [vmem:[#allocation47_spill] sm:$0xff] }
 0x1f1   : > { %9687 = vst [vmem:[#allocation103_spill] sm:$0xff] %v5623_v59  ;;  %v5636_v37 = vsub.f32 %v584_v60, %v9689_v41  ;;  %4266 = vset.pattern.permute.xlu1 %v9547_v18  ;;  %9691 = vst [vmem:[#allocation105_spill] sm:$0xff] %v5644_v44  ;;  %v5656_v41 = vsub.f32 %v820_v27, %v706_v50  ;;  %v5666_v58 = vadd.f32 1.0, %v5626_v31  ;;  %v966_v60 = vadd.f32 1.0, %v9696_v51 }
 0x1f2   : > { %v5639_v54 = vpop.permute.xlu0 %1279  ;;  %1502 = vperm.xlu1 %4266, %v5649_v10   ;;  %v2859_v2 = vmax.f32 %v5631_v14, 0.0  ;;  %v2895_v61 = vmax.f32 %v5597_v33, 0.0  ;;  %v9698_v15 = vmax.f32 %v9607_v23, %v4911_v40  ;;  %v5683_v51 = vadd.f32 1.0, %v5654_v12 }
 0x1f3   : > { %9690 = vst [vmem:[#allocation104_spill] sm:$0xff] %v5639_v54  ;;  %v9693_v54 = vld [vmem:[#allocation44_spill] sm:$0xff]  ;;  %v2860_v20 = vmax.f32 %v5636_v37, 0.0  ;;  %v5686_v5 = vadd.f32 1.0, %v5656_v41  ;;  %v302_v33 = vadd.s32 40, %v9654_v38  ;;  %v997_v9 = vmax.f32 %v965_v1, 0.0 }
 0x1f4   : > { %v960_v35 = vadd.f32 1.0, %v9693_v54  ;;  %v5663_v25 = vpop.permute.xlu1 %1566  ;;  %v2896_v54 = vmax.f32 %v5626_v31, 0.0  ;;  %v5679_v6 = vsub.f32 %v587_v45, %v9698_v15  ;;  %9699 = vst [vmem:[#allocation46_spill] sm:$0xff] %v5683_v51  ;;  %v991_v31 = vmax.f32 %v959_v52, 0.0  ;;  %v9745_v51 = vld [vmem:[#allocation56_spill] sm:$0xff] }
 0x1f5   : > { %9695 = vst [vmem:[#allocation43_spill] sm:$0xff] %v5663_v25  ;;  %9700 = vst [vmem:[#allocation47_spill] sm:$0xff] %v5686_v5  ;;  %v9701_v45 = vmax.f32 %v9607_v23, %v4913_v21  ;;  %v998_v44 = vmax.f32 %v966_v60, 0.0  ;;  %v970_v25 = vadd.f32 1.0, %v5134_v28  ;;  %v5699_v26 = vmul.f32 %v2891_v11, %v2859_v2 }
 0x1f6   : > { %v5671_v50 = vpop.permute.xlu0 %1294  ;;  %4267 = vset.pattern.permute.xlu1 %v9552_v32  ;;  %v992_v27 = vmax.f32 %v960_v35, 0.0  ;;  %v2863_v35 = vmax.f32 %v5679_v6, 0.0  ;;  %v5722_v1 = vmul.f32 %v991_v31, %v9706_v13  ;;  %v9710_v2 = vmax.f32 %v5312_v19, 0.0 }
 0x1f7   : > { %9697 = vst [vmem:[#allocation44_spill] sm:$0xff] %v5671_v50  ;;  %v969_v50 = vadd.f32 1.0, %v5132_v30  ;;  %1598 = vperm.xlu1 %4267, %v5649_v10   ;;  %v5694_v15 = vsub.f32 %v588_v48, %v9701_v45  ;;  %9702 = vst [vmem:[#allocation106_spill] sm:$0xff] %v5699_v26  ;;  %v5701_v30 = vmul.f32 %v2892_v22, %v2860_v20  ;;  %v9704_v48 = vld [vmem:[#allocation40_spill] sm:$0xff]  ;;  %v1002_v52 = vmax.f32 %v970_v25, 0.0 }
 0x1f8   : > { %v823_v60 = vmin.f32 %v9704_v48, %v4945_v17  ;;  %v824_v28 = vmin.f32 %v9704_v48, %v4947_v42  ;;  %v5715_v22 = vadd.s32 %v5509_v56, %v302_v33  ;;  %v9708_v33 = vmax.f32 %v5309_v7, 0.0 }
 0x1f9   : > { %v5697_v16 = vpop.permute.xlu1 %662  ;;  %9703 = vst [vmem:[#allocation107_spill] sm:$0xff] %v5701_v30  ;;  %v1001_v11 = vmax.f32 %v969_v50, 0.0  ;;  %v2864_v45 = vmax.f32 %v5694_v15, 0.0  ;;  %v9707_v50 = vmax.f32 %v5295_v55, 0.0  ;;  %v5735_v20 = vmul.f32 %v998_v44, %v9710_v2 }
 0x1fa   : > { %9705 = vst [vmem:[#allocation40_spill] sm:$0xff] %v5715_v22  ;;  %v5731_v30 = vmul.f32 %v997_v9, %v9708_v33  ;;  %v5738_v26 = vadd.f32 1.0, %v5140_v53  ;;  %v707_v13 = vmax.f32 %v9712_v3, %v4934_v57  ;;  %v821_v25 = vmin.f32 %v5212_v62, %v4945_v17  ;;  %v9715_v9 = vld [vmem:[#allocation54_spill] sm:$0xff] }
 0x1fb   : > { %v5707_v23 = vpop.permute.xlu0 %1802  ;;  %4269 = vset.pattern.permute.xlu1 %v9546_v36  ;;  %v5727_v48 = vmul.f32 %v992_v27, %v9707_v50  ;;  %9711 = vst [vmem:[#allocation109_spill] sm:$0xff] %v5735_v20  ;;  %v5746_v7 = vmul.f32 %v2895_v61, %v2863_v35  ;;  %v5749_v31 = vadd.f32 1.0, %v9715_v9  ;;  %v708_v19 = vmax.f32 %v9712_v3, %v4936_v0 }
 0x1fc   : > { %1726 = vperm.xlu1 %4269, %v5649_v10   ;;  %9709 = vst [vmem:[#allocation108_spill] sm:$0xff] %v5731_v30  ;;  %v9716_v53 = vmax.f32 %v5327_v46, 0.0  ;;  %v5758_v2 = vadd.s32 24, %v9654_v38  ;;  %v822_v50 = vmin.f32 %v5212_v62, %v4947_v42  ;;  %v591_v61 = vmin.f32 %v5253_v4, %v4918_v47  ;;  %v9719_v62 = vld [vmem:[#allocation13_spill] sm:$0xff] }
 0x1fd   : > { %9714 = vst [vmem:[#allocation110_spill] sm:$0xff] %v5746_v7  ;;  %v592_v35 = vmin.f32 %v5253_v4, %v4921_v34  ;;  %v5767_v33 = vmul.f32 %v2896_v54, %v2864_v45  ;;  %v595_v46 = vmin.f32 %v5270_v63, %v4918_v47  ;;  %v825_v3 = vmin.f32 %v5522_v8, %v4945_v17  ;;  %v5780_v7 = vld [vmem:[%s4566_s27 + $0x70] sm:$0xff]  ;;  %v9722_v54 = vld [vmem:[#allocation23_spill] sm:$0xff] }
 0x1fe   : > { %v777_v55 = vpop.permute.xlu1 %776  ;;  %v5755_v44 = vmul.f32 %v1001_v11, %v9716_v53  ;;  %v596_v11 = vmin.f32 %v5270_v63, %v4921_v34  ;;  %v9720_v9 = vmax.f32 %v9719_v62, 0.0  ;;  %v5784_v4 = vsub.f32 %v821_v25, %v707_v13 }
 0x1ff   : > { %v5744_v27 = vpop.permute.xlu0 %1818  ;;  %9718 = vst [vmem:[#allocation111_spill] sm:$0xff] %v5767_v33  ;;  %v709_v45 = vmax.f32 %v9722_v54, %v4934_v57  ;;  %v710_v63 = vmax.f32 %v9722_v54, %v4936_v0  ;;  %v826_v13 = vmin.f32 %v5522_v8, %v4947_v42  ;;  %v827_v20 = vmin.f32 %v777_v55, %v4945_v17 }
 0x200   : > { %9713 = vst [vmem:[#allocation57_spill] sm:$0xff] %v5744_v27  ;;  %9717 = vst [vmem:[#allocation54_spill] sm:$0xff] %v5755_v44  ;;  %4270 = vset.pattern.permute.xlu1 %v9547_v18  ;;  %v5777_v53 = vmul.f32 %v1002_v52, %v9720_v9  ;;  %v9724_v52 = vld [vmem:[#allocation59_spill] sm:$0xff]  ;;  %v5801_v18 = vsub.f32 %v822_v50, %v708_v19  ;;  %vm9395_vm12 = vcmp.lt.s32.totalorder %v5623_v59, 200 }
 0x201   : > { %1506 = vperm.xlu1 %4270, %v5780_v7   ;;  %v711_v9 = vmax.f32 %v9724_v52, %v4934_v57  ;;  %v712_v27 = vmax.f32 %v9724_v52, %v4936_v0  ;;  %v9729_v52 = vld [vmem:[#allocation17_spill] sm:$0xff] }
 0x202   : > { %9721 = vst [vmem:[#allocation13_spill] sm:$0xff] %v5777_v53  ;;  %v9725_v53 = vld [vmem:[#allocation16_spill] sm:$0xff]  ;;  %v9730_v30 = vmax.f32 %v9729_v52, %v4911_v40  ;;  %v9732_v19 = vmax.f32 %v9729_v52, %v4913_v21 }
 0x203   : > { %v5790_v33 = vpop.permute.xlu0 %1826  ;;  %v5799_v25 = vpop.permute.xlu1 %1694  ;;  %v9726_v54 = vmax.f32 %v9725_v53, %v4911_v40  ;;  %v9728_v62 = vmax.f32 %v9725_v53, %v4913_v21  ;;  %v5824_v5 = vsub.f32 %v825_v3, %v711_v9  ;;  %v5829_v53 = vsub.f32 %v823_v60, %v709_v45 }
 0x204   : > { %9723 = vst [vmem:[#allocation23_spill] sm:$0xff] %v5790_v33  ;;  %v5817_v8 = vsub.f32 %v595_v46, %v9730_v30  ;;  %v5822_v50 = vsub.f32 %v596_v11, %v9732_v19  ;;  %v713_v30 = vmax.f32 %v5697_v16, %v4934_v57  ;;  %v9738_v11 = vld [vmem:[#allocation14_spill] sm:$0xff]  ;;  %v5842_v9 = vsub.f32 %v826_v13, %v712_v27 }
 0x205   : > { %v5806_v44 = vsub.f32 %v591_v61, %v9726_v54  ;;  %v5811_v33 = vsub.f32 %v592_v35, %v9728_v62  ;;  %9734 = vst [vmem:[#allocation112_spill] sm:$0xff] %v5824_v5  ;;  %v828_v61 = vmin.f32 %v777_v55, %v4947_v42  ;;  %4272 = vset.pattern.permute.xlu1 %v9548_v49  ;;  %v2901_v35 = vmax.f32 %v5784_v4, 0.0 }
 0x206   : > { %9731 = vst [vmem:[#allocation16_spill] sm:$0xff] %v5817_v8  ;;  %9733 = vst [vmem:[#allocation17_spill] sm:$0xff] %v5822_v50  ;;  %v5831_v62 = vsub.f32 %v824_v28, %v710_v63  ;;  %1854 = vperm.xlu1 %4272, %v5649_v10   ;;  %v599_v3 = vmin.f32 %v9738_v11, %v4918_v47  ;;  %v600_v55 = vmin.f32 %v9738_v11, %v4921_v34  ;;  %v9744_v11 = vld [vmem:[#allocation55_spill] sm:$0xff] }
 0x207   : > { %9727 = vst [vmem:[#allocation59_spill] sm:$0xff] %v5806_v44  ;;  %9735 = vst [vmem:[#allocation113_spill] sm:$0xff] %v5829_v53  ;;  %v5836_v46 = vpop.permute.xlu0 %1838  ;;  %v714_v60 = vmax.f32 %v5697_v16, %v4936_v0  ;;  %v2902_v28 = vmax.f32 %v5801_v18, 0.0  ;;  %v2867_v45 = vmax.f32 %v5806_v44, 0.0  ;;  %v2868_v63 = vmax.f32 %v5811_v33, 0.0  ;;  %v9743_v16 = vld [vmem:[#allocation42_spill] sm:$0xff] }
 0x208   : > { %9736 = vst [vmem:[#allocation114_spill] sm:$0xff] %v5831_v62  ;;  %9737 = vst [vmem:[#allocation115_spill] sm:$0xff] %v5836_v46  ;;  %v5849_v10 = vsub.f32 %v827_v20, %v713_v30  ;;  %v5851_v54 = vpop.permute.xlu1 %1474  ;;  %v2871_v52 = vmax.f32 %v5817_v8, 0.0  ;;  %v2872_v19 = vmax.f32 %v5822_v50, 0.0  ;;  %v2905_v27 = vmax.f32 %v5824_v5, 0.0  ;;  %v9754_v8 = vld [vmem:[#allocation41_spill] sm:$0xff] }
 0x209   : > { %9739 = vst [vmem:[#allocation14_spill] sm:$0xff] %v5842_v9  ;;  %9741 = vst [vmem:[#allocation117_spill] sm:$0xff] %v5851_v54  ;;  %v5856_v13 = vsub.f32 %v828_v61, %v714_v60  ;;  %vm1609_vm0 = vcmp.eq.f32.partialorder %v9743_v16, %v4934_v57  ;;  %v977_v46 = vadd.f32 1.0, %v9744_v11  ;;  %v978_v44 = vadd.f32 1.0, %v9745_v51  ;;  %v9747_v61 = vld [vmem:[#allocation19_spill] sm:$0xff] }
 0x20a   : > { %9740 = vst [vmem:[#allocation116_spill] sm:$0xff] %v5849_v10  ;;  %v2903_v20 = vmax.f32 %v5829_v53, 0.0  ;;  %v2904_v30 = vmax.f32 %v5831_v62, 0.0  ;;  %4273 = vset.pattern.permute.xlu1 %v9546_v36  ;;  %vm1610_vm1 = vcmp.eq.f32.partialorder %v9743_v16, %v4936_v0  ;;  %v9748_v60 = vmax.f32 %v9747_v61, %v4911_v40  ;;  %v9755_v62 = vld [vmem:[#allocation50_spill] sm:$0xff] }
 0x20b   : > { %9742 = vst [vmem:[#allocation118_spill] sm:$0xff] %v5856_v13  ;;  %v5865_v54 = vpop.permute.xlu0 %1850  ;;  %v9750_v11 = vmax.f32 %v9747_v61, %v4913_v21  ;;  %v2906_v50 = vmax.f32 %v5842_v9, 0.0  ;;  %1730 = vperm.xlu1 %4273, %v5780_v7   ;;  %v9752_v36 = vmax.f32 %v5389_v29, 0.0  ;;  %vm1513_vm2 = vcmp.eq.f32.partialorder %v9754_v8, %v4911_v40 }
 0x20c   : > { %9746 = vst [vmem:[#allocation42_spill] sm:$0xff] %v5865_v54  ;;  %v5872_v5 = vsub.f32 %v599_v3, %v9748_v60  ;;  %vm1737_vm3 = vcmp.eq.f32.partialorder %v9755_v62, %v4918_v47  ;;  %v2907_v3 = vmax.f32 %v5849_v10, 0.0  ;;  %v9756_v60 = vld [vmem:[#allocation74_spill] sm:$0xff]  ;;  %v9761_v29 = vmax.f32 %v5656_v41, 0.0  ;;  %vm1641_vm10 = vmand %vm1513_vm2, %vm1609_vm0 }
 0x20d   : > { %v5877_v51 = vsub.f32 %v600_v55, %v9750_v11  ;;  %v5883_v54 = vmul.f32 %v2901_v35, %v9752_v36  ;;  %v9757_v61 = vmax.f32 %v9756_v60, 0.0  ;;  %v9759_v11 = vmax.f32 %v5654_v12, 0.0  ;;  %v9766_v12 = vld [vmem:[#allocation81_spill] sm:$0xff]  ;;  %vm6016_vm15 = vmand %vm1641_vm10, %vm1737_vm3 }
 0x20e   : > { %9749 = vst [vmem:[#allocation55_spill] sm:$0xff] %v5872_v5  ;;  %v5900_v35 = vmul.f32 %v9761_v29, %v2868_v63  ;;  %vm1514_vm4 = vcmp.eq.f32.partialorder %v9754_v8, %v4913_v21  ;;  %vm1738_vm5 = vcmp.eq.f32.partialorder %v9755_v62, %v4921_v34  ;;  %v2908_v36 = vmax.f32 %v5856_v13, 0.0  ;;  %v9769_v63 = vld [vmem:[#allocation58_spill] sm:$0xff]  ;;  %v9833_v8 = vld [vmem:[#allocation15_spill] sm:$0xff] }
 0x20f   : > { %9751 = vst [vmem:[#allocation56_spill] sm:$0xff] %v5877_v51  ;;  %9753 = vst [vmem:[#allocation19_spill] sm:$0xff] %v5883_v54  ;;  %v5892_v55 = vmul.f32 %v2902_v28, %v9757_v61  ;;  %v5896_v9 = vmul.f32 %v9759_v11, %v2867_v45  ;;  %v5907_v54 = vpop.permute.xlu1 %1822  ;;  %v5909_v28 = vmul.f32 %v2903_v20, %v2871_v52  ;;  %v9767_v45 = vmax.f32 %v9766_v12, 0.0  ;;  %v9770_v11 = vld [vmem:[#allocation11_spill] sm:$0xff]  ;;  %v9772_v52 = vld [vmem:[#allocation20_spill] sm:$0xff] }
 0x210   : > { %9762 = vst [vmem:[#allocation74_spill] sm:$0xff] %v5900_v35  ;;  %9763 = vst [vmem:[#allocation119_spill] sm:$0xff] %v5907_v54  ;;  %v5911_v60 = vmul.f32 %v2904_v30, %v2872_v19  ;;  %v1009_v41 = vmax.f32 %v977_v46, 0.0  ;;  %vm1613_vm6 = vcmp.eq.f32.partialorder %v9769_v63, %v4934_v57  ;;  %v861_v29 = vadd.f32 1.0, %v9770_v11  ;;  %v9773_v20 = vld [vmem:[#allocation25_spill] sm:$0xff]  ;;  %4275 = vset.pattern.permute.xlu1 %v9552_v32  ;;  %v5931_v12 = vpop.permute.xlu0 %1558  ;;  %v9775_v11 = vld [vmem:[#allocation75_spill] sm:$0xff] }
 0x211   : > { %9758 = vst [vmem:[#allocation41_spill] sm:$0xff] %v5892_v55  ;;  %9760 = vst [vmem:[#allocation50_spill] sm:$0xff] %v5896_v9  ;;  %v5915_v61 = vmul.f32 %v2905_v27, %v9767_v45  ;;  %v5922_v35 = vadd.s32 %v5509_v56, %v5758_v2  ;;  %vm1614_vm7 = vcmp.eq.f32.partialorder %v9769_v63, %v4936_v0  ;;  %v862_v19 = vadd.f32 1.0, %v9772_v52  ;;  %v9774_v45 = vld [vmem:[#allocation51_spill] sm:$0xff]  ;;  %v9781_v13 = vld [vmem:[#allocation82_spill] sm:$0xff] }
 0x212   : > { %9764 = vst [vmem:[#allocation120_spill] sm:$0xff] %v5909_v28  ;;  %9765 = vst [vmem:[#allocation121_spill] sm:$0xff] %v5911_v60  ;;  %v867_v30 = vadd.f32 1.0, %v9773_v20  ;;  %v2875_v27 = vmax.f32 %v5872_v5, 0.0  ;;  %v2876_v46 = vmax.f32 %v5877_v51, 0.0  ;;  %vm1517_vm8 = vcmp.eq.f32.partialorder %v9774_v45, %v4911_v40  ;;  %v9776_v60 = vld [vmem:[#allocation18_spill] sm:$0xff] }
 0x213   : > { %9768 = vst [vmem:[#allocation81_spill] sm:$0xff] %v5915_v61  ;;  %9771 = vst [vmem:[#allocation58_spill] sm:$0xff] %v5922_v35  ;;  %v1010_v2 = vmax.f32 %v978_v44, 0.0  ;;  %v868_v61 = vadd.f32 1.0, %v9775_v11  ;;  %v9777_v28 = vmax.f32 %v9776_v60, 0.0  ;;  %v9778_v52 = vmax.f32 %v5738_v26, 0.0 }
 0x214   : > { %v9780_v20 = vld [vmem:[#allocation12_spill] sm:$0xff]  ;;  %v304_v55 = vadd.s32 56, %v9654_v38  ;;  %vm1518_vm9 = vcmp.eq.f32.partialorder %v9774_v45, %v4913_v21  ;;  %v981_v32 = vadd.f32 1.0, %v5784_v4  ;;  %v9782_v10 = vmax.f32 %v9781_v13, 0.0  ;;  %vm1642_vm13 = vmand %vm1514_vm4, %vm1610_vm1  ;;  %v9825_v63 = vld [vmem:[#allocation67_spill] sm:$0xff] }
 0x215   : > { %v5940_v9 = vmul.f32 %v9778_v52, %v9777_v28  ;;  %1606 = vperm.xlu1 %4275, %v9780_v20   ;;  %v5951_v11 = vmul.f32 %v2907_v3, %v2875_v27  ;;  %v5953_v60 = vmul.f32 %v2908_v36, %v2876_v46  ;;  %v893_v26 = vmax.f32 %v861_v29, 0.0  ;;  %v9786_v52 = vld [vmem:[#allocation70_spill] sm:$0xff]  ;;  %v9794_v3 = vld [vmem:[#allocation84_spill] sm:$0xff]  ;;  %v5974_v29 = vpop.permute.xlu0 %1570  ;;  %vm6037_vm1 = vmand %vm1642_vm13, %vm1738_vm5 }
 0x216   : > { %v5949_v44 = vmul.f32 %v2906_v50, %v9782_v10  ;;  %v5956_v28 = vadd.f32 1.0, %v5801_v18  ;;  %v9787_v51 = vmax.f32 %v9786_v52, 0.0  ;;  %v9791_v4 = vmax.f32 %v5749_v31, 0.0  ;;  %v5968_v50 = vpop.permute.xlu1 %1284  ;;  %9795 = vst [vmem:[#allocation82_spill] sm:$0xff] %v5974_v29  ;;  %v9797_v31 = vld [vmem:[#allocation73_spill] sm:$0xff]  ;;  %vm1645_vm2 = vmand %vm1517_vm8, %vm1613_vm6  ;;  %v9872_v29 = vld [vmem:[#allocation96_spill] sm:$0xff] }
 0x217   : > { %9779 = vst [vmem:[#allocation11_spill] sm:$0xff] %v5940_v9  ;;  %9784 = vst [vmem:[#allocation25_spill] sm:$0xff] %v5951_v11  ;;  %v9789_v9 = vld [vmem:[#allocation69_spill] sm:$0xff]  ;;  %v894_v10 = vmax.f32 %v862_v19, 0.0  ;;  %v899_v13 = vmax.f32 %v867_v30, 0.0  ;;  %v5971_v36 = vadd.f32 1.0, %v9794_v3  ;;  %vm1865_vm5 = vcmp.eq.f32.partialorder %v5707_v23, %v4945_v17 }
 0x218   : > { %9783 = vst [vmem:[#allocation20_spill] sm:$0xff] %v5949_v44  ;;  %9785 = vst [vmem:[#allocation51_spill] sm:$0xff] %v5953_v60  ;;  %v5960_v5 = vmul.f32 %v1009_v41, %v9787_v51  ;;  %v9790_v53 = vmax.f32 %v9789_v9, 0.0  ;;  %v875_v18 = vadd.f32 1.0, %v5631_v14  ;;  %v900_v27 = vmax.f32 %v868_v61, 0.0  ;;  %v9796_v51 = vld [vmem:[#allocation85_spill] sm:$0xff] }
 0x219   : > { %9793 = vst [vmem:[#allocation12_spill] sm:$0xff] %v5968_v50  ;;  %v5977_v41 = vadd.f32 1.0, %v9796_v51  ;;  %v876_v9 = vadd.f32 1.0, %v5636_v37  ;;  %4276 = vset.pattern.permute.xlu1 %v9548_v49  ;;  %v1013_v14 = vmax.f32 %v981_v32, 0.0  ;;  %v9800_v61 = vld [vmem:[#allocation65_spill] sm:$0xff]  ;;  %v879_v19 = vadd.f32 1.0, %v5679_v6  ;;  %vm1646_vm3 = vmand %vm1518_vm9, %vm1614_vm7 }
 0x21a   : > { %9788 = vst [vmem:[#allocation75_spill] sm:$0xff] %v5960_v5  ;;  %v5966_v54 = vmul.f32 %v9791_v4, %v9790_v53  ;;  %v9798_v53 = vmax.f32 %v9797_v31, 0.0  ;;  %vm1741_vm11 = vcmp.eq.f32.partialorder %v9800_v61, %v4918_v47  ;;  %1858 = vperm.xlu1 %4276, %v5780_v7   ;;  %v5997_v37 = vadd.s32 %v5509_v56, %v304_v55  ;;  %v6032_v4 = vpop.permute.xlu0 %1582  ;;  %v9813_v51 = vld [vmem:[#allocation37_spill] sm:$0xff]  ;;  %v9834_v11 = vld [vmem:[#allocation43_spill] sm:$0xff] }
 0x21b   : > { %vm1742_vm14 = vcmp.eq.f32.partialorder %v9800_v61, %v4921_v34  ;;  %v880_v6 = vadd.f32 1.0, %v5694_v15  ;;  %v9802_v30 = vmax.f32 %v5540_v43, 0.0  ;;  %v907_v55 = vmax.f32 %v875_v18, 0.0  ;;  %9809 = vst [vmem:[#allocation85_spill] sm:$0xff] %v6032_v4  ;;  %vm6079_vm6 = vmand %vm1645_vm2, %vm1741_vm11  ;;  %v9826_v45 = vld [vmem:[#allocation101_spill] sm:$0xff]  ;;  %v9869_v3 = vld [vmem:[#allocation119_spill] sm:$0xff] }
 0x21c   : > { %9792 = vst [vmem:[#allocation18_spill] sm:$0xff] %v5966_v54  ;;  %v5982_v46 = vmul.f32 %v1010_v2, %v9798_v53  ;;  %9801 = vst [vmem:[#allocation69_spill] sm:$0xff] %v5997_v37  ;;  %v9805_v2 = vld [vmem:[#allocation92_spill] sm:$0xff]  ;;  %v9806_v32 = vmax.f32 %v5543_v24, 0.0  ;;  %v9807_v43 = vmax.f32 %v5563_v39, 0.0  ;;  %v908_v24 = vmax.f32 %v876_v9, 0.0 }
 0x21d   : > { %v6011_v7 = vmul.f32 %v9802_v30, %v893_v26  ;;  %vm9417_vm0 = vcmp.lt.s32.totalorder %v9805_v2, 200  ;;  %v6030_v26 = vpop.permute.xlu1 %1478  ;;  %v9814_v39 = vld [vmem:[#allocation33_spill] sm:$0xff]  ;;  %v911_v62 = vmax.f32 %v879_v19, 0.0  ;;  %v9821_v19 = vld [vmem:[#allocation68_spill] sm:$0xff]  ;;  %vm1519_vm7 = vcmp.eq.f32.partialorder %v9825_v63, %v4911_v40  ;;  %vm6101_vm11 = vmand %vm1646_vm3, %vm1742_vm14 }
 0x21e   : > { %9799 = vst [vmem:[#allocation70_spill] sm:$0xff] %v5982_v46  ;;  %v6024_v52 = vmul.f32 %v9806_v32, %v894_v10  ;;  %v6028_v15 = vmul.f32 %v9807_v43, %v899_v13  ;;  %v9812_v10 = vld [vmem:[#allocation29_spill] sm:$0xff]  ;;  %v9815_v13 = vmax.f32 %v9814_v39, 0.0  ;;  %1862 = vperm.xlu1 %4276, %v9780_v20   ;;  %vm1869_vm4 = vcmp.eq.f32.partialorder %v9821_v19, %v4945_v17  ;;  %v9822_v39 = vld [vmem:[#allocation10_spill] sm:$0xff] }
 0x21f   : > { %v1323_v31 = vadd.f32 %v9813_v51, %v9812_v10  ;;  %v9817_v30 = vld [vmem:[#allocation93_spill] sm:$0xff]  ;;  %vm1870_vm8 = vcmp.eq.f32.partialorder %v9821_v19, %v4947_v42  ;;  %vm1866_vm9 = vcmp.eq.f32.partialorder %v5707_v23, %v4947_v42  ;;  %vm1520_vm13 = vcmp.eq.f32.partialorder %v9825_v63, %v4913_v21  ;;  %vm6123_vm14 = vmand %vm6079_vm6, %vm1869_vm4 }
 0x220   : > { %9808 = vst [vmem:[#allocation84_spill] sm:$0xff] %v6028_v15  ;;  %v6046_v53 = vmul.f32 %v9815_v13, %v900_v27  ;;  %v1324_v32 = vadd.f32 %v9817_v30, %v9812_v10  ;;  %v9818_v43 = vld [vmem:[#allocation77_spill] sm:$0xff]  ;;  %v6062_v27 = vadd.s32 8, %v9654_v38  ;;  %v912_v10 = vmax.f32 %v880_v6, 0.0  ;;  %vm6141_vm4 = vmand %vm6016_vm15, %vm1865_vm5 }
 0x221   : > { %v9819_v9 = vmax.f32 %v9818_v43, 0.0  ;;  %v9827_v6 = vmax.f32 %v9826_v45, 0.0  ;;  %v1336_v43 = vadd.f32 %v9817_v30, %v9822_v39  ;;  %v1339_v60 = vadd.f32 %v9813_v51, %v9833_v8  ;;  %v6116_v61 = vpop.permute.xlu1 %1574  ;;  %vm6159_vm15 = vmand %vm6037_vm1, %vm1866_vm9 }
 0x222   : > { %9816 = vst [vmem:[#allocation73_spill] sm:$0xff] %v6046_v53  ;;  %vm1619_vm2 = vcmp.eq.f32.partialorder %v9834_v11, %v4934_v57  ;;  %vm1620_vm3 = vcmp.eq.f32.partialorder %v9834_v11, %v4936_v0  ;;  %vm6169_vm10 = vmand %vm6101_vm11, %vm1870_vm8  ;;  %vm1747_vm8 = vcmp.eq.f32.partialorder %v5799_v25, %v4918_v47  ;;  %vm1748_vm11 = vcmp.eq.f32.partialorder %v5799_v25, %v4921_v34 }
 0x223   : > { %v6058_v49 = vmul.f32 %v1013_v14, %v9819_v9  ;;  %v1335_v14 = vadd.f32 %v9813_v51, %v9822_v39  ;;  %v6089_v13 = vmul.f32 %v9827_v6, %v907_v55  ;;  %v6095_v9 = vpop.permute.xlu0 %1590  ;;  %v1355_v55 = vsub.f32 %v1323_v31, %v5722_v1  ;;  %v9831_v39 = vld [vmem:[#allocation102_spill] sm:$0xff]  ;;  %v9837_v31 = vld [vmem:[#allocation105_spill] sm:$0xff] }
 0x224   : > { %9828 = vst [vmem:[#allocation92_spill] sm:$0xff] %v6095_v9  ;;  %v9832_v45 = vmax.f32 %v9831_v39, 0.0  ;;  %v9838_v39 = vmax.f32 %v9837_v31, 0.0  ;;  %v1340_v9 = vadd.f32 %v9817_v30, %v9833_v8  ;;  %v9860_v50 = vmov 0 }
 0x225   : > { %9820 = vst [vmem:[#allocation65_spill] sm:$0xff] %v6058_v49  ;;  %v9843_v49 = vld [vmem:[#allocation39_spill] sm:$0xff]  ;;  %4278 = vrcp.f32 %v1355_v55  ;;  %vm1615_vm5 = vcmp.eq.f32.partialorder %v5931_v12, %v4934_v57  ;;  %v9871_v4 = vmax.f32 %v5971_v36, 0.0  ;;  %v9873_v54 = vmax.f32 %v9872_v29, 0.0 }
 0x226   : > { %v6110_v6 = vmul.f32 %v9832_v45, %v908_v24  ;;  %v1356_v24 = vsub.f32 %v1324_v32, %v5727_v48  ;;  %v6130_v45 = vmul.f32 %v9838_v39, %v911_v62  ;;  %v1367_v32 = vsub.f32 %v1335_v14, %v6089_v13  ;;  %v9842_v39 = vld [vmem:[#allocation21_spill] sm:$0xff]  ;;  %v9846_v14 = vld [vmem:[#allocation34_spill] sm:$0xff] }
 0x227   : > { %v9841_v62 = vmax.f32 %v5666_v58, 0.0  ;;  %v1321_v8 = vadd.f32 %v9813_v51, %v9842_v39  ;;  %vm1523_vm6 = vcmp.eq.f32.partialorder %v9843_v49, %v4911_v40  ;;  %v1322_v23 = vadd.f32 %v9817_v30, %v9842_v39  ;;  %v6188_v18 = vpop.permute.xlu0 %1602  ;;  %v10033_v39 = vld [vmem:[#allocation100_spill] sm:$0xff] }
 0x228   : > { %vm1524_vm1 = vcmp.eq.f32.partialorder %v9843_v49, %v4913_v21  ;;  %vm6181_vm9 = vmand %vm1523_vm6, %vm1619_vm2  ;;  %9851 = vst [vmem:[#allocation29_spill] sm:$0xff] %v6188_v18  ;;  %v1371_v19 = vsub.f32 %v1339_v60, %v6130_v45  ;;  %v9857_v60 = vld [vmem:[#allocation59_spill] sm:$0xff]  ;;  %4280 = vrcp.f32 %v1356_v24  ;;  %v6228_v24 = vpop.permute.xlu1 %1289  ;;  %v6266_v25 = vmul.f32 %v9873_v54, %v9871_v4  ;;  %v9878_v54 = vld [vmem:[#allocation97_spill] sm:$0xff] }
 0x229   : > { %v6148_v31 = vmul.f32 %v9841_v62, %v912_v10  ;;  %v1368_v10 = vsub.f32 %v1336_v43, %v6110_v6  ;;  %v9852_v43 = vld [vmem:[#allocation76_spill] sm:$0xff]  ;;  %vm6196_vm2 = vmand %vm1524_vm1, %vm1620_vm3  ;;  %v883_v55 = vadd.f32 1.0, %v9857_v60  ;;  %vm9397_vm3 = vmmov 1   ;;  %9863 = vst [vmem:[#allocation77_spill] sm:$0xff] %v6228_v24  ;;  %v9940_v18 = vld [vmem:[#allocation45_spill] sm:$0xff] }
 0x22a   : > { %v1325_v49 = vadd.f32 %v9813_v51, %v9852_v43  ;;  %vm6204_vm6 = vmand %vm9395_vm12, %vm9417_vm0  ;;  %4282 = vrcp.f32 %v1367_v32  ;;  %v1353_v20 = vsub.f32 %v1321_v8, %v6011_v7  ;;  %v1354_v60 = vsub.f32 %v1322_v23, %v6024_v52  ;;  %v9870_v23 = vld [vmem:[#allocation99_spill] sm:$0xff]  ;;  %9874 = vst [vmem:[#allocation68_spill] sm:$0xff] %v6266_v25  ;;  %v9916_v8 = vld [vmem:[#allocation16_spill] sm:$0xff] }
 0x22b   : > { %v1372_v11 = vsub.f32 %v1340_v9, %v6148_v31  ;;  %vm6215_vm1 = vmxor %vm6141_vm4, %vm9397_vm3  ;;  %v6231_v9 = vadd.f32 1.0, %v5811_v33  ;;  %4284 = vrcp.f32 %v1368_v10  ;;  %v9866_v33 = vld [vmem:[#allocation79_spill] sm:$0xff]  ;;  %v1326_v10 = vadd.f32 %v9817_v30, %v9852_v43 }
 0x22c   : > { %vm6222_vm12 = vmxor %vm6159_vm15, %vm9397_vm3  ;;  %vm1616_vm15 = vcmp.eq.f32.partialorder %v5931_v12, %v4936_v0  ;;  %v1327_v32 = vadd.f32 %v9813_v51, %v9866_v33  ;;  %4286 = vrcp.f32 %v1371_v19  ;;  %v1357_v24 = vsub.f32 %v1325_v49, %v9870_v23  ;;  %v6278_v19 = vpop.permute.xlu0 %1454 }
 0x22d   : > { %v9861_v50 = vsel %vm6222_vm12, 4294967295, %v9860_v50  ;;  %vm6239_vm4 = vmand %vm6181_vm9, %vm1747_vm8  ;;  %vm1875_vm9 = vcmp.eq.f32.partialorder %v9869_v3, %v4945_v17  ;;  %4288 = vrcp.f32 %v1372_v11  ;;  %v1328_v36 = vadd.f32 %v9817_v30, %v9866_v33  ;;  %v9883_v11 = vld [vmem:[#allocation78_spill] sm:$0xff] }
 0x22e   : > { %9862 = vst [vmem:[#allocation33_spill] sm:$0xff] %v9861_v50  ;;  %vm6253_vm3 = vmand %vm6196_vm2, %vm1748_vm11  ;;  %v9877_v29 = vmax.f32 %v5977_v41, 0.0  ;;  %v9879_v4 = vmax.f32 %v9878_v54, 0.0  ;;  %v9884_v46 = vmax.f32 %v9883_v11, 0.0  ;;  %v9885_v33 = vmax.f32 %v5956_v28, 0.0  ;;  %v6318_v28 = vpop.permute.xlu1 %1702 }
 0x22f   : > { %vm6274_vm8 = vmand %vm1519_vm7, %vm1615_vm5  ;;  %v915_v41 = vmax.f32 %v883_v55, 0.0  ;;  %4290 = vrcp.f32 %v1353_v20  ;;  %v916_v63 = vmax.f32 %v6231_v9, 0.0  ;;  %v1359_v55 = vsub.f32 %v1327_v32, %v6028_v15  ;;  %v9898_v9 = vld [vmem:[#allocation113_spill] sm:$0xff]  ;;  %v9901_v32 = vld [vmem:[#allocation27_spill] sm:$0xff]  ;;  %v6376_v49 = vpop.eup %4278 }
 0x230   : > { %v6286_v43 = vmul.f32 %v9879_v4, %v9877_v29  ;;  %vm6294_vm7 = vmand %vm1520_vm13, %vm1616_vm15  ;;  %v6302_v5 = vmul.f32 %v9885_v33, %v9884_v46  ;;  %v9887_v29 = vld [vmem:[#allocation72_spill] sm:$0xff]  ;;  %vm9890_vm15 = vcmp.lt.s32.totalorder %v5922_v35, 200  ;;  %v9891_v46 = vmov 0  ;;  %v6357_v44 = vpop.permute.xlu0 %1466  ;;  %v9905_v33 = vld [vmem:[#allocation114_spill] sm:$0xff] }
 0x231   : > { %vm1743_vm11 = vcmp.eq.f32.partialorder %v9887_v29, %v4918_v47  ;;  %vm6314_vm13 = vmand %vm6239_vm4, %vm1875_vm9  ;;  %vm1744_vm2 = vcmp.eq.f32.partialorder %v9887_v29, %v4921_v34  ;;  %4292 = vrcp.f32 %v1354_v60  ;;  %vm9895_vm9 = vmmov 1   ;;  %v9900_v4 = vld [vmem:[#allocation100_spill] sm:$0xff]  ;;  %9904 = vst [vmem:[#allocation102_spill] sm:$0xff] %v6357_v44 }
 0x232   : > { %9880 = vst [vmem:[#allocation10_spill] sm:$0xff] %v6286_v43  ;;  %9886 = vst [vmem:[#allocation67_spill] sm:$0xff] %v6302_v5  ;;  %v9896_v16 = vmov 0  ;;  %v6346_v54 = vadd.f32 1.0, %v9898_v9  ;;  %v1358_v60 = vsub.f32 %v1326_v10, %v9900_v4  ;;  %4294 = vrcp.f32 %v1357_v24  ;;  %v6437_v20 = vpop.permute.xlu1 %1578 }
 0x233   : > { %vm6324_vm5 = vmand %vm9890_vm15, %vm9417_vm0  ;;  %v1331_v62 = vadd.f32 %v9813_v51, %v9901_v32  ;;  %v6360_v29 = vadd.f32 1.0, %v9905_v33  ;;  %v1360_v9 = vsub.f32 %v1328_v36, %v6046_v53  ;;  %v1332_v24 = vadd.f32 %v9817_v30, %v9901_v32  ;;  %v9918_v33 = vld [vmem:[#allocation46_spill] sm:$0xff]  ;;  %9931 = vst [vmem:[#allocation39_spill] sm:$0xff] %v6437_v20 }
 0x234   : > { %v9892_v46 = vsel %vm6324_vm5, 4294967295, %v9891_v46  ;;  %vm6334_vm4 = vmand %vm6274_vm8, %vm1743_vm11  ;;  %9899 = vst [vmem:[#allocation101_spill] sm:$0xff] %v6346_v54  ;;  %v9907_v54 = vld [vmem:[#allocation26_spill] sm:$0xff]  ;;  %vm9908_vm11 = vcmp.eq.f32.partialorder %v9869_v3, %v4947_v42  ;;  %v9912_v36 = vmov 0  ;;  %v6394_v32 = vadd.f32 1.0, %v9916_v8 }
 0x235   : > { %vm6341_vm15 = vmxor %vm6123_vm14, %vm9895_vm9  ;;  %9906 = vst [vmem:[#allocation15_spill] sm:$0xff] %v6360_v29  ;;  %vm1871_vm14 = vcmp.eq.f32.partialorder %v9907_v54, %v4945_v17  ;;  %v9919_v29 = vmax.f32 %v9918_v33, 0.0  ;;  %v9922_v58 = vmov 0  ;;  %4296 = vrcp.f32 %v1359_v55 }
 0x236   : > { %v9897_v16 = vsel %vm6341_vm15, 4294967295, %v9896_v16  ;;  %vm6353_vm8 = vmand %vm6294_vm7, %vm1744_vm2  ;;  %vm9911_vm2 = vcmp.lt.s32.totalorder %v9846_v14, 200  ;;  %9917 = vst [vmem:[#allocation43_spill] sm:$0xff] %v6394_v32  ;;  %v301_v33 = vadd.s32 32, %v9654_v38  ;;  %v303_v32 = vadd.s32 48, %v9654_v38 }
 0x237   : > { %vm6372_vm7 = vmand %vm6253_vm3, %vm9908_vm11  ;;  %vm1872_vm3 = vcmp.eq.f32.partialorder %v9907_v54, %v4947_v42  ;;  %v6400_v5 = vmul.f32 %v9919_v29, %v915_v41  ;;  %vm9921_vm11 = vcmp.lt.s32.totalorder %v5715_v22, 200  ;;  %v6425_v54 = vadd.s32 %v5509_v56, %v6062_v27  ;;  %v4281_v29 = vpop.eup %4280  ;;  %v9950_v41 = vld [vmem:[#allocation89_spill] sm:$0xff] }
 0x238   : > { %vm6382_vm15 = vmand %vm9911_vm2, %vm9417_vm0  ;;  %v305_v27 = vadd.s32 64, %v9654_v38  ;;  %v4283_v55 = vpop.eup %4282  ;;  %4298 = vrcp.f32 %v1358_v60  ;;  %v1363_v53 = vsub.f32 %v1331_v62, %v6266_v25  ;;  %v9934_v11 = vmov 0  ;;  %v6462_v60 = vpop.permute.xlu0 %1482 }
 0x239   : > { %v9913_v36 = vsel %vm6382_vm15, 4294967295, %v9912_v36  ;;  %vm6389_vm5 = vmxor %vm6169_vm10, %vm9895_vm9  ;;  %9920 = vst [vmem:[#allocation105_spill] sm:$0xff] %v6400_v5  ;;  %v9932_v5 = vld [vmem:[#allocation86_spill] sm:$0xff]  ;;  %v9937_v20 = vmov 0  ;;  %v4285_v62 = vpop.eup %4284  ;;  %4300 = vrcp.f32 %v1360_v9  ;;  %v1364_v15 = vsub.f32 %v1332_v24, %v6286_v43 }
 0x23a   : > { %vm6406_vm2 = vmand %vm9921_vm11, %vm9417_vm0  ;;  %9928 = vst [vmem:[#allocation21_spill] sm:$0xff] %v6425_v54  ;;  %v1329_v4 = vadd.f32 %v9813_v51, %v9932_v5  ;;  %v1330_v25 = vadd.f32 %v9817_v30, %v9932_v5  ;;  %v4287_v44 = vpop.eup %4286  ;;  %v9946_v5 = vmov 0  ;;  %v306_v9 = vadd.s32 72, %v9654_v38 }
 0x23b   : > { %v9923_v58 = vsel %vm6406_vm2, 4294967295, %v9922_v58  ;;  %vm6413_vm10 = vmxor %vm6314_vm13, %vm9895_vm9  ;;  %9939 = vst [vmem:[#allocation59_spill] sm:$0xff] %v6462_v60  ;;  %v4289_v24 = vpop.eup %4288  ;;  %v6509_v12 = vadd.s32 %v5509_v56, %v301_v33  ;;  %4302 = vrcp.f32 %v1363_v53  ;;  %v9959_v33 = vmov 0 }
 0x23c   : > { %vm6419_vm15 = vmand %vm6334_vm4, %vm1871_vm14  ;;  %vm9933_vm4 = vcmp.lt.s32.totalorder %v5623_v59, 200  ;;  %v6535_v53 = vadd.s32 %v5509_v56, %v303_v32  ;;  %4304 = vrcp.f32 %v1364_v15  ;;  %v6539_v43 = vpop.permute.xlu0 %1498  ;;  %v6555_v15 = vmul.f32 %v6376_v49, %v5722_v1  ;;  %v9968_v32 = vld [vmem:[#allocation22_spill] sm:$0xff] }
 0x23d   : > { %vm6433_vm11 = vmand %vm6353_vm8, %vm1872_vm3  ;;  %vm1623_vm3 = vcmp.eq.f32.partialorder %v6116_v61, %v4934_v57  ;;  %9951 = vst [vmem:[#allocation119_spill] sm:$0xff] %v6509_v12  ;;  %vm9969_vm13 = vcmp.eq.f32.partialorder %v6318_v28, %v4918_v47  ;;  %v6566_v10 = vmul.f32 %v4281_v29, %v5727_v48  ;;  %vm9971_vm0 = vnez %v9897_v16  ;;  %v9975_v49 = vld [vmem:[#allocation38_spill] sm:$0xff]  ;;  %v9977_v48 = vld [vmem:[#allocation32_spill] sm:$0xff] }
 0x23e   : > { %vm6449_vm8 = vmand %vm9933_vm4, %vm6215_vm1  ;;  %9961 = vst [vmem:[#allocation96_spill] sm:$0xff] %v6535_v53  ;;  %v9973_v1 = vmov 0  ;;  %v6587_v29 = vadd.f32 %v9813_v51, %v9977_v48  ;;  %v6597_v16 = vmul.f32 %v4283_v55, %v6089_v13  ;;  %v6612_v38 = vmul.f32 %v4287_v44, %v6130_v45 }
 0x23f   : > { %v9935_v11 = vsel %vm6449_vm8, 4294967295, %v9934_v11  ;;  %vm6456_vm14 = vmxor %vm6372_vm7, %vm9895_vm9  ;;  %vm1528_vm7 = vcmp.eq.f32.partialorder %v6030_v26, %v4913_v21  ;;  %vm9957_vm8 = vcmp.lt.s32.totalorder %v9805_v2, 200  ;;  %9963 = vst [vmem:[#allocation97_spill] sm:$0xff] %v6539_v43  ;;  %v6569_v43 = vadd.s32 %v5509_v56, %v306_v9 }
 0x240   : > { %9936 = vst [vmem:[#allocation76_spill] sm:$0xff] %v9935_v11  ;;  %v9938_v20 = vsel %vm6456_vm14, 4294967295, %v9937_v20  ;;  %vm6472_vm1 = vmxor %vm6419_vm15, %vm9895_vm9  ;;  %v9943_v11 = vld [vmem:[#allocation47_spill] sm:$0xff]  ;;  %vm1527_vm15 = vcmp.eq.f32.partialorder %v6030_v26, %v4911_v40  ;;  %v4291_v26 = vpop.eup %4290  ;;  %v6640_v44 = vpop.permute.xlu0 %1510  ;;  %v10011_v9 = vmov 0 }
 0x241   : > { %v9944_v60 = vmax.f32 %v9943_v11, 0.0  ;;  %vm6485_vm4 = vmxor %vm6433_vm11, %vm9895_vm9  ;;  %v6512_v11 = vadd.s32 %v5509_v56, %v305_v27  ;;  %vm9958_vm9 = vcmp.lt.s32.totalorder %v5997_v37, 200  ;;  %v9962_v27 = vld [vmem:[#allocation109_spill] sm:$0xff]  ;;  %9970 = vst [vmem:[#allocation78_spill] sm:$0xff] %v6569_v43  ;;  %v1417_v8 = vmul.f32 %v4291_v26, %v6011_v7 }
 0x242   : > { %v9947_v5 = vsel %vm6485_vm4, 4294967295, %v9946_v5  ;;  %vm6500_vm11 = vmand %vm1527_vm15, %vm1623_vm3  ;;  %vm9954_vm3 = vcmp.eq.f32.partialorder %v6116_v61, %v4936_v0  ;;  %v4293_v61 = vpop.eup %4292  ;;  %vm9972_vm4 = vcmp.lt.s32.totalorder %v9846_v14, 200  ;;  %9982 = vst [vmem:[#allocation113_spill] sm:$0xff] %v6612_v38  ;;  %v10032_v26 = vld [vmem:[#allocation73_spill] sm:$0xff] }
 0x243   : > { %v6480_v50 = vmul.f32 %v9944_v60, %v916_v63  ;;  %9952 = vst [vmem:[#allocation99_spill] sm:$0xff] %v6512_v11  ;;  %v9953_v60 = vld [vmem:[#allocation108_spill] sm:$0xff]  ;;  %vm6520_vm15 = vmand %vm1528_vm7, %vm9954_vm3  ;;  %vm9964_vm3 = vcmp.lt.s32.totalorder %v5922_v35, 200  ;;  %v6583_v63 = vadd.f32 %v9813_v51, %v9975_v49  ;;  %v1418_v56 = vmul.f32 %v4293_v61, %v6024_v52  ;;  %v10056_v11 = vld [vmem:[#allocation18_spill] sm:$0xff] }
 0x244   : > { %vm6530_vm12 = vmand %vm9958_vm9, %vm9957_vm8  ;;  %v9986_v52 = vmov 0  ;;  %9991 = vst [vmem:[#allocation27_spill] sm:$0xff] %v6640_v44  ;;  %v6656_v61 = vadd.f32 %v9817_v30, %v9977_v48  ;;  %v10003_v44 = vld [vmem:[#allocation59_spill] sm:$0xff] }
 0x245   : > { %9945 = vst [vmem:[#allocation79_spill] sm:$0xff] %v6480_v50  ;;  %v1361_v50 = vsub.f32 %v1329_v4, %v9953_v60  ;;  %v9960_v33 = vsel %vm6530_vm12, 4294967295, %v9959_v33  ;;  %v1831_v4 = vpop.permute.xlu1 %1830  ;;  %v1362_v60 = vsub.f32 %v1330_v25, %v9962_v27  ;;  %vm6545_vm9 = vmand %vm9964_vm3, %vm6472_vm1  ;;  %v4295_v25 = vpop.eup %4294  ;;  %vm9994_vm3 = vcmp.eq.f32.partialorder %v6278_v19, %v4911_v40  ;;  %v10034_v27 = vld [vmem:[#allocation13_spill] sm:$0xff] }
 0x246   : > { %vm1783_vm1 = vmand %vm6500_vm11, %vm9969_vm13  ;;  %9976 = vst [vmem:[#allocation72_spill] sm:$0xff] %v6583_v63  ;;  %vm9979_vm11 = vcmp.eq.f32.partialorder %v1831_v4, %v4945_v17  ;;  %v4297_v13 = vpop.eup %4296  ;;  %v1421_v55 = vmul.f32 %v4295_v25, %v9870_v23  ;;  %vm10045_vm12 = vcmp.eq.f32.partialorder %v9968_v32, %v4936_v0 }
 0x247   : > { %vm6575_vm8 = vmand %vm9972_vm4, %vm9971_vm0  ;;  %vm9978_vm0 = vcmp.eq.f32.partialorder %v6318_v28, %v4921_v34  ;;  %4306 = vrcp.f32 %v1361_v50  ;;  %v6609_v28 = vmul.f32 %v4285_v62, %v6110_v6  ;;  %v9983_v50 = vld [vmem:[#allocation60_spill] sm:$0xff]  ;;  %v6646_v62 = vmul.f32 %v4289_v24, %v6148_v31  ;;  %v9997_v31 = vld [vmem:[#allocation33_spill] sm:$0xff] }
 0x248   : > { %v9974_v1 = vsel %vm6575_vm8, 4294967295, %v9973_v1  ;;  %vm1784_vm4 = vmand %vm6520_vm15, %vm9978_vm0  ;;  %4308 = vrcp.f32 %v1362_v60  ;;  %vm9988_vm15 = vcmp.eq.f32.partialorder %v1831_v4, %v4947_v42  ;;  %v4299_v60 = vpop.eup %4298  ;;  %v6652_v4 = vadd.f32 %v9817_v30, %v9975_v49  ;;  %v10002_v49 = vld [vmem:[#allocation54_spill] sm:$0xff]  ;;  %v10018_v6 = vld [vmem:[#allocation39_spill] sm:$0xff] }
 0x249   : > { %vm6601_vm7 = vmand %vm1783_vm1, %vm9979_vm11  ;;  %vm9984_vm1 = vnez %v9913_v36  ;;  %vm9985_vm11 = vcmp.lt.s32.totalorder %v5715_v22, 200  ;;  %v6638_v45 = vpop.permute.xlu1 %1706  ;;  %9992 = vst [vmem:[#allocation114_spill] sm:$0xff] %v6646_v62  ;;  %v4301_v24 = vpop.eup %4300  ;;  %v1365_v48 = vsub.f32 %v6587_v29, %v10002_v49  ;;  %v10009_v62 = vld [vmem:[#allocation98_spill] sm:$0xff]  ;;  %vm1626_vm2 = vcmp.eq.f32.partialorder %v10018_v6, %v4936_v0 }
 0x24a   : > { %vm6624_vm13 = vmand %vm9985_vm11, %vm6413_vm10  ;;  %vm9993_vm11 = vcmp.eq.f32.partialorder %v9940_v18, %v4934_v57  ;;  %v6698_v25 = vadd.f32 %v9813_v51, %v10009_v62  ;;  %v10010_v29 = vld [vmem:[#allocation102_spill] sm:$0xff]  ;;  %v6722_v49 = vadd.f32 %v9817_v30, %v10009_v62  ;;  %v4303_v62 = vpop.eup %4302  ;;  %v1679_v30 = vpop.permute.xlu0 %1678  ;;  %v1424_v63 = vmul.f32 %v4301_v24, %v10032_v26  ;;  %v10060_v51 = vld [vmem:[#allocation68_spill] sm:$0xff] }
 0x24b   : > { %v9987_v52 = vsel %vm6624_vm13, 4294967295, %v9986_v52  ;;  %vm6634_vm8 = vmand %vm1784_vm4, %vm9988_vm15  ;;  %vm9998_vm4 = vnez %v9997_v31  ;;  %vm10014_vm15 = vcmp.lt.s32.totalorder %v6425_v54, 200  ;;  %vm10024_vm13 = vcmp.eq.f32.partialorder %v10003_v44, %v4911_v40 }
 0x24c   : > { %vm6666_vm10 = vmand %vm9994_vm3, %vm9993_vm11  ;;  %vm10004_vm11 = vmmov 1   ;;  %v1422_v43 = vmul.f32 %v4299_v60, %v10033_v39  ;;  %v1366_v22 = vsub.f32 %v6656_v61, %v10034_v27  ;;  %v10042_v61 = vld [vmem:[#allocation99_spill] sm:$0xff]  ;;  %4310 = vrcp.f32 %v1365_v48  ;;  %v10135_v39 = vld [vmem:[#allocation37_spill] sm:$0xff] }
 0x24d   : > { %vm9999_vm0 = vmand %vm6204_vm6, %vm9998_vm4  ;;  %vm10019_vm4 = vcmp.eq.f32.partialorder %v9940_v18, %v4936_v0  ;;  %v10028_v18 = vmov 0 }
 0x24e   : > { %v6675_v23 = vsel %vm9999_vm0, %v1418_v56, 0.0  ;;  %vm6688_vm14 = vmxor %vm6601_vm7, %vm10004_vm11  ;;  %v10007_v56 = vld [vmem:[#allocation76_spill] sm:$0xff]  ;;  %vm1625_vm0 = vcmp.eq.f32.partialorder %v10018_v6, %v4934_v57  ;;  %4312 = vrcp.f32 %v1366_v22 }
 0x24f   : > { %10000 = vst [vmem:[#allocation26_spill] sm:$0xff] %v6675_v23  ;;  %vm10008_vm6 = vnez %v10007_v56  ;;  %vm6707_vm7 = vmxor %vm6634_vm8, %vm10004_vm11  ;;  %v10017_v56 = vld [vmem:[#allocation84_spill] sm:$0xff]  ;;  %vm10031_vm8 = vcmp.lt.s32.totalorder %v9950_v41, %v5623_v59 }
 0x250   : > { %v6694_v31 = vsel %vm10008_vm6, %v1417_v8, 0.0  ;;  %v10012_v9 = vsel %vm6707_vm7, 4294967295, %v10011_v9  ;;  %vm10013_vm6 = vcmp.lt.s32.totalorder %v9805_v2, 200  ;;  %v10015_v8 = vmov 0 }
 0x251   : > { %vm6715_vm3 = vmand %vm10014_vm15, %vm10013_vm6  ;;  %v1423_v38 = vmul.f32 %v4297_v13, %v10017_v56  ;;  %vm10020_vm15 = vcmp.eq.f32.partialorder %v6278_v19, %v4913_v21  ;;  %v10025_v19 = vmov 0  ;;  %v6763_v56 = vpop.permute.xlu1 %1486  ;;  %v2125_v6 = vsel %vm10031_vm8, %v6694_v31, 0.0 }
 0x252   : > { %v10016_v8 = vsel %vm6715_vm3, 4294967295, %v10015_v8  ;;  %vm6734_vm6 = vmand %vm10020_vm15, %vm10019_vm4  ;;  %vm10023_vm3 = vcmp.lt.s32.totalorder %v9805_v2, %v5623_v59  ;;  %vm10027_vm15 = vcmp.lt.s32.totalorder %v5997_v37, 200  ;;  %10030 = vst [vmem:[#allocation16_spill] sm:$0xff] %v6763_v56  ;;  %v4305_v37 = vpop.eup %4304  ;;  %v10036_v56 = vmov 0  ;;  %v10055_v59 = vld [vmem:[#allocation11_spill] sm:$0xff] }
 0x253   : > { %v6742_v13 = vsel %vm10023_vm3, %v6675_v23, 0.0  ;;  %vm6751_vm4 = vmand %vm10024_vm13, %vm1625_vm0  ;;  %vm1740_vm13 = vcmp.eq.f32.partialorder %v1679_v30, %v4921_v34  ;;  %v2445_v60 = vmax.f32 %v6694_v31, %v6675_v23  ;;  %v6820_v26 = vsel %vm6545_vm9, %v1423_v38, 0.0 }
 0x254   : > { %v10026_v19 = vsel %vm6751_vm4, 4294967295, %v10025_v19  ;;  %vm6759_vm3 = vmand %vm10027_vm15, %vm6688_vm14  ;;  %vm10035_vm14 = vcmp.eq.f32.partialorder %v10003_v44, %v4913_v21  ;;  %vm1739_vm15 = vcmp.eq.f32.partialorder %v1679_v30, %v4918_v47  ;;  %vm2286_vm7 = vcmp.gt.f32.partialorder %v6742_v13, 0.0  ;;  %v10100_v44 = vld [vmem:[#allocation40_spill] sm:$0xff] }
 0x255   : > { %v10029_v18 = vsel %vm6759_vm3, 4294967295, %v10028_v18  ;;  %vm6778_vm0 = vmand %vm10035_vm14, %vm1626_vm2  ;;  %vm10038_vm3 = vcmp.eq.f32.partialorder %v9968_v32, %v4934_v57  ;;  %vm10039_vm2 = vcmp.eq.f32.partialorder %v10010_v29, %v4911_v40  ;;  %vm10046_vm4 = vcmp.eq.f32.partialorder %v10010_v29, %v4913_v21  ;;  %v10054_v29 = vld [vmem:[#allocation70_spill] sm:$0xff]  ;;  %2446 = vmax.xlane.f32.xlu1 %v2445_v60  ;;  %v6875_v36 = vpop.permute.xlu1 %1834 }
 0x256   : > { %v10037_v56 = vsel %vm6778_vm0, 4294967295, %v10036_v56  ;;  %vm6796_vm14 = vmand %vm10039_vm2, %vm10038_vm3  ;;  %vm10052_vm0 = vnez %v9974_v1  ;;  %v1369_v23 = vsub.f32 %v6698_v25, %v10055_v59  ;;  %v1370_v38 = vsub.f32 %v6722_v49, %v10056_v11  ;;  %v1691_v1 = vpop.permute.xlu0 %1690 }
 0x257   : > { %vm6803_vm8 = vmand %vm6666_vm10, %vm1739_vm15  ;;  %vm10049_vm10 = vnez %v9892_v46  ;;  %vm10050_vm15 = vnez %v9947_v5  ;;  %v6831_v32 = vsel %vm10052_vm0, %v1421_v55, 0.0  ;;  %vm2285_vm9 = vcmp.gt.f32.partialorder %v2125_v6, 0.0  ;;  %v6843_v46 = vpop.eup %4306  ;;  %v10061_v55 = vld [vmem:[#allocation10_spill] sm:$0xff] }
 0x258   : > { %vm6814_vm3 = vmand %vm10046_vm4, %vm10045_vm12  ;;  %10053 = vst [vmem:[#allocation46_spill] sm:$0xff] %v6831_v32  ;;  %vm10057_vm0 = vcmp.eq.f32.partialorder %v9983_v50, %v4945_v17  ;;  %v1428_v25 = vmul.f32 %v4305_v37, %v10061_v55  ;;  %v6863_v60 = vpop.eup %4308  ;;  %4314 = vrcp.f32 %v1369_v23  ;;  %v10106_v55 = vld [vmem:[#allocation117_spill] sm:$0xff]  ;;  %v10120_v23 = vld [vmem:[#allocation78_spill] sm:$0xff] }
 0x259   : > { %vm10051_vm2 = vmand %vm10049_vm10, %vm10050_vm15  ;;  %vm1753_vm15 = vcmp.eq.f32.partialorder %v6638_v45, %v4918_v47  ;;  %4316 = vrcp.f32 %v1370_v38 }
 0x25a   : > { %v6827_v7 = vsel %vm10051_vm2, %v1424_v63, 0.0  ;;  %vm1772_vm12 = vmand %vm6734_vm6, %vm1740_vm13  ;;  %v1427_v63 = vmul.f32 %v4303_v62, %v10060_v51  ;;  %vm10064_vm13 = vcmp.eq.f32.partialorder %v9983_v50, %v4947_v42  ;;  %v9444_v62 = vmov 0.0  }
 0x25b   : > { %vm6850_vm10 = vmand %vm6803_vm8, %vm10057_vm0  ;;  %v4036_v37 = vsel %vm2286_vm7, 1.0, %v9444_v62  ;;  %v2454_v22 = vmax.f32 %v6820_v26, %v6827_v7  ;;  %v4035_v3 = vsel %vm2285_vm9, 1.0, %v9444_v62  ;;  %vm10068_vm2 = vcmp.lt.s32.totalorder %v9805_v2, 200 }
 0x25c   : > { %vm10062_vm6 = vmand %vm9984_vm1, %vm6389_vm5  ;;  %vm10067_vm1 = vcmp.lt.s32.totalorder %v9950_v41, %v9846_v14  ;;  %vm1754_vm9 = vcmp.eq.f32.partialorder %v6638_v45, %v4921_v34  ;;  %vm1746_vm5 = vcmp.eq.f32.partialorder %v1691_v1, %v4921_v34 }
 0x25d   : > { %v6861_v48 = vsel %vm10062_vm6, %v1422_v43, 0.0  ;;  %vm6868_vm8 = vmand %vm1772_vm12, %vm10064_vm13  ;;  %v6885_v43 = vsel %vm10067_vm1, %v6831_v32, 0.0  ;;  %vm10069_vm12 = vcmp.lt.s32.totalorder %v6509_v12, 200  ;;  %vm10072_vm6 = vnez %v9987_v52  ;;  %2455 = vmax.xlane.f32.xlu1 %v2454_v22 }
 0x25e   : > { %10063 = vst [vmem:[#allocation86_spill] sm:$0xff] %v6861_v48  ;;  %vm1999_vm7 = vmxor %vm6850_vm10, %vm10004_vm11  ;;  %v6904_v51 = vsel %vm10072_vm6, %v1427_v63, 0.0  ;;  %vm10073_vm13 = vnez %v9923_v58  ;;  %vm10074_vm1 = vnez %v9938_v20  ;;  %vm10079_vm6 = vcmp.lt.s32.totalorder %v9805_v2, %v9846_v14  ;;  %v10080_v20 = vld [vmem:[#allocation57_spill] sm:$0xff] }
 0x25f   : > { %vm6898_vm0 = vmand %vm10069_vm12, %vm10068_vm2  ;;  %v6927_v58 = vsel %vm10079_vm6, %v6861_v48, 0.0  ;;  %v2451_v52 = vmax.f32 %v6831_v32, %v6861_v48  ;;  %vm10082_vm6 = vnez %v10026_v19  ;;  %v3796_v63 = vadd.f32 %v6742_v13, %v2125_v6 }
 0x260   : > { %vm10075_vm10 = vmand %vm10073_vm13, %vm10074_vm1  ;;  %vm1873_vm1 = vcmp.eq.f32.partialorder %v10080_v20, %v4945_v17 }
 0x261   : > { %v6911_v5 = vsel %vm10075_vm10, %v1428_v25, 0.0  ;;  %vm6918_vm2 = vmxor %vm6868_vm8, %vm10004_vm11  ;;  %vm10081_vm8 = vcmp.lt.s32.totalorder %v6425_v54, 200  ;;  %v3868_v25 = vadd.f32 %v4036_v37, %v4035_v3  ;;  %v7037_v3 = vpop.eup %4310 }
 0x262   : > { %10076 = vst [vmem:[#allocation45_spill] sm:$0xff] %v6911_v5  ;;  %vm2031_vm10 = vmand %vm10081_vm8, %vm1999_vm7  ;;  %vm10085_vm7 = vnez %v10016_v8  ;;  %v2460_v19 = vmax.f32 %v6904_v51, %v6911_v5 }
 0x263   : > { %vm6944_vm12 = vmand %vm10082_vm6, %vm1753_vm15  ;;  %v6955_v24 = vsel %vm2031_vm10, %v6555_v15, 0.0  ;;  %vm10086_vm6 = vnez %v10037_v56  ;;  %vm10092_vm15 = vcmp.lt.s32.totalorder %v9950_v41, %v6425_v54  ;;  %v6985_v56 = vpop.permute.xlu1 %1299 }
 0x264   : > { %vm2032_vm8 = vmand %vm10085_vm7, %vm6918_vm2  ;;  %vm10089_vm7 = vcmp.eq.f32.partialorder %v1691_v1, %v4918_v47  ;;  %v2127_v45 = vsel %vm10092_vm15, %v6955_v24, 0.0  ;;  %vm10099_vm15 = vcmp.lt.s32.totalorder %v9805_v2, %v6425_v54  ;;  %2461 = vmax.xlane.f32.xlu1 %v2460_v19  ;;  %v10144_v54 = vsub.f32 %v6652_v4, %v10054_v29 }
 0x265   : > { %vm6966_vm2 = vmand %vm10086_vm6, %vm1754_vm9  ;;  %v6979_v13 = vsel %vm2032_vm8, %v6566_v10, 0.0  ;;  %vm10093_vm9 = vnez %v10029_v18  ;;  %vm10096_vm6 = vnez %v10012_v9  ;;  %v10183_v9 = vld [vmem:[#allocation114_spill] sm:$0xff] }
 0x266   : > { %vm6974_vm10 = vmand %vm6796_vm14, %vm10089_vm7  ;;  %v6990_v6 = vsel %vm10093_vm9, %v6597_v16, 0.0  ;;  %vm10095_vm14 = vnez %v9960_v33  ;;  %v2128_v18 = vsel %vm10099_vm15, %v6979_v13, 0.0  ;;  %v2448_v16 = vmax.f32 %v6955_v24, %v6979_v13 }
 0x267   : > { %10094 = vst [vmem:[#allocation47_spill] sm:$0xff] %v6990_v6  ;;  %vm10097_vm7 = vmand %vm10095_vm14, %vm10096_vm6  ;;  %vm2287_vm9 = vcmp.gt.f32.partialorder %v2127_v45, 0.0  ;;  %v3797_v33 = vadd.f32 %v3796_v63, %v2127_v45  ;;  %vm1874_vm6 = vcmp.eq.f32.partialorder %v10080_v20, %v4947_v42  ;;  %vm10103_vm15 = vcmp.lt.s32.totalorder %v10042_v61, 200  ;;  %v7048_v20 = vpop.eup %4312  ;;  %v7065_v45 = vpop.permute.xlu1 %1490 }
 0x268   : > { %v6998_v10 = vsel %vm10097_vm7, %v6609_v28, 0.0  ;;  %vm1778_vm8 = vmand %vm6814_vm3, %vm1746_vm5  ;;  %v10101_v28 = vld [vmem:[#allocation82_spill] sm:$0xff]  ;;  %vm10102_vm7 = vcmp.lt.s32.totalorder %v9805_v2, 200  ;;  %vm2288_vm14 = vcmp.gt.f32.partialorder %v2128_v18, 0.0  ;;  %v4037_v30 = vsel %vm2287_vm9, 1.0, %v9444_v62  ;;  %2449 = vmax.xlane.f32.xlu0 %v2448_v16 }
 0x269   : > { %10098 = vst [vmem:[#allocation89_spill] sm:$0xff] %v6998_v10  ;;  %vm1621_vm3 = vcmp.eq.f32.partialorder %v10101_v28, %v4934_v57  ;;  %vm1905_vm5 = vmand %vm6974_vm10, %vm1873_vm1  ;;  %v3798_v1 = vadd.f32 %v3797_v33, %v2128_v18  ;;  %v3869_v37 = vadd.f32 %v4037_v30, %v3868_v25  ;;  %vm2104_vm1 = vcmp.lt.s32.totalorder %v9805_v2, %v10100_v44  ;;  %v10112_v18 = vld [vmem:[#allocation108_spill] sm:$0xff] }
 0x26a   : > { %vm7025_vm13 = vmand %vm10103_vm15, %vm10102_vm7  ;;  %v2466_v22 = vmax.f32 %v6990_v6, %v6998_v10  ;;  %vm1525_vm10 = vcmp.eq.f32.partialorder %v10106_v55, %v4911_v40  ;;  %v4038_v38 = vsel %vm2288_vm14, 1.0, %v9444_v62  ;;  %vm1881_vm15 = vcmp.eq.f32.partialorder %v6875_v36, %v4945_v17 }
 0x26b   : > { %vm1906_vm4 = vmand %vm1778_vm8, %vm1874_vm6  ;;  %vm10107_vm8 = vcmp.lt.s32.totalorder %v9950_v41, %v5922_v35  ;;  %vm2290_vm6 = vcmp.gt.f32.partialorder %v6927_v58, 0.0  ;;  %v3870_v19 = vadd.f32 %v4038_v38, %v3869_v37  ;;  %v3799_v15 = vadd.f32 %v3798_v1, %v6885_v43  ;;  %v10116_v1 = vld [vmem:[#allocation109_spill] sm:$0xff] }
 0x26c   : > { %vm2005_vm9 = vmxor %vm1905_vm5, %vm10004_vm11  ;;  %v2131_v49 = vsel %vm10107_vm8, %v6820_v26, 0.0  ;;  %2467 = vmax.xlane.f32.xlu1 %v2466_v22  ;;  %v1425_v16 = vmul.f32 %v6843_v46, %v10112_v18  ;;  %vm1882_vm8 = vcmp.eq.f32.partialorder %v6875_v36, %v4947_v42  ;;  %v1426_v37 = vmul.f32 %v6863_v60, %v10116_v1  ;;  %v7082_v22 = vpop.eup %4314  ;;  %2452 = vmax.xlane.f32.xlu0 %v2451_v52  ;;  %v1699_v60 = vpop.permute.xlu0 %1698 }
 0x26d   : > { %vm7051_vm7 = vmxor %vm1906_vm4, %vm10004_vm11  ;;  %vm10113_vm4 = vcmp.lt.s32.totalorder %v6509_v12, 200  ;;  %v3800_v46 = vadd.f32 %v3799_v15, %v6927_v58  ;;  %v10121_v15 = vld [vmem:[#allocation72_spill] sm:$0xff]  ;;  %v2136_v36 = vsel %vm2104_vm1, %v6911_v5, 0.0  ;;  %v1430_v48 = vmul.f32 %v7048_v20, %v10034_v27 }
 0x26e   : > { %vm7060_vm5 = vmand %vm1525_vm10, %vm1621_vm3  ;;  %vm10114_vm3 = vcmp.lt.s32.totalorder %v9805_v2, %v5922_v35  ;;  %vm10115_vm10 = vcmp.gt.f32.partialorder %v6885_v43, 0.0  ;;  %v4040_v43 = vsel %vm2290_vm6, 1.0, %v9444_v62  ;;  %vm1526_vm6 = vcmp.eq.f32.partialorder %v10106_v55, %v4913_v21 }
 0x26f   : > { %vm2037_vm14 = vmand %vm10113_vm4, %vm2005_vm9  ;;  %v2132_v33 = vsel %vm10114_vm3, %v6827_v7, 0.0  ;;  %v4039_v30 = vsel %vm10115_vm10, 1.0, %v9444_v62  ;;  %vm2291_vm4 = vcmp.gt.f32.partialorder %v2131_v49, 0.0  ;;  %vm1622_vm3 = vcmp.eq.f32.partialorder %v10101_v28, %v4936_v0 }
 0x270   : > { %vm2038_vm9 = vmand %vm6898_vm0, %vm7051_vm7  ;;  %v3871_v38 = vadd.f32 %v4039_v30, %v3870_v19  ;;  %v7089_v18 = vsel %vm2037_vm14, %v1425_v16, 0.0  ;;  %vm10119_vm0 = vcmp.lt.s32.totalorder %v9950_v41, %v6509_v12  ;;  %vm2292_vm14 = vcmp.gt.f32.partialorder %v2132_v33, 0.0  ;;  %v10122_v16 = vld [vmem:[#allocation75_spill] sm:$0xff] }
 0x271   : > { %10117 = vst [vmem:[#allocation22_spill] sm:$0xff] %v7089_v18  ;;  %vm1913_vm10 = vmand %vm6944_vm12, %vm1881_vm15  ;;  %v7101_v50 = vsel %vm2038_vm9, %v1426_v37, 0.0  ;;  %v2133_v52 = vsel %vm10119_vm0, %v7089_v18, 0.0  ;;  %v3801_v63 = vadd.f32 %v3800_v46, %v2131_v49  ;;  %v10123_v30 = vsub.f32 %v10121_v15, %v10122_v16  ;;  %v10130_v37 = vld [vmem:[#allocation69_spill] sm:$0xff] }
 0x272   : > { %10118 = vst [vmem:[#allocation38_spill] sm:$0xff] %v7101_v50  ;;  %vm1914_vm7 = vmand %vm6966_vm2, %vm1882_vm8  ;;  %v3872_v19 = vadd.f32 %v4040_v43, %v3871_v38  ;;  %v2457_v58 = vmax.f32 %v7089_v18, %v7101_v50  ;;  %v4041_v8 = vsel %vm2291_vm4, 1.0, %v9444_v62  ;;  %vm10126_vm2 = vcmp.lt.s32.totalorder %v9805_v2, 200  ;;  %v7141_v38 = vpop.permute.xlu1 %1586 }
 0x273   : > { %4318 = vrcp.f32 %v10123_v30  ;;  %vm7121_vm15 = vmxor %vm1913_vm10, %vm10004_vm11  ;;  %vm10127_vm8 = vcmp.lt.s32.totalorder %v6535_v53, 200  ;;  %vm10131_vm10 = vcmp.lt.s32.totalorder %v9805_v2, %v6509_v12  ;;  %v3802_v15 = vadd.f32 %v3801_v63, %v2132_v33  ;;  %v10134_v30 = vld [vmem:[#allocation104_spill] sm:$0xff] }
 0x274   : > { %vm7131_vm9 = vmand %vm10127_vm8, %vm10126_vm2  ;;  %v2134_v46 = vsel %vm10131_vm10, %v7101_v50, 0.0  ;;  %vm1749_vm2 = vcmp.eq.f32.partialorder %v1699_v60, %v4918_v47  ;;  %v3873_v43 = vadd.f32 %v4041_v8, %v3872_v19  ;;  %2458 = vmax.xlane.f32.xlu0 %v2457_v58  ;;  %vm2293_vm0 = vcmp.gt.f32.partialorder %v2133_v52, 0.0  ;;  %v4317_v58 = vpop.eup %4316  ;;  %v10143_v8 = vld [vmem:[#allocation28_spill] sm:$0xff]  ;;  %v10152_v50 = vld [vmem:[#allocation54_spill] sm:$0xff] }
 0x275   : > { %vm7144_vm4 = vmxor %vm1914_vm7, %vm10004_vm11  ;;  %v7155_v62 = vadd.f32 %v10135_v39, %v10134_v30  ;;  %v10136_v12 = vmov 0.0   ;;  %vm1750_vm10 = vcmp.eq.f32.partialorder %v1699_v60, %v4921_v34  ;;  %vm10139_vm12 = vcmp.lt.s32.totalorder %v9950_v41, %v10100_v44  ;;  %v10147_v44 = vld [vmem:[#allocation105_spill] sm:$0xff] }
 0x276   : > { %v4042_v35 = vsel %vm2292_vm14, 1.0, %v10136_v12  ;;  %vm7165_vm7 = vmand %vm1526_vm6, %vm1622_vm3  ;;  %v2135_v19 = vsel %vm10139_vm12, %v6904_v51, 0.0  ;;  %vm10140_vm14 = vcmp.lt.s32.totalorder %v10042_v61, 200  ;;  %vm2294_vm6 = vcmp.gt.f32.partialorder %v2134_v46, 0.0  ;;  %v7208_v25 = vpop.permute.xlu1 %1714 }
 0x277   : > { %vm7178_vm8 = vmand %vm10140_vm14, %vm7121_vm15  ;;  %v3874_v55 = vadd.f32 %v4042_v35, %v3873_v43  ;;  %v3803_v33 = vadd.f32 %v3802_v15, %v2133_v52  ;;  %v307_v14 = vadd.s32 80, %v10143_v8  ;;  %4320 = vrcp.f32 %v10144_v54  ;;  %v10145_v43 = vld [vmem:[#allocation23_spill] sm:$0xff]  ;;  %v10146_v15 = vld [vmem:[#allocation93_spill] sm:$0xff] }
 0x278   : > { %vm1781_vm12 = vmand %vm7060_vm5, %vm1749_vm2  ;;  %v4043_v35 = vsel %vm2293_vm0, 1.0, %v10136_v12  ;;  %vm1877_vm14 = vcmp.eq.f32.partialorder %v10145_v43, %v4945_v17  ;;  %vm2295_vm5 = vcmp.gt.f32.partialorder %v2135_v19, 0.0  ;;  %v7212_v52 = vadd.f32 %v10146_v15, %v10134_v30 }
 0x279   : > { %vm1782_vm3 = vmand %vm7165_vm7, %vm1750_vm10  ;;  %v3804_v54 = vadd.f32 %v3803_v33, %v2134_v46  ;;  %v3875_v4 = vadd.f32 %v4043_v35, %v3874_v55  ;;  %vm1878_vm1 = vcmp.eq.f32.partialorder %v10145_v43, %v4947_v42  ;;  %v4044_v60 = vsel %vm2294_vm6, 1.0, %v10136_v12  ;;  %v10148_v33 = vld [vmem:[#allocation91_spill] sm:$0xff]  ;;  %v1711_v46 = vpop.permute.xlu0 %1710 }
 0x27a   : > { %vm1909_vm0 = vmand %vm1781_vm12, %vm1877_vm14  ;;  %vm2296_vm10 = vcmp.gt.f32.partialorder %v2136_v36, 0.0  ;;  %v7223_v30 = vadd.s32 %v10148_v33, %v307_v14  ;;  %v4045_v43 = vsel %vm2295_vm5, 1.0, %v10136_v12  ;;  %v1429_v18 = vmul.f32 %v7037_v3, %v10152_v50  ;;  %v10153_v14 = vld [vmem:[#allocation85_spill] sm:$0xff] }
 0x27b   : > { %vm1910_vm7 = vmand %vm1782_vm3, %vm1878_vm1  ;;  %v3805_v63 = vadd.f32 %v3804_v54, %v2135_v19  ;;  %v3876_v55 = vadd.f32 %v4044_v60, %v3875_v4  ;;  %v1433_v54 = vmul.f32 %v7082_v22, %v10055_v59  ;;  %vm1627_vm6 = vcmp.eq.f32.partialorder %v10153_v14, %v4934_v57  ;;  %v10154_v4 = vld [vmem:[#allocation16_spill] sm:$0xff]  ;;  %v7270_v60 = vpop.permute.xlu1 %1494 }
 0x27c   : > { %10149 = vst [vmem:[#allocation32_spill] sm:$0xff] %v7223_v30  ;;  %vm7226_vm15 = vmxor %vm1909_vm0, %vm10004_vm11  ;;  %vm1628_vm5 = vcmp.eq.f32.partialorder %v10153_v14, %v4936_v0  ;;  %vm1532_vm1 = vcmp.eq.f32.partialorder %v10154_v4, %v4913_v21  ;;  %vm10157_vm0 = vcmp.lt.s32.totalorder %v6535_v53, 200  ;;  %v4046_v59 = vsel %vm2296_vm10, 1.0, %v10136_v12 }
 0x27d   : > { %vm7245_vm14 = vmxor %vm1910_vm7, %vm10004_vm11  ;;  %v3877_v3 = vadd.f32 %v4045_v43, %v3876_v55  ;;  %v3806_v50 = vadd.f32 %v3805_v63, %v2136_v36  ;;  %v7249_v27 = vpop.eup %4318  ;;  %vm10158_vm7 = vcmp.lt.s32.totalorder %v9805_v2, 200  ;;  %vm10159_vm2 = vcmp.lt.s32.totalorder %v10120_v23, 200 }
 0x27e   : > { %vm2041_vm3 = vmand %vm10157_vm0, %vm7226_vm15  ;;  %v1434_v22 = vmul.f32 %v4317_v58, %v10056_v11  ;;  %vm10162_vm10 = vcmp.lt.s32.totalorder %v9950_v41, %v10130_v37  ;;  %vm10165_vm0 = vcmp.lt.s32.totalorder %v9805_v2, %v10130_v37 }
 0x27f   : > { %vm7265_vm12 = vmand %vm10159_vm2, %vm10158_vm7  ;;  %v2139_v36 = vsel %vm10162_vm10, %v6990_v6, 0.0  ;;  %v7281_v63 = vsel %vm2041_vm3, %v1429_v18, 0.0  ;;  %v3878_v55 = vadd.f32 %v4046_v59, %v3877_v3  ;;  %vm2111_vm2 = vcmp.lt.s32.totalorder %v9950_v41, %v10120_v23  ;;  %v10173_v3 = vld [vmem:[#allocation115_spill] sm:$0xff]  ;;  %v7336_v28 = vpop.permute.xlu1 %1842 }
 0x280   : > { %vm2042_vm15 = vmand %vm7131_vm9, %vm7245_vm14  ;;  %10163 = vst [vmem:[#allocation60_spill] sm:$0xff] %v7281_v63  ;;  %vm10164_vm7 = vcmp.eq.f32.partialorder %v10154_v4, %v4911_v40  ;;  %vm1756_vm14 = vcmp.eq.f32.partialorder %v1711_v46, %v4921_v34  ;;  %v2140_v11 = vsel %vm10165_vm0, %v6998_v10, 0.0  ;;  %vm10167_vm3 = vcmp.lt.s32.totalorder %v9950_v41, %v6535_v53 }
 0x281   : > { %vm1659_vm9 = vmand %vm10164_vm7, %vm1627_vm6  ;;  %v7296_v18 = vsel %vm2042_vm15, %v1430_v48, 0.0  ;;  %v2137_v1 = vsel %vm10167_vm3, %v7281_v63, 0.0  ;;  %vm10168_vm15 = vcmp.lt.s32.totalorder %v9805_v2, %v6535_v53  ;;  %v7316_v43 = vpop.eup %4320  ;;  %vm10169_vm7 = vcmp.eq.f32.partialorder %v1711_v46, %v4918_v47 }
 0x282   : > { %10166 = vst [vmem:[#allocation33_spill] sm:$0xff] %v7296_v18  ;;  %vm1660_vm6 = vmand %vm1532_vm1, %vm1628_vm5  ;;  %v2138_v48 = vsel %vm10168_vm15, %v7296_v18, 0.0  ;;  %v2463_v58 = vmax.f32 %v7281_v63, %v7296_v18  ;;  %vm2297_vm0 = vcmp.gt.f32.partialorder %v2137_v1, 0.0  ;;  %v3807_v35 = vadd.f32 %v3806_v50, %v2137_v1 }
 0x283   : > { %vm1787_vm3 = vmand %vm1659_vm9, %vm10169_vm7  ;;  %vm2298_vm10 = vcmp.gt.f32.partialorder %v2138_v48, 0.0  ;;  %v4047_v14 = vsel %vm2297_vm0, 1.0, %v10136_v12  ;;  %v7323_v4 = vsel %vm7178_vm8, %v1433_v54, 0.0  ;;  %vm1883_vm1 = vcmp.eq.f32.partialorder %v10173_v3, %v4945_v17  ;;  %v10174_v54 = vld [vmem:[#allocation79_spill] sm:$0xff] }
 0x284   : > { %10170 = vst [vmem:[#allocation59_spill] sm:$0xff] %v7323_v4  ;;  %vm10171_vm5 = vmand %vm7025_vm13, %vm7144_vm4  ;;  %vm2299_vm15 = vcmp.gt.f32.partialorder %v2139_v36, 0.0  ;;  %2464 = vmax.xlane.f32.xlu0 %v2463_v58  ;;  %v3808_v50 = vadd.f32 %v3807_v35, %v2138_v48  ;;  %v3879_v59 = vadd.f32 %v4047_v14, %v3878_v55  ;;  %vm1884_vm13 = vcmp.eq.f32.partialorder %v10173_v3, %v4947_v42  ;;  %v10176_v48 = vld [vmem:[#allocation12_spill] sm:$0xff] }
 0x285   : > { %v7330_v19 = vsel %vm10171_vm5, %v1434_v22, 0.0  ;;  %vm1788_vm9 = vmand %vm1660_vm6, %vm1756_vm14  ;;  %vm2300_vm8 = vcmp.gt.f32.partialorder %v2140_v11, 0.0  ;;  %v4048_v49 = vsel %vm2298_vm10, 1.0, %v10136_v12  ;;  %vm10175_vm14 = vcmp.lt.s32.totalorder %v9950_v41, %v10042_v61 }
 0x286   : > { %10172 = vst [vmem:[#allocation76_spill] sm:$0xff] %v7330_v19  ;;  %vm1915_vm4 = vmand %vm1787_vm3, %vm1883_vm1  ;;  %v3809_v22 = vadd.f32 %v3808_v50, %v2139_v36  ;;  %v3880_v46 = vadd.f32 %v4048_v49, %v3879_v59  ;;  %v2141_v55 = vsel %vm10175_vm14, %v7323_v4, 0.0  ;;  %v2469_v1 = vmax.f32 %v7323_v4, %v7330_v19  ;;  %v10234_v4 = vld [vmem:[#allocation44_spill] sm:$0xff] }
 0x287   : > { %vm1916_vm0 = vmand %vm1788_vm9, %vm1884_vm13  ;;  %v7351_v58 = vadd.f32 %v10135_v39, %v10176_v48  ;;  %v4049_v35 = vsel %vm2299_vm15, 1.0, %v10136_v12  ;;  %vm9459_vm10 = vcmp.lt.s32.totalorder %v7223_v30, 200  ;;  %v309_v14 = vadd.s32 96, %v10143_v8 }
 0x288   : > { %vm2015_vm6 = vmxor %vm1915_vm4, %vm10004_vm11  ;;  %v7360_v3 = vadd.f32 %v10146_v15, %v10176_v48  ;;  %v3881_v59 = vadd.f32 %v4049_v35, %v3880_v46  ;;  %vm10179_vm3 = vcmp.lt.s32.totalorder %v9805_v2, %v10042_v61  ;;  %2470 = vmax.xlane.f32.xlu0 %v2469_v1  ;;  %v3810_v49 = vadd.f32 %v3809_v22, %v2140_v11  ;;  %v7379_v46 = vpop.permute.xlu1 %1718  ;;  %v10181_v22 = vld [vmem:[#allocation113_spill] sm:$0xff] }
 0x289   : > { %vm7363_vm7 = vmxor %vm1916_vm0, %vm10004_vm11  ;;  %v2142_v36 = vsel %vm10179_vm3, %v7330_v19, 0.0  ;;  %vm10180_vm5 = vcmp.lt.s32.totalorder %v10120_v23, 200  ;;  %vm1533_vm9 = vcmp.eq.f32.partialorder %v7065_v45, %v4911_v40  ;;  %v4050_v48 = vsel %vm2300_vm8, 1.0, %v10136_v12 }
 0x28a   : > { %vm2047_vm1 = vmand %vm10180_vm5, %vm2015_vm6  ;;  %vm1629_vm15 = vcmp.eq.f32.partialorder %v7141_v38, %v4934_v57  ;;  %vm2301_vm13 = vcmp.gt.f32.partialorder %v2141_v55, 0.0  ;;  %vm1630_vm0 = vcmp.eq.f32.partialorder %v7141_v38, %v4936_v0  ;;  %v3811_v35 = vadd.f32 %v3810_v49, %v2141_v55 }
 0x28b   : > { %vm2048_vm4 = vmand %vm7265_vm12, %vm7363_vm7  ;;  %v7388_v1 = vsel %vm2047_vm1, %v10181_v22, 0.0  ;;  %v3882_v11 = vadd.f32 %v4050_v48, %v3881_v59  ;;  %vm1757_vm8 = vcmp.eq.f32.partialorder %v7208_v25, %v4918_v47  ;;  %vm2302_vm12 = vcmp.gt.f32.partialorder %v2142_v36, 0.0 }
 0x28c   : > { %10182 = vst [vmem:[#allocation98_spill] sm:$0xff] %v7388_v1  ;;  %v7391_v61 = vsel %vm2048_vm4, %v10183_v9, 0.0  ;;  %v2143_v37 = vsel %vm2111_vm2, %v7388_v1, 0.0  ;;  %vm10185_vm14 = vcmp.lt.s32.totalorder %v9805_v2, %v10120_v23  ;;  %v4051_v9 = vsel %vm2301_vm13, 1.0, %v10136_v12  ;;  %vm1661_vm3 = vmand %vm1533_vm9, %vm1629_vm15  ;;  %v7430_v22 = vpop.permute.xlu1 %1594 }
 0x28d   : > { %10184 = vst [vmem:[#allocation102_spill] sm:$0xff] %v7391_v61  ;;  %v2144_v20 = vsel %vm10185_vm14, %v7391_v61, 0.0  ;;  %v2472_v55 = vmax.f32 %v7388_v1, %v7391_v61  ;;  %v3812_v50 = vadd.f32 %v3811_v35, %v2142_v36  ;;  %vm10186_vm6 = vcmp.lt.s32.totalorder %v9805_v2, 200  ;;  %v10190_v35 = vld [vmem:[#allocation65_spill] sm:$0xff]  ;;  %vm1789_vm15 = vmand %vm1661_vm3, %vm1757_vm8 }
 0x28e   : > { %vm7410_vm2 = vmand %vm9459_vm10, %vm10186_vm6  ;;  %vm1534_vm7 = vcmp.eq.f32.partialorder %v7065_v45, %v4913_v21  ;;  %vm2303_vm5 = vcmp.gt.f32.partialorder %v2143_v37, 0.0  ;;  %vm1758_vm1 = vcmp.eq.f32.partialorder %v7208_v25, %v4921_v34  ;;  %v3883_v36 = vadd.f32 %v4051_v9, %v3882_v11  ;;  %v10191_v11 = vld [vmem:[#allocation67_spill] sm:$0xff] }
 0x28f   : > { %vm1662_vm13 = vmand %vm1534_vm7, %vm1630_vm0  ;;  %2473 = vmax.xlane.f32.xlu1 %v2472_v55  ;;  %v4052_v49 = vsel %vm2302_vm12, 1.0, %v10136_v12  ;;  %v3813_v48 = vadd.f32 %v3812_v50, %v2143_v37  ;;  %vm1885_vm4 = vcmp.eq.f32.partialorder %v7336_v28, %v4945_v17  ;;  %v7433_v45 = vadd.s32 %v10148_v33, %v309_v14  ;;  %v10192_v50 = vld [vmem:[#allocation17_spill] sm:$0xff] }
 0x290   : > { %v1377_v23 = vsub.f32 %v7351_v58, %v10190_v35  ;;  %vm2304_vm9 = vcmp.gt.f32.partialorder %v2144_v20, 0.0  ;;  %v3884_v38 = vadd.f32 %v4052_v49, %v3883_v36  ;;  %vm1886_vm0 = vcmp.eq.f32.partialorder %v7336_v28, %v4947_v42  ;;  %vm1790_vm12 = vmand %vm1662_vm13, %vm1758_vm1  ;;  %v10193_v36 = vld [vmem:[#allocation112_spill] sm:$0xff]  ;;  %v7479_v28 = vpop.permute.xlu1 %1846 }
 0x291   : > { %10189 = vst [vmem:[#allocation84_spill] sm:$0xff] %v7433_v45  ;;  %v1378_v55 = vsub.f32 %v7360_v3, %v10191_v11  ;;  %v4053_v9 = vsel %vm2303_vm5, 1.0, %v10136_v12  ;;  %v3814_v58 = vadd.f32 %v3813_v48, %v2144_v20  ;;  %v308_v14 = vadd.s32 88, %v10143_v8  ;;  %vm1917_vm8 = vmand %vm1789_vm15, %vm1885_vm4 }
 0x292   : > { %v7451_v53 = vadd.f32 1.0, %v10192_v50  ;;  %v7454_v49 = vadd.f32 1.0, %v10193_v36  ;;  %v10194_v61 = vsub.f32 %v7155_v62, %v10147_v44  ;;  %v3885_v3 = vadd.f32 %v4053_v9, %v3884_v38  ;;  %vm1918_vm14 = vmand %vm1790_vm12, %vm1886_vm0 }
 0x293   : > { %v10195_v37 = vsub.f32 %v7212_v52, %v10174_v54  ;;  %v4054_v25 = vsel %vm2304_vm9, 1.0, %v10136_v12  ;;  %v1437_v20 = vmul.f32 %v7249_v27, %v10122_v16  ;;  %v1438_v48 = vmul.f32 %v7316_v43, %v10054_v29  ;;  %vm7471_vm6 = vmxor %vm1917_vm8, %vm10004_vm11  ;;  %v1723_v52 = vpop.permute.xlu0 %1722  ;;  %v10201_v16 = vld [vmem:[#allocation92_spill] sm:$0xff]  ;;  %v10202_v27 = vld [vmem:[#allocation97_spill] sm:$0xff] }
 0x294   : > { %4322 = vrcp.f32 %v10194_v61  ;;  %vm2113_vm7 = vcmp.lt.s32.totalorder %v9950_v41, %v7223_v30  ;;  %v3886_v62 = vadd.f32 %v4054_v25, %v3885_v3  ;;  %vm1535_vm5 = vcmp.eq.f32.partialorder %v7270_v60, %v4911_v40  ;;  %vm7484_vm1 = vmxor %vm1918_vm14, %vm10004_vm11  ;;  %v7550_v3 = vpop.permute.xlu1 %1502  ;;  %v10229_v25 = vld [vmem:[#allocation77_spill] sm:$0xff] }
 0x295   : > { %4324 = vrcp.f32 %v10195_v37  ;;  %vm9474_vm13 = vcmp.lt.s32.totalorder %v7433_v45, 200  ;;  %vm1631_vm4 = vcmp.eq.f32.partialorder %v10201_v16, %v4934_v57  ;;  %vm1536_vm0 = vcmp.eq.f32.partialorder %v7270_v60, %v4913_v21  ;;  %vm2049_vm12 = vmand %vm9459_vm10, %vm7471_vm6 }
 0x296   : > { %4326 = vrcp.f32 %v1377_v23  ;;  %v7490_v23 = vadd.s32 %v10148_v33, %v308_v14  ;;  %vm2050_vm8 = vmand %vm7410_vm2, %vm7484_vm1  ;;  %vm1759_vm14 = vcmp.eq.f32.partialorder %v7379_v46, %v4918_v47  ;;  %v7510_v43 = vsel %vm2049_vm12, %v1437_v20, 0.0 }
 0x297   : > { %4328 = vrcp.f32 %v1378_v55  ;;  %10203 = vst [vmem:[#allocation73_spill] sm:$0xff] %v7510_v43  ;;  %vm1633_vm15 = vcmp.eq.f32.partialorder %v7430_v22, %v4934_v57  ;;  %vm1761_vm3 = vcmp.eq.f32.partialorder %v1723_v52, %v4918_v47  ;;  %vm7515_vm9 = vmand %vm1535_vm5, %vm1631_vm4  ;;  %vm1760_vm6 = vcmp.eq.f32.partialorder %v7379_v46, %v4921_v34  ;;  %v10226_v46 = vld [vmem:[#allocation42_spill] sm:$0xff] }
 0x298   : > { %10200 = vst [vmem:[#allocation39_spill] sm:$0xff] %v7490_v23  ;;  %v7521_v38 = vsel %vm2050_vm8, %v1438_v48, 0.0  ;;  %v2145_v59 = vsel %vm2113_vm7, %v7510_v43, 0.0  ;;  %vm1634_vm2 = vcmp.eq.f32.partialorder %v7430_v22, %v4936_v0  ;;  %vm10207_vm1 = vcmp.lt.s32.totalorder %v9805_v2, 200 }
 0x299   : > { %10206 = vst [vmem:[#allocation100_spill] sm:$0xff] %v7521_v38  ;;  %vm7533_vm5 = vmand %vm9474_vm13, %vm10207_vm1  ;;  %vm10210_vm4 = vcmp.eq.f32.partialorder %v10201_v16, %v4936_v0  ;;  %vm10213_vm7 = vcmp.lt.s32.totalorder %v9805_v2, %v7223_v30  ;;  %vm2305_vm8 = vcmp.gt.f32.partialorder %v2145_v59, 0.0  ;;  %v2475_v50 = vmax.f32 %v7510_v43, %v7521_v38  ;;  %v10228_v43 = vld [vmem:[#allocation55_spill] sm:$0xff] }
 0x29a   : > { %vm7540_vm12 = vmand %vm1536_vm0, %vm10210_vm4  ;;  %v2146_v14 = vsel %vm10213_vm7, %v7521_v38, 0.0  ;;  %v3815_v36 = vadd.f32 %v3814_v58, %v2145_v59  ;;  %vm1538_vm1 = vcmp.eq.f32.partialorder %v10202_v27, %v4913_v21  ;;  %v4055_v37 = vsel %vm2305_vm8, 1.0, %v10136_v12  ;;  %v10217_v58 = vld [vmem:[#allocation14_spill] sm:$0xff] }
 0x29b   : > { %vm2306_vm10 = vcmp.gt.f32.partialorder %v2146_v14, 0.0  ;;  %vm10214_vm0 = vcmp.eq.f32.partialorder %v10202_v27, %v4911_v40  ;;  %vm1762_vm7 = vcmp.eq.f32.partialorder %v1723_v52, %v4921_v34  ;;  %v986_v20 = vadd.f32 1.0, %v10217_v58  ;;  %vm7572_vm8 = vmand %vm7515_vm9, %vm1759_vm14  ;;  %2476 = vmax.xlane.f32.xlu0 %v2475_v50  ;;  %v10220_v27 = vld [vmem:[#allocation88_spill] sm:$0xff]  ;;  %v10221_v58 = vld [vmem:[#allocation43_spill] sm:$0xff] }
 0x29c   : > { %vm7561_vm4 = vmand %vm10214_vm0, %vm1633_vm15  ;;  %v7576_v61 = vadd.f32 %v3815_v36, %v2146_v14  ;;  %v3887_v29 = vadd.f32 %v4055_v37, %v3886_v62  ;;  %vm9475_vm0 = vcmp.lt.s32.totalorder %v7490_v23, 200  ;;  %v921_v59 = vmax.f32 %v10220_v27, 0.0  ;;  %v10224_v36 = vld [vmem:[#allocation90_spill] sm:$0xff]  ;;  %v10225_v37 = vld [vmem:[#allocation101_spill] sm:$0xff] }
 0x29d   : > { %vm1666_vm15 = vmand %vm1538_vm1, %vm1634_vm2  ;;  %v919_v60 = vmax.f32 %v10221_v58, 0.0  ;;  %v920_v30 = vmax.f32 %v7451_v53, 0.0  ;;  %v4056_v22 = vsel %vm2306_vm10, 1.0, %v10136_v12  ;;  %v922_v53 = vmax.f32 %v10224_v36, 0.0  ;;  %v10227_v58 = vld [vmem:[#allocation15_spill] sm:$0xff] }
 0x29e   : > { %v7582_v16 = vpop.eup %4322  ;;  %vm7592_vm9 = vmand %vm7540_vm12, %vm1760_vm6  ;;  %v1015_v27 = vmax.f32 %v10225_v37, 0.0  ;;  %vm1889_vm2 = vcmp.eq.f32.partialorder %v10226_v46, %v4945_v17  ;;  %v7606_v9 = vadd.f32 %v4056_v22, %v3887_v29  ;;  %v1016_v38 = vmax.f32 %v10227_v58, 0.0  ;;  %v7626_v29 = vpop.permute.xlu1 %1598 }
 0x29f   : > { %vm1793_vm14 = vmand %vm7561_vm4, %vm1761_vm3  ;;  %v4325_v50 = vpop.eup %4324  ;;  %v7612_v1 = vadd.f32 1.0, %v10228_v43  ;;  %vm1890_vm10 = vcmp.eq.f32.partialorder %v10226_v46, %v4947_v42  ;;  %v1347_v36 = vadd.f32 %v10135_v39, %v10229_v25  ;;  %vm10230_vm12 = vcmp.lt.s32.totalorder %v9805_v2, 200  ;;  %v10233_v43 = vld [vmem:[#allocation56_spill] sm:$0xff] }
 0x2a0   : > { %vm1794_vm6 = vmand %vm1666_vm15, %vm1762_vm7  ;;  %v4327_v14 = vpop.eup %4326  ;;  %v7629_v37 = vadd.f32 1.0, %v10233_v43  ;;  %v1017_v46 = vmax.f32 %v7454_v49, 0.0  ;;  %v1018_v58 = vmax.f32 %v986_v20, 0.0  ;;  %v1348_v19 = vadd.f32 %v10146_v15, %v10229_v25  ;;  %v10235_v20 = vld [vmem:[#allocation116_spill] sm:$0xff] }
 0x2a1   : > { %vm1921_vm3 = vmand %vm1793_vm14, %vm1889_vm2  ;;  %v4329_v22 = vpop.eup %4328  ;;  %v7636_v18 = vadd.f32 %v10135_v39, %v10234_v4  ;;  %v7638_v63 = vmul.f32 %v1015_v27, %v919_v60  ;;  %v7640_v10 = vmul.f32 %v1016_v38, %v920_v30  ;;  %v310_v43 = vadd.s32 104, %v10143_v8  ;;  %v10238_v38 = vld [vmem:[#allocation118_spill] sm:$0xff] }
 0x2a2   : > { %vm7622_vm1 = vmand %vm9475_vm0, %vm10230_vm12  ;;  %v7646_v49 = vadd.f32 %v10146_v15, %v10234_v4  ;;  %v7649_v6 = vadd.f32 1.0, %v10235_v20  ;;  %vm1887_vm14 = vcmp.eq.f32.partialorder %v7479_v28, %v4945_v17  ;;  %v1441_v30 = vmul.f32 %v4327_v14, %v10190_v35  ;;  %v7679_v14 = vpop.permute.xlu1 %1726 }
 0x2a3   : > { %vm1922_vm4 = vmand %vm1794_vm6, %vm1890_vm10  ;;  %v7660_v60 = vadd.f32 1.0, %v10238_v38  ;;  %v1379_v27 = vsub.f32 %v1347_v36, %v7638_v63  ;;  %vm1888_vm6 = vcmp.eq.f32.partialorder %v7479_v28, %v4947_v42  ;;  %v1442_v4 = vmul.f32 %v4329_v22, %v10191_v11 }
 0x2a4   : > { %vm2021_vm7 = vmxor %vm1921_vm3, %vm10004_vm11  ;;  %v7668_v20 = vmul.f32 %v1017_v46, %v921_v59  ;;  %v7670_v32 = vmul.f32 %v1018_v58, %v922_v53  ;;  %v1380_v5 = vsub.f32 %v1348_v19, %v7640_v10  ;;  %v923_v36 = vmax.f32 %v7612_v1, 0.0 }
 0x2a5   : > { %vm7652_vm15 = vmxor %vm1922_vm4, %vm10004_vm11  ;;  %v924_v38 = vmax.f32 %v7629_v37, 0.0  ;;  %v7691_v11 = vadd.s32 %v10148_v33, %v310_v43  ;;  %v1019_v53 = vmax.f32 %v7649_v6, 0.0  ;;  %v1020_v22 = vmax.f32 %v7660_v60, 0.0 }
 0x2a6   : > { %vm2053_vm2 = vmand %vm9474_vm13, %vm2021_vm7  ;;  %v1381_v55 = vsub.f32 %v7636_v18, %v7668_v20  ;;  %v1382_v59 = vsub.f32 %v7646_v49, %v7670_v32  ;;  %4330 = vrcp.f32 %v1379_v27  ;;  %vm2118_vm4 = vcmp.lt.s32.totalorder %v9805_v2, %v7433_v45 }
 0x2a7   : > { %vm2054_vm10 = vmand %vm7533_vm5, %vm7652_vm15  ;;  %v7677_v35 = vsel %vm2053_vm2, %v1441_v30, 0.0  ;;  %10239 = vst [vmem:[#allocation13_spill] sm:$0xff] %v7691_v11  ;;  %4332 = vrcp.f32 %v1380_v5  ;;  %v1439_v28 = vmul.f32 %v7582_v16, %v10147_v44  ;;  %v1440_v6 = vmul.f32 %v4325_v50, %v10174_v54  ;;  %v7727_v5 = vpop.permute.xlu1 %1506 }
 0x2a8   : > { %vm1919_vm3 = vmand %vm7572_vm8, %vm1887_vm14  ;;  %v7688_v19 = vsel %vm2054_vm10, %v1442_v4, 0.0  ;;  %vm2117_vm8 = vcmp.lt.s32.totalorder %v9950_v41, %v7433_v45  ;;  %vm1539_vm14 = vcmp.eq.f32.partialorder %v7550_v3, %v4911_v40  ;;  %vm2116_vm2 = vcmp.lt.s32.totalorder %v9805_v2, %v7490_v23 }
 0x2a9   : > { %vm1920_vm5 = vmand %vm7592_vm9, %vm1888_vm6  ;;  %v2481_v48 = vmax.f32 %v7677_v35, %v7688_v19  ;;  %vm2115_vm9 = vcmp.lt.s32.totalorder %v9950_v41, %v7490_v23  ;;  %vm9476_vm6 = vcmp.lt.s32.totalorder %v7691_v11, 200  ;;  %v311_v44 = vadd.s32 112, %v10143_v8  ;;  %v10301_v23 = vld [vmem:[#allocation98_spill] sm:$0xff] }
 0x2aa   : > { %vm2019_vm12 = vmxor %vm1919_vm3, %vm10004_vm11  ;;  %vm1540_vm3 = vcmp.eq.f32.partialorder %v7550_v3, %v4913_v21  ;;  %v2149_v16 = vsel %vm2117_vm8, %v7677_v35, 0.0  ;;  %v2150_v49 = vsel %vm2118_vm4, %v7688_v19, 0.0  ;;  %4334 = vrcp.f32 %v1381_v55 }
 0x2ab   : > { %vm7712_vm7 = vmxor %vm1920_vm5, %vm10004_vm11  ;;  %2482 = vmax.xlane.f32.xlu0 %v2481_v48  ;;  %vm1635_vm5 = vcmp.eq.f32.partialorder %v7626_v29, %v4934_v57  ;;  %v1855_v60 = vpop.permute.xlu1 %1854  ;;  %4336 = vrcp.f32 %v1382_v59  ;;  %vm2310_vm13 = vcmp.gt.f32.partialorder %v2150_v49, 0.0  ;;  %v7795_v55 = vmul.f32 %v1019_v53, %v923_v36 }
 0x2ac   : > { %vm2051_vm15 = vmand %vm9475_vm0, %vm2019_vm12  ;;  %vm1636_vm12 = vcmp.eq.f32.partialorder %v7626_v29, %v4936_v0  ;;  %v7799_v48 = vmul.f32 %v1020_v22, %v924_v38  ;;  %v312_v59 = vadd.s32 120, %v10143_v8  ;;  %v1352_v37 = vadd.f32 %v10146_v15, %v6985_v56  ;;  %v10246_v8 = vld [vmem:[#allocation29_spill] sm:$0xff]  ;;  %v10248_v22 = vld [vmem:[#allocation27_spill] sm:$0xff] }
 0x2ad   : > { %vm2052_vm10 = vmand %vm7622_vm1, %vm7712_vm7  ;;  %v7737_v54 = vsel %vm2051_vm15, %v1439_v28, 0.0  ;;  %vm1763_vm1 = vcmp.eq.f32.partialorder %v7679_v14, %v4918_v47  ;;  %vm10242_vm15 = vcmp.lt.s32.totalorder %v9805_v2, 200  ;;  %v4060_v36 = vsel %vm2310_vm13, 1.0, %v10136_v12 }
 0x2ae   : > { %v7747_v62 = vsel %vm2052_vm10, %v1440_v6, 0.0  ;;  %v2147_v50 = vsel %vm2115_vm9, %v7737_v54, 0.0  ;;  %vm7760_vm8 = vmand %vm9476_vm6, %vm10242_vm15  ;;  %vm1764_vm10 = vcmp.eq.f32.partialorder %v7679_v14, %v4921_v34  ;;  %vm2309_vm15 = vcmp.gt.f32.partialorder %v2149_v16, 0.0 }
 0x2af   : > { %v2148_v52 = vsel %vm2116_vm2, %v7747_v62, 0.0  ;;  %vm2307_vm7 = vcmp.gt.f32.partialorder %v2147_v50, 0.0  ;;  %v2478_v46 = vmax.f32 %v7737_v54, %v7747_v62  ;;  %v3817_v58 = vadd.f32 %v7576_v61, %v2147_v50  ;;  %vm1667_vm2 = vmand %vm1539_vm14, %vm1635_vm5 }
 0x2b0   : > { %vm2308_vm9 = vcmp.gt.f32.partialorder %v2148_v52, 0.0  ;;  %v4057_v25 = vsel %vm2307_vm7, 1.0, %v10136_v12  ;;  %vm1668_vm4 = vmand %vm1540_vm3, %vm1636_vm12  ;;  %vm1891_vm5 = vcmp.eq.f32.partialorder %v1855_v60, %v4945_v17  ;;  %vm1892_vm7 = vcmp.eq.f32.partialorder %v1855_v60, %v4947_v42  ;;  %v4331_v3 = vpop.eup %4330 }
 0x2b1   : > { %2479 = vmax.xlane.f32.xlu1 %v2478_v46  ;;  %v3818_v61 = vadd.f32 %v3817_v58, %v2148_v52  ;;  %v3889_v30 = vadd.f32 %v4057_v25, %v7606_v9  ;;  %v4058_v27 = vsel %vm2308_vm9, 1.0, %v10136_v12  ;;  %vm1795_vm14 = vmand %vm1667_vm2, %vm1763_vm1  ;;  %v7788_v9 = vadd.s32 %v10148_v33, %v311_v44  ;;  %v4333_v28 = vpop.eup %4332  ;;  %v1735_v25 = vpop.permute.xlu0 %1734  ;;  %v8074_v52 = vld [vmem:[%s4566_s27 + $0x10] sm:$0xff] }
 0x2b2   : > { %vm1796_vm3 = vmand %vm1668_vm4, %vm1764_vm10  ;;  %v4059_v18 = vsel %vm2309_vm15, 1.0, %v10136_v12  ;;  %v1351_v14 = vadd.f32 %v10135_v39, %v6985_v56  ;;  %vm2119_vm1 = vcmp.lt.s32.totalorder %v9950_v41, %v7691_v11  ;;  %vm2120_vm2 = vcmp.lt.s32.totalorder %v9805_v2, %v7691_v11  ;;  %v1731_v39 = vpop.permute.xlu1 %1730 }
 0x2b3   : > { %10245 = vst [vmem:[#allocation70_spill] sm:$0xff] %v7788_v9  ;;  %v3819_v29 = vadd.f32 %v3818_v61, %v2149_v16  ;;  %v3890_v4 = vadd.f32 %v4058_v27, %v3889_v30  ;;  %vm1923_vm12 = vmand %vm1795_vm14, %vm1891_vm5  ;;  %vm9477_vm15 = vcmp.lt.s32.totalorder %v7788_v9, 200  ;;  %vm1637_vm4 = vcmp.eq.f32.partialorder %v10246_v8, %v4934_v57 }
 0x2b4   : > { %vm1924_vm9 = vmand %vm1796_vm3, %vm1892_vm7  ;;  %vm1541_vm14 = vcmp.eq.f32.partialorder %v7727_v5, %v4911_v40  ;;  %v1443_v38 = vmul.f32 %v4331_v3, %v7638_v63  ;;  %vm1638_vm13 = vcmp.eq.f32.partialorder %v10246_v8, %v4936_v0  ;;  %vm1542_vm7 = vcmp.eq.f32.partialorder %v7727_v5, %v4913_v21  ;;  %v4335_v50 = vpop.eup %4334 }
 0x2b5   : > { %v3891_v6 = vadd.f32 %v4059_v18, %v3890_v4  ;;  %v3820_v1 = vadd.f32 %v3819_v29, %v2150_v49  ;;  %vm2023_vm10 = vmxor %vm1923_vm12, %vm10004_vm11  ;;  %v1444_v15 = vmul.f32 %v4333_v28, %v7640_v10  ;;  %v7832_v53 = vadd.s32 %v10148_v33, %v312_v59  ;;  %v7889_v60 = vpop.eup %4336 }
 0x2b6   : > { %vm2024_vm5 = vmxor %vm1924_vm9, %vm10004_vm11  ;;  %vm1543_vm12 = vcmp.eq.f32.partialorder %v10248_v22, %v4911_v40  ;;  %v1383_v63 = vsub.f32 %v1351_v14, %v7795_v55  ;;  %vm1765_vm0 = vcmp.eq.f32.partialorder %v1731_v39, %v4918_v47  ;;  %v1384_v10 = vsub.f32 %v1352_v37, %v7799_v48  ;;  %v1607_v49 = vpop.permute.xlu1 %1606 }
 0x2b7   : > { %v3892_v56 = vadd.f32 %v4060_v36, %v3891_v6  ;;  %vm2055_vm3 = vmand %vm9476_vm6, %vm2023_vm10  ;;  %10247 = vst [vmem:[#allocation11_spill] sm:$0xff] %v7832_v53  ;;  %vm9490_vm6 = vcmp.lt.s32.totalorder %v7832_v53, 200  ;;  %v1445_v18 = vmul.f32 %v4335_v50, %v7668_v20  ;;  %v1446_v20 = vmul.f32 %v7889_v60, %v7670_v32  ;;  %v8069_v50 = vld [vmem:[%s4566_s27 + $0x18] sm:$0xff] }
 0x2b8   : > { %vm2056_vm9 = vmand %vm7760_vm8, %vm2024_vm5  ;;  %v7839_v44 = vsel %vm2055_vm3, %v1443_v38, 0.0  ;;  %vm1766_vm8 = vcmp.eq.f32.partialorder %v1731_v39, %v4921_v34  ;;  %4338 = vrcp.f32 %v1383_v63 }
 0x2b9   : > { %vm1669_vm10 = vmand %vm1541_vm14, %vm1637_vm4  ;;  %v7849_v33 = vsel %vm2056_vm9, %v1444_v15, 0.0  ;;  %v2151_v16 = vsel %vm2119_vm1, %v7839_v44, 0.0  ;;  %4340 = vrcp.f32 %v1384_v10  ;;  %v8059_v10 = vld [vmem:[%s4566_s27] sm:$0xff] }
 0x2ba   : > { %vm7862_vm5 = vmand %vm1542_vm7, %vm1638_vm13  ;;  %v2152_v46 = vsel %vm2120_vm2, %v7849_v33, 0.0  ;;  %vm2311_vm4 = vcmp.gt.f32.partialorder %v2151_v16, 0.0  ;;  %v3821_v58 = vadd.f32 %v3820_v1, %v2151_v16  ;;  %v2484_v43 = vmax.f32 %v7839_v44, %v7849_v33  ;;  %v8064_v16 = vld [vmem:[%s4566_s27 + $0x8] sm:$0xff] }
 0x2bb   : > { %vm2312_vm1 = vcmp.gt.f32.partialorder %v2152_v46, 0.0  ;;  %v4061_v61 = vsel %vm2311_vm4, 1.0, %v10136_v12  ;;  %vm7875_vm14 = vmand %vm1669_vm10, %vm1765_vm0  ;;  %vm1639_vm13 = vcmp.eq.f32.partialorder %v1607_v49, %v4934_v57  ;;  %vm1640_vm2 = vcmp.eq.f32.partialorder %v1607_v49, %v4936_v0 }
 0x2bc   : > { %vm10253_vm7 = vcmp.lt.s32.totalorder %v9805_v2, 200  ;;  %vm1544_vm0 = vcmp.eq.f32.partialorder %v10248_v22, %v4913_v21  ;;  %v7893_v27 = vadd.f32 %v3821_v58, %v2152_v46  ;;  %v3893_v29 = vadd.f32 %v4061_v61, %v3892_v56  ;;  %2485 = vmax.xlane.f32.xlu1 %v2484_v43  ;;  %vm1671_vm9 = vmand %vm1543_vm12, %vm1639_vm13  ;;  %v1859_v21 = vpop.permute.xlu1 %1858  ;;  %v8079_v46 = vld [vmem:[%s4566_s27 + $0x28] sm:$0xff]  ;;  %v8084_v58 = vld [vmem:[%s4566_s27 + $0x20] sm:$0xff] }
 0x2bd   : > { %vm7885_vm3 = vmand %vm9477_vm15, %vm10253_vm7  ;;  %v4062_v57 = vsel %vm2312_vm1, 1.0, %v10136_v12  ;;  %vm1767_vm4 = vcmp.eq.f32.partialorder %v1735_v25, %v4918_v47  ;;  %vm1768_vm15 = vcmp.eq.f32.partialorder %v1735_v25, %v4921_v34  ;;  %vm1893_vm1 = vcmp.eq.f32.partialorder %v1859_v21, %v4945_v17  ;;  %v8089_v43 = vld [vmem:[%s4566_s27 + $0x30] sm:$0xff]  ;;  %v10271_v61 = vld [vmem:[#allocation26_spill] sm:$0xff] }
 0x2be   : > { %vm1672_vm10 = vmand %vm1544_vm0, %vm1640_vm2  ;;  %v7900_v0 = vadd.f32 %v4062_v57, %v3893_v29  ;;  %vm1894_vm13 = vcmp.eq.f32.partialorder %v1859_v21, %v4947_v42 }
 0x2bf   : > { %vm1798_vm7 = vmand %vm7862_vm5, %vm1766_vm8  ;;  %vm10260_vm5 = vcmp.lt.s32.totalorder %v9805_v2, 200 }
 0x2c0   : > { %vm7908_vm12 = vmand %vm1671_vm9, %vm1767_vm4  ;;  %v1863_v3 = vpop.permute.xlu1 %1862 }
 0x2c1   : > { %vm7914_vm2 = vmand %vm1672_vm10, %vm1768_vm15  ;;  %vm182_vm15 = vcmask 7168   ;;  %vm2121_vm10 = vcmp.lt.s32.totalorder %v9950_v41, %v7788_v9 }
 0x2c2   : > { %vm1925_vm8 = vmand %vm7875_vm14, %vm1893_vm1  ;;  %vm1895_vm1 = vcmp.eq.f32.partialorder %v1863_v3, %v4945_v17  ;;  %183 = vst.msk [vmem:[#allocation2] sm:$0xff] %vm182_vm15, %v10136_v12  ;;  %v4339_v14 = vpop.eup %4338 }
 0x2c3   : > { %vm7924_vm0 = vmand %vm9490_vm6, %vm10260_vm5  ;;  %199 = vst.msk [vmem:[#allocation3] sm:$0xff] %vm182_vm15, %v10136_v12  ;;  %vm1896_vm5 = vcmp.eq.f32.partialorder %v1863_v3, %v4947_v42  ;;  %v4341_v42 = vpop.eup %4340  ;;  %v1447_v17 = vmul.f32 %v4339_v14, %v7795_v55  ;;  %v10277_v3 = vld [vmem:[#allocation45_spill] sm:$0xff] }
 0x2c4   : > { %vm1926_vm9 = vmand %vm1798_vm7, %vm1894_vm13  ;;  %184 = vst.msk [vmem:[#allocation2 + $0x8] sm:$0xff] %vm182_vm15, %v10136_v12  ;;  %vm2122_vm7 = vcmp.lt.s32.totalorder %v9805_v2, %v7788_v9  ;;  %vm10267_vm13 = vcmp.lt.s32.totalorder %v7788_v9, 200  ;;  %v1448_v56 = vmul.f32 %v4341_v42, %v7799_v48 }
 0x2c5   : > { %vm7929_vm4 = vmxor %vm1925_vm8, %vm10004_vm11  ;;  %185 = vst.msk [vmem:[#allocation2 + $0x10] sm:$0xff] %vm182_vm15, %v10136_v12 }
 0x2c6   : > { %vm7937_vm14 = vmxor %vm1926_vm9, %vm10004_vm11  ;;  %186 = vst.msk [vmem:[#allocation2 + $0x18] sm:$0xff] %vm182_vm15, %v10136_v12 }
 0x2c7   : > { %187 = vst.msk [vmem:[#allocation2 + $0x20] sm:$0xff] %vm182_vm15, %v10136_v12  ;;  %188 = vst.msk [vmem:[#allocation2 + $0x28] sm:$0xff] %vm182_vm15, %v10136_v12 }
 0x2c8   : > { %189 = vst.msk [vmem:[#allocation2 + $0x30] sm:$0xff] %vm182_vm15, %v10136_v12  ;;  %190 = vst.msk [vmem:[#allocation2 + $0x38] sm:$0xff] %vm182_vm15, %v10136_v12 }
 0x2c9   : > { %191 = vst.msk [vmem:[#allocation2 + $0x40] sm:$0xff] %vm182_vm15, %v10136_v12  ;;  %192 = vst.msk [vmem:[#allocation2 + $0x48] sm:$0xff] %vm182_vm15, %v10136_v12  ;;  %v8093_v49 = vld [vmem:[#allocation2] sm:$0xff] }
 0x2ca   : > { %193 = vst.msk [vmem:[#allocation2 + $0x50] sm:$0xff] %vm182_vm15, %v10136_v12  ;;  %194 = vst.msk [vmem:[#allocation2 + $0x58] sm:$0xff] %vm182_vm15, %v10136_v12 }
 0x2cb   : > { %195 = vst.msk [vmem:[#allocation2 + $0x60] sm:$0xff] %vm182_vm15, %v10136_v12  ;;  %196 = vst.msk [vmem:[#allocation2 + $0x68] sm:$0xff] %vm182_vm15, %v10136_v12 }
 0x2cc   : > { %197 = vst.msk [vmem:[#allocation2 + $0x70] sm:$0xff] %vm182_vm15, %v10136_v12  ;;  %198 = vst.msk [vmem:[#allocation2 + $0x78] sm:$0xff] %vm182_vm15, %v10136_v12 }
 0x2cd   : > { %200 = vst.msk [vmem:[#allocation3 + $0x8] sm:$0xff] %vm182_vm15, %v10136_v12  ;;  %201 = vst.msk [vmem:[#allocation3 + $0x10] sm:$0xff] %vm182_vm15, %v10136_v12 }
 0x2ce   : > { %202 = vst.msk [vmem:[#allocation3 + $0x18] sm:$0xff] %vm182_vm15, %v10136_v12  ;;  %203 = vst.msk [vmem:[#allocation3 + $0x20] sm:$0xff] %vm182_vm15, %v10136_v12 }
 0x2cf   : > { %204 = vst.msk [vmem:[#allocation3 + $0x28] sm:$0xff] %vm182_vm15, %v10136_v12  ;;  %205 = vst.msk [vmem:[#allocation3 + $0x30] sm:$0xff] %vm182_vm15, %v10136_v12 }
 0x2d0   : > { %206 = vst.msk [vmem:[#allocation3 + $0x38] sm:$0xff] %vm182_vm15, %v10136_v12  ;;  %207 = vst.msk [vmem:[#allocation3 + $0x40] sm:$0xff] %vm182_vm15, %v10136_v12 }
 0x2d1   : > { %208 = vst.msk [vmem:[#allocation3 + $0x48] sm:$0xff] %vm182_vm15, %v10136_v12  ;;  %209 = vst.msk [vmem:[#allocation3 + $0x50] sm:$0xff] %vm182_vm15, %v10136_v12 }
 0x2d2   : > { %210 = vst.msk [vmem:[#allocation3 + $0x58] sm:$0xff] %vm182_vm15, %v10136_v12  ;;  %211 = vst.msk [vmem:[#allocation3 + $0x60] sm:$0xff] %vm182_vm15, %v10136_v12 }
 0x2d3   : > { %212 = vst.msk [vmem:[#allocation3 + $0x68] sm:$0xff] %vm182_vm15, %v10136_v12  ;;  %213 = vst.msk [vmem:[#allocation3 + $0x70] sm:$0xff] %vm182_vm15, %v10136_v12 }
 0x2d4   : > { %214 = vst.msk [vmem:[#allocation3 + $0x78] sm:$0xff] %vm182_vm15, %v10136_v12  ;;  %vm2057_vm8 = vmand %vm10267_vm13, %vm7929_vm4 }
 0x2d5   : > { %vm2058_vm9 = vmand %vm7885_vm3, %vm7937_vm14  ;;  %v8019_v28 = vsel %vm2057_vm8, %v1445_v18, 0.0  ;;  %10270 = vst [vmem:[#allocation10_spill] sm:$0xff] %v8093_v49 }
 0x2d6   : > { %v8021_v6 = vsel %vm2058_vm9, %v1446_v20, 0.0  ;;  %v2153_v32 = vsel %vm2121_vm10, %v8019_v28, 0.0  ;;  %vm1927_vm4 = vmand %vm7908_vm12, %vm1895_vm1 }
 0x2d7   : > { %v2154_v1 = vsel %vm2122_vm7, %v8021_v6, 0.0  ;;  %vm2313_vm13 = vcmp.gt.f32.partialorder %v2153_v32, 0.0  ;;  %v3823_v37 = vadd.f32 %v7893_v27, %v2153_v32  ;;  %vm1928_vm3 = vmand %vm7914_vm2, %vm1896_vm5  ;;  %v2487_v36 = vmax.f32 %v8019_v28, %v8021_v6  ;;  %v8111_v27 = vld [vmem:[#allocation2 + $0x18] sm:$0xff] }
 0x2d8   : > { %vm2314_vm14 = vcmp.gt.f32.partialorder %v2154_v1, 0.0  ;;  %v4063_v39 = vsel %vm2313_vm13, 1.0, %v10136_v12  ;;  %vm2027_vm10 = vmxor %vm1927_vm4, %vm10004_vm11  ;;  %10272 = vst [vmem:[#allocation57_spill] sm:$0xff] %v8111_v27 }
 0x2d9   : > { %vm2028_vm12 = vmxor %vm1928_vm3, %vm10004_vm11  ;;  %2488 = vmax.xlane.f32.xlu0 %v2487_v36  ;;  %v8041_v8 = vadd.f32 %v3823_v37, %v2154_v1  ;;  %v3895_v38 = vadd.f32 %v4063_v39, %v7900_v0  ;;  %v4064_v15 = vsel %vm2314_vm14, 1.0, %v10136_v12  ;;  %v8339_v12 = vld [vmem:[#allocation2 + $0x50] sm:$0xff] }
 0x2da   : > { %vm2059_vm2 = vmand %vm9490_vm6, %vm2027_vm10  ;;  %10303 = vst [vmem:[#allocation79_spill] sm:$0xff] %v8339_v12 }
 0x2db   : > { %10268 = vst [vmem:[#allocation18_spill] sm:$0xff] %v8041_v8  ;;  %vm2060_vm1 = vmand %vm7924_vm0, %vm2028_vm12  ;;  %v8050_v55 = vsel %vm2059_vm2, %v1447_v17, 0.0  ;;  %v8052_v22 = vadd.f32 %v4064_v15, %v3895_v38  ;;  %v8171_v17 = vld [vmem:[#allocation2 + $0x10] sm:$0xff]  ;;  %v10284_v38 = vld [vmem:[#allocation22_spill] sm:$0xff] }
 0x2dc   : > { %v8054_v63 = vsel %vm2060_vm1, %v1448_v56, 0.0  ;;  %10283 = vst [vmem:[#allocation37_spill] sm:$0xff] %v8171_v17  ;;  %v10285_v56 = vld [vmem:[#allocation38_spill] sm:$0xff] }
 0x2dd   : > { %10269 = vst [vmem:[#allocation68_spill] sm:$0xff] %v8052_v22  ;;  %v2490_v48 = vmax.f32 %v8050_v55, %v8054_v63  ;;  %v10298_v22 = vld [vmem:[#allocation76_spill] sm:$0xff]  ;;  %v10302_v8 = vld [vmem:[#allocation102_spill] sm:$0xff] }
 0x2df   : > { %2491 = vmax.xlane.f32.xlu1 %v2490_v48  ;;  %v8178_v48 = vld [vmem:[#allocation2 + $0x8] sm:$0xff] }
 0x2e0   : > { %10286 = vst [vmem:[#allocation28_spill] sm:$0xff] %v8178_v48 }
 0x2e2   : > { %v8095_v25 = vpop.xlane.xlu1 %2446 }
 0x2e3   : > { %vm2493_vm11 = vcmp.eq.f32.partialorder %v6694_v31, %v8095_v25  ;;  %vm2494_vm0 = vcmp.eq.f32.partialorder %v10271_v61, %v8095_v25  ;;  %vm3095_vm7 = vcmp.gt.f32.partialorder %v8095_v25, %v8093_v49  ;;  %v8180_v61 = vld [vmem:[#allocation2 + $0x20] sm:$0xff] }
 0x2e4   : > { %v3176_v5 = vsel %vm3095_vm7, %v8095_v25, %v8093_v49  ;;  %v2525_v30 = vsel %vm2493_vm11, %v9950_v41, 256  ;;  %v2526_v60 = vsel %vm2494_vm0, %v9805_v2, 256  ;;  %10287 = vst [vmem:[#allocation23_spill] sm:$0xff] %v8180_v61 }
 0x2e5   : > { %3192 = vst.msk [vmem:[#allocation2] sm:$0xff] %vm182_vm15, %v3176_v5  ;;  %vm2557_vm8 = vcmp.lt.s32.totalorder %v2525_v30, %v2526_v60  ;;  %v10288_v5 = vld [vmem:[#allocation47_spill] sm:$0xff] }
 0x2e6   : > { %v8127_v57 = vsel %vm2557_vm8, %v2525_v30, %v2526_v60  ;;  %v10289_v30 = vld [vmem:[#allocation89_spill] sm:$0xff] }
 0x2e7   : > { %v2560_v34 = vshra.s32 %v8127_v57, 16 }
 0x2e9   : > { %v8154_v20 = vcvt.s32.f32 %v2560_v34 }
 0x2ea   : > { %v8113_v31 = vpop.xlane.xlu1 %2455 }
 0x2eb   : > { %10273 = vst [vmem:[#allocation82_spill] sm:$0xff] %v8113_v31  ;;  %vm3098_vm5 = vcmp.gt.f32.partialorder %v8113_v31, %v8111_v27  ;;  %vm2499_vm9 = vcmp.eq.f32.partialorder %v6820_v26, %v8113_v31  ;;  %vm2500_vm4 = vcmp.eq.f32.partialorder %v6827_v7, %v8113_v31 }
 0x2ec   : > { %v3179_v29 = vsel %vm3098_vm5, %v8113_v31, %v8111_v27  ;;  %v2531_v21 = vsel %vm2499_vm9, %v9950_v41, 256  ;;  %v2532_v40 = vsel %vm2500_vm4, %v9805_v2, 256 }
 0x2ed   : > { %3195 = vst.msk [vmem:[#allocation2 + $0x18] sm:$0xff] %vm182_vm15, %v3179_v29  ;;  %vm2605_vm10 = vcmp.lt.s32.totalorder %v2531_v21, %v2532_v40 }
 0x2ee   : > { %v8160_v32 = vsel %vm2605_vm10, %v2531_v21, %v2532_v40 }
 0x2ef   : > { %3211 = vrot.lane.b32.xlu0 %v8059_v10, %s4490_s5 }
 0x2f0   : > { %3213 = vrot.lane.b32.xlu1 %v8064_v16, %s4490_s5 }
 0x2f1   : > { %v8137_v26 = vpop.xlane.xlu1 %2461 }
 0x2f2   : > { %10275 = vst [vmem:[#allocation108_spill] sm:$0xff] %v8137_v26  ;;  %vm2503_vm14 = vcmp.eq.f32.partialorder %v6904_v51, %v8137_v26  ;;  %vm2504_vm12 = vcmp.eq.f32.partialorder %v10277_v3, %v8137_v26  ;;  %v8156_v51 = vld [vmem:[#allocation2 + $0x28] sm:$0xff] }
 0x2f3   : > { %3217 = vrot.lane.b32.xlu0 %v8069_v50, %s4490_s5  ;;  %10280 = vst [vmem:[#allocation72_spill] sm:$0xff] %v8156_v51  ;;  %v2535_v42 = vsel %vm2503_vm14, %v9950_v41, 256  ;;  %v2536_v1 = vsel %vm2504_vm12, %v9805_v2, 256  ;;  %vm3100_vm4 = vcmp.gt.f32.partialorder %v8137_v26, %v8156_v51 }
 0x2f4   : > { %3215 = vrot.lane.b32.xlu1 %v8074_v52, %s4490_s5 }
 0x2f5   : > { %v8129_v0 = vpop.xlane.xlu0 %2449 }
 0x2f6   : > { %10274 = vst [vmem:[#allocation117_spill] sm:$0xff] %v8129_v0  ;;  %vm2495_vm13 = vcmp.eq.f32.partialorder %v6955_v24, %v8129_v0  ;;  %vm2496_vm3 = vcmp.eq.f32.partialorder %v6979_v13, %v8129_v0  ;;  %v10278_v24 = vld [vmem:[#allocation46_spill] sm:$0xff]  ;;  %vm3096_vm12 = vcmp.gt.f32.partialorder %v8129_v0, %v8178_v48 }
 0x2f7   : > { %3221 = vrot.lane.b32.xlu0 %v8079_v46, %s4490_s5  ;;  %v2527_v7 = vsel %vm2495_vm13, %v9950_v41, 256  ;;  %v2528_v47 = vsel %vm2496_vm3, %v9805_v2, 256  ;;  %v10279_v13 = vld [vmem:[#allocation86_spill] sm:$0xff] }
 0x2f8   : > { %3219 = vrot.lane.b32.xlu1 %v8084_v58, %s4490_s5  ;;  %vm2573_vm11 = vcmp.lt.s32.totalorder %v2527_v7, %v2528_v47 }
 0x2f9   : > { %v8144_v4 = vpop.xlane.xlu0 %2452  ;;  %v8158_v14 = vpop.xlane.xlu1 %2467  ;;  %v8169_v39 = vsel %vm2573_vm11, %v2527_v7, %v2528_v47  ;;  %v8195_v7 = vld [vmem:[#allocation2 + $0x38] sm:$0xff] }
 0x2fa   : > { %10276 = vst [vmem:[#allocation109_spill] sm:$0xff] %v8144_v4  ;;  %vm2497_vm2 = vcmp.eq.f32.partialorder %v10278_v24, %v8144_v4  ;;  %vm2498_vm1 = vcmp.eq.f32.partialorder %v10279_v13, %v8144_v4  ;;  %10281 = vst [vmem:[#allocation75_spill] sm:$0xff] %v8158_v14  ;;  %vm2507_vm13 = vcmp.eq.f32.partialorder %v10288_v5, %v8158_v14  ;;  %v2576_v40 = vshra.s32 %v8169_v39, 16 }
 0x2fb   : > { %v2529_v18 = vsel %vm2497_vm2, %v9950_v41, 256  ;;  %v2530_v59 = vsel %vm2498_vm1, %v9805_v2, 256  ;;  %vm2508_vm3 = vcmp.eq.f32.partialorder %v10289_v30, %v8158_v14  ;;  %vm3097_vm10 = vcmp.gt.f32.partialorder %v8144_v4, %v8171_v17  ;;  %10290 = vst [vmem:[#allocation93_spill] sm:$0xff] %v8195_v7 }
 0x2fc   : > { %3223 = vrot.lane.b32.xlu1 %v8089_v43, %s4490_s5  ;;  %vm2589_vm0 = vcmp.lt.s32.totalorder %v2529_v18, %v2530_v59  ;;  %v3178_v34 = vsel %vm3097_vm10, %v8144_v4, %v8171_v17  ;;  %vm2637_vm1 = vcmp.lt.s32.totalorder %v2535_v42, %v2536_v1  ;;  %v3177_v24 = vsel %vm3096_vm12, %v8129_v0, %v8178_v48 }
 0x2fd   : > { %v8167_v36 = vsel %vm2589_vm0, %v2529_v18, %v2530_v59  ;;  %3194 = vst.msk [vmem:[#allocation2 + $0x10] sm:$0xff] %vm182_vm15, %v3178_v34  ;;  %3193 = vst.msk [vmem:[#allocation2 + $0x8] sm:$0xff] %vm182_vm15, %v3177_v24  ;;  %v3181_v18 = vsel %vm3100_vm4, %v8137_v26, %v8156_v51  ;;  %vm3102_vm11 = vcmp.gt.f32.partialorder %v8158_v14, %v8195_v7  ;;  %v2539_v59 = vsel %vm2507_vm13, %v9950_v41, 256 }
 0x2fe   : > { %v2592_v15 = vshra.s32 %v8167_v36, 16  ;;  %3197 = vst.msk [vmem:[#allocation2 + $0x28] sm:$0xff] %vm182_vm15, %v3181_v18  ;;  %v2608_v5 = vshra.s32 %v8160_v32, 16 }
 0x300   : > { %v8190_v21 = vcvt.s32.f32 %v2592_v15  ;;  %v3183_v15 = vsel %vm3102_vm11, %v8158_v14, %v8195_v7  ;;  %v8255_v34 = vcvt.s32.f32 %v2608_v5  ;;  %v8281_v5 = vld [vmem:[#allocation2 + $0x40] sm:$0xff]  ;;  %v10306_v7 = vld [vmem:[#allocation100_spill] sm:$0xff] }
 0x301   : > { %v8164_v37 = vpop.xlane.xlu0 %2458  ;;  %3199 = vst.msk [vmem:[#allocation2 + $0x38] sm:$0xff] %vm182_vm15, %v3183_v15  ;;  %10295 = vst [vmem:[#allocation54_spill] sm:$0xff] %v8281_v5 }
 0x302   : > { %10282 = vst [vmem:[#allocation104_spill] sm:$0xff] %v8164_v37  ;;  %vm2501_vm8 = vcmp.eq.f32.partialorder %v10284_v38, %v8164_v37  ;;  %vm2502_vm9 = vcmp.eq.f32.partialorder %v10285_v56, %v8164_v37  ;;  %vm3099_vm2 = vcmp.gt.f32.partialorder %v8164_v37, %v8180_v61  ;;  %v2540_v38 = vsel %vm2508_vm3, %v9805_v2, 256 }
 0x303   : > { %v2533_v60 = vsel %vm2501_vm8, %v9950_v41, 256  ;;  %v2534_v29 = vsel %vm2502_vm9, %v9805_v2, 256  ;;  %v3180_v13 = vsel %vm3099_vm2, %v8164_v37, %v8180_v61  ;;  %vm2669_vm0 = vcmp.lt.s32.totalorder %v2539_v59, %v2540_v38 }
 0x304   : > { %vm2621_vm14 = vcmp.lt.s32.totalorder %v2533_v60, %v2534_v29  ;;  %3196 = vst.msk [vmem:[#allocation2 + $0x20] sm:$0xff] %vm182_vm15, %v3180_v13  ;;  %v8259_v24 = vsel %vm2669_vm0, %v2539_v59, %v2540_v38 }
 0x305   : > { %v8197_v47 = vsel %vm2621_vm14, %v2533_v60, %v2534_v29  ;;  %v8246_v60 = vcvt.s32.f32 %v2576_v40  ;;  %v8249_v29 = vsel %vm2637_vm1, %v2535_v42, %v2536_v1  ;;  %v10293_v42 = vld [vmem:[#allocation60_spill] sm:$0xff]  ;;  %v10294_v1 = vld [vmem:[#allocation33_spill] sm:$0xff]  ;;  %v2672_v38 = vshra.s32 %v8259_v24, 16 }
 0x306   : > { %v2624_v3 = vshra.s32 %v8197_v47, 16  ;;  %v2640_v30 = vshra.s32 %v8249_v29, 16 }
 0x307   : > { %v8295_v45 = vcvt.s32.f32 %v2672_v38 }
 0x308   : > { %v8238_v56 = vcvt.s32.f32 %v2624_v3  ;;  %v8257_v3 = vld [vmem:[#allocation2 + $0x30] sm:$0xff]  ;;  %v8268_v13 = vcvt.s32.f32 %v2640_v30 }
 0x309   : > { %10291 = vst [vmem:[#allocation105_spill] sm:$0xff] %v8257_v3 }
 0x311   : > { %v8261_v40 = vpop.xlane.xlu0 %2464 }
 0x312   : > { %10292 = vst [vmem:[#allocation91_spill] sm:$0xff] %v8261_v40  ;;  %vm2505_vm8 = vcmp.eq.f32.partialorder %v10293_v42, %v8261_v40  ;;  %vm2506_vm9 = vcmp.eq.f32.partialorder %v10294_v1, %v8261_v40  ;;  %vm3101_vm13 = vcmp.gt.f32.partialorder %v8261_v40, %v8257_v3  ;;  %v10297_v1 = vld [vmem:[#allocation59_spill] sm:$0xff] }
 0x313   : > { %v2537_v18 = vsel %vm2505_vm8, %v9950_v41, 256  ;;  %v2538_v59 = vsel %vm2506_vm9, %v9805_v2, 256  ;;  %v3182_v15 = vsel %vm3101_vm13, %v8261_v40, %v8257_v3 }
 0x314   : > { %vm2653_vm3 = vcmp.lt.s32.totalorder %v2537_v18, %v2538_v59  ;;  %3198 = vst.msk [vmem:[#allocation2 + $0x30] sm:$0xff] %vm182_vm15, %v3182_v15 }
 0x315   : > { %v8283_v30 = vpop.xlane.xlu0 %2470  ;;  %v8285_v42 = vsel %vm2653_vm3, %v2537_v18, %v2538_v59 }
 0x316   : > { %2563 = vmin.xlane.f32.xlu0 %v8154_v20  ;;  %10296 = vst [vmem:[#allocation85_spill] sm:$0xff] %v8283_v30  ;;  %vm2509_vm14 = vcmp.eq.f32.partialorder %v10297_v1, %v8283_v30  ;;  %vm2510_vm1 = vcmp.eq.f32.partialorder %v10298_v22, %v8283_v30  ;;  %v2656_v9 = vshra.s32 %v8285_v42, 16  ;;  %vm9523_vm0 = vcmp.gt.f32.partialorder %v8283_v30, %v8281_v5  ;;  %v8312_v1 = vld [vmem:[#allocation2 + $0x48] sm:$0xff] }
 0x317   : > { %v2541_v11 = vsel %vm2509_vm14, %v9950_v41, 256  ;;  %v2542_v15 = vsel %vm2510_vm1, %v9805_v2, 256  ;;  %v3184_v22 = vsel %vm9523_vm0, %v8283_v30, %v8281_v5  ;;  %10299 = vst [vmem:[#allocation16_spill] sm:$0xff] %v8312_v1  ;;  %v10305_v30 = vld [vmem:[#allocation73_spill] sm:$0xff] }
 0x318   : > { %v8299_v18 = vcvt.s32.f32 %v2656_v9  ;;  %vm2685_vm8 = vcmp.lt.s32.totalorder %v2541_v11, %v2542_v15  ;;  %3200 = vst.msk [vmem:[#allocation2 + $0x40] sm:$0xff] %vm182_vm15, %v3184_v22 }
 0x319   : > { %v8306_v59 = vsel %vm2685_vm8, %v2541_v11, %v2542_v15 }
 0x31a   : > { %2595 = vmin.xlane.f32.xlu0 %v8190_v21  ;;  %v2688_v38 = vshra.s32 %v8306_v59, 16 }
 0x31c   : > { %v8314_v9 = vpop.xlane.xlu1 %2473  ;;  %v8320_v11 = vcvt.s32.f32 %v2688_v38 }
 0x31d   : > { %10300 = vst [vmem:[#allocation115_spill] sm:$0xff] %v8314_v9  ;;  %vm2511_vm9 = vcmp.eq.f32.partialorder %v10301_v23, %v8314_v9  ;;  %vm2512_vm3 = vcmp.eq.f32.partialorder %v10302_v8, %v8314_v9  ;;  %vm9522_vm14 = vcmp.gt.f32.partialorder %v8314_v9, %v8312_v1 }
 0x31e   : > { %2627 = vmin.xlane.f32.xlu0 %v8238_v56  ;;  %v2543_v15 = vsel %vm2511_vm9, %v9950_v41, 256  ;;  %v2544_v22 = vsel %vm2512_vm3, %v9805_v2, 256  ;;  %v3185_v23 = vsel %vm9522_vm14, %v8314_v9, %v8312_v1  ;;  %v8363_v1 = vld [vmem:[#allocation2 + $0x60] sm:$0xff] }
 0x31f   : > { %vm2701_vm1 = vcmp.lt.s32.totalorder %v2543_v15, %v2544_v22  ;;  %3201 = vst.msk [vmem:[#allocation2 + $0x48] sm:$0xff] %vm182_vm15, %v3185_v23  ;;  %10307 = vst [vmem:[#allocation113_spill] sm:$0xff] %v8363_v1 }
 0x320   : > { %2579 = vmin.xlane.f32.xlu1 %v8246_v60  ;;  %v8332_v53 = vsel %vm2701_vm1, %v2543_v15, %v2544_v22 }
 0x321   : > { %v2704_v8 = vshra.s32 %v8332_v53, 16 }
 0x322   : > { %2659 = vmin.xlane.f32.xlu0 %v8299_v18 }
 0x323   : > { %v8336_v38 = vcvt.s32.f32 %v2704_v8 }
 0x324   : > { %2611 = vmin.xlane.f32.xlu1 %v8255_v34 }
 0x326   : > { %2691 = vmin.xlane.f32.xlu0 %v8320_v11 }
 0x328   : > { %2643 = vmin.xlane.f32.xlu1 %v8268_v13  ;;  %v8341_v5 = vpop.xlane.xlu0 %2476 }
 0x329   : > { %10304 = vst [vmem:[#allocation12_spill] sm:$0xff] %v8341_v5  ;;  %vm2513_vm8 = vcmp.eq.f32.partialorder %v10305_v30, %v8341_v5  ;;  %vm2514_vm9 = vcmp.eq.f32.partialorder %v10306_v7, %v8341_v5  ;;  %vm9521_vm3 = vcmp.gt.f32.partialorder %v8341_v5, %v8339_v12 }
 0x32a   : > { %v2545_v15 = vsel %vm2513_vm8, %v9950_v41, 256  ;;  %v2546_v22 = vsel %vm2514_vm9, %v9805_v2, 256  ;;  %v3186_v23 = vsel %vm9521_vm3, %v8341_v5, %v8339_v12 }
 0x32b   : > { %vm2717_vm1 = vcmp.lt.s32.totalorder %v2545_v15, %v2546_v22  ;;  %3202 = vst.msk [vmem:[#allocation2 + $0x50] sm:$0xff] %vm182_vm15, %v3186_v23 }
 0x32c   : > { %2675 = vmin.xlane.f32.xlu1 %v8295_v45  ;;  %v8357_v30 = vsel %vm2717_vm1, %v2545_v15, %v2546_v22 }
 0x32d   : > { %v2720_v7 = vshra.s32 %v8357_v30, 16 }
 0x32f   : > { %v8360_v8 = vcvt.s32.f32 %v2720_v7  ;;  %v8384_v7 = vld [vmem:[#allocation2 + $0x58] sm:$0xff] }
 0x330   : > { %2707 = vmin.xlane.f32.xlu1 %v8336_v38  ;;  %10309 = vst [vmem:[#allocation65_spill] sm:$0xff] %v8384_v7 }
 0x331   : > { %2723 = vmin.xlane.f32.xlu0 %v8360_v8 }
 0x338   : > { %v8365_v9 = vpop.xlane.xlu0 %2482 }
 0x339   : > { %10308 = vst [vmem:[#allocation114_spill] sm:$0xff] %v8365_v9  ;;  %vm2517_vm8 = vcmp.eq.f32.partialorder %v7677_v35, %v8365_v9  ;;  %vm2518_vm9 = vcmp.eq.f32.partialorder %v7688_v19, %v8365_v9  ;;  %vm9494_vm1 = vcmp.gt.f32.partialorder %v8365_v9, %v8363_v1 }
 0x33a   : > { %v2549_v15 = vsel %vm2517_vm8, %v9950_v41, 256  ;;  %v2550_v22 = vsel %vm2518_vm9, %v9805_v2, 256  ;;  %v3188_v23 = vsel %vm9494_vm1, %v8365_v9, %v8363_v1 }
 0x33b   : > { %vm2749_vm6 = vcmp.lt.s32.totalorder %v2549_v15, %v2550_v22  ;;  %3204 = vst.msk [vmem:[#allocation2 + $0x60] sm:$0xff] %vm182_vm15, %v3188_v23 }
 0x33c   : > { %v8381_v35 = vsel %vm2749_vm6, %v2549_v15, %v2550_v22 }
 0x33d   : > { %v2752_v19 = vshra.s32 %v8381_v35, 16 }
 0x33e   : > { %v8386_v12 = vpop.xlane.xlu1 %2479 }
 0x33f   : > { %10310 = vst [vmem:[#allocation67_spill] sm:$0xff] %v8386_v12  ;;  %vm2515_vm8 = vcmp.eq.f32.partialorder %v7737_v54, %v8386_v12  ;;  %vm2516_vm9 = vcmp.eq.f32.partialorder %v7747_v62, %v8386_v12  ;;  %v8392_v5 = vcvt.s32.f32 %v2752_v19  ;;  %vm9496_vm6 = vcmp.gt.f32.partialorder %v8386_v12, %v8384_v7  ;;  %v8411_v19 = vld [vmem:[#allocation2 + $0x68] sm:$0xff] }
 0x340   : > { %v2547_v1 = vsel %vm2515_vm8, %v9950_v41, 256  ;;  %v2548_v23 = vsel %vm2516_vm9, %v9805_v2, 256  ;;  %v3187_v54 = vsel %vm9496_vm6, %v8386_v12, %v8384_v7  ;;  %10311 = vst [vmem:[#allocation17_spill] sm:$0xff] %v8411_v19  ;;  %v8435_v7 = vld [vmem:[#allocation2 + $0x70] sm:$0xff] }
 0x341   : > { %2755 = vmin.xlane.f32.xlu0 %v8392_v5  ;;  %vm2733_vm1 = vcmp.lt.s32.totalorder %v2547_v1, %v2548_v23  ;;  %3203 = vst.msk [vmem:[#allocation2 + $0x58] sm:$0xff] %vm182_vm15, %v3187_v54  ;;  %10313 = vst [vmem:[#allocation92_spill] sm:$0xff] %v8435_v7 }
 0x342   : > { %v8404_v15 = vsel %vm2733_vm1, %v2547_v1, %v2548_v23 }
 0x343   : > { %v2736_v62 = vshra.s32 %v8404_v15, 16 }
 0x345   : > { %v8408_v22 = vcvt.s32.f32 %v2736_v62 }
 0x347   : > { %2739 = vmin.xlane.f32.xlu1 %v8408_v22 }
 0x349   : > { %v8413_v9 = vpop.xlane.xlu1 %2485 }
 0x34a   : > { %10312 = vst [vmem:[#allocation112_spill] sm:$0xff] %v8413_v9  ;;  %vm2519_vm8 = vcmp.eq.f32.partialorder %v7839_v44, %v8413_v9  ;;  %vm2520_vm9 = vcmp.eq.f32.partialorder %v7849_v33, %v8413_v9  ;;  %vm9499_vm1 = vcmp.gt.f32.partialorder %v8413_v9, %v8411_v19 }
 0x34b   : > { %v2551_v1 = vsel %vm2519_vm8, %v9950_v41, 256  ;;  %v2552_v23 = vsel %vm2520_vm9, %v9805_v2, 256  ;;  %v3189_v54 = vsel %vm9499_vm1, %v8413_v9, %v8411_v19  ;;  %v8457_v9 = vld [vmem:[#allocation2 + $0x78] sm:$0xff] }
 0x34c   : > { %vm2765_vm6 = vcmp.lt.s32.totalorder %v2551_v1, %v2552_v23  ;;  %3205 = vst.msk [vmem:[#allocation2 + $0x68] sm:$0xff] %vm182_vm15, %v3189_v54  ;;  %10315 = vst [vmem:[#allocation14_spill] sm:$0xff] %v8457_v9 }
 0x34d   : > { %v8429_v44 = vsel %vm2765_vm6, %v2551_v1, %v2552_v23 }
 0x34e   : > { %v2768_v33 = vshra.s32 %v8429_v44, 16 }
 0x350   : > { %v8432_v62 = vcvt.s32.f32 %v2768_v33 }
 0x352   : > { %2771 = vmin.xlane.f32.xlu1 %v8432_v62 }
 0x366   : > { %v8437_v12 = vpop.xlane.xlu0 %2488 }
 0x367   : > { %10314 = vst [vmem:[#allocation97_spill] sm:$0xff] %v8437_v12  ;;  %vm2521_vm8 = vcmp.eq.f32.partialorder %v8019_v28, %v8437_v12  ;;  %vm2522_vm9 = vcmp.eq.f32.partialorder %v8021_v6, %v8437_v12  ;;  %vm9516_vm6 = vcmp.gt.f32.partialorder %v8437_v12, %v8435_v7 }
 0x368   : > { %v2553_v1 = vsel %vm2521_vm8, %v9950_v41, 256  ;;  %v2554_v23 = vsel %vm2522_vm9, %v9805_v2, 256  ;;  %v3190_v54 = vsel %vm9516_vm6, %v8437_v12, %v8435_v7  ;;  %v8475_v12 = vld [vmem:[%s4566_s27 + $0x40] sm:$0xff]  ;;  %vm3371_vm9 = vcmask 31744  }
 0x369   : > { %vm2781_vm1 = vcmp.lt.s32.totalorder %v2553_v1, %v2554_v23  ;;  %3206 = vst.msk [vmem:[#allocation2 + $0x70] sm:$0xff] %vm182_vm15, %v3190_v54  ;;  %3227 = vrot.lane.b32.xlu1 %v8475_v12, %s4490_s5 }
 0x36a   : > { %v8453_v28 = vsel %vm2781_vm1, %v2553_v1, %v2554_v23  ;;  %v3212_v33 = vpop.permute.xlu0 %3211 }
 0x36b   : > { %v2784_v6 = vshra.s32 %v8453_v28, 16  ;;  %v3259_v19 = vsub.f32 %v8059_v10, %v3212_v33 }
 0x36c   : > { %v8459_v14 = vpop.xlane.xlu1 %2491 }
 0x36d   : > { %v8461_v3 = vcvt.s32.f32 %v2784_v6  ;;  %v3275_v40 = vand.u32 2147483647, %v3259_v19  ;;  %vm9512_vm8 = vcmp.gt.f32.partialorder %v8459_v14, %v8457_v9  ;;  %vm2524_vm14 = vcmp.eq.f32.partialorder %v8054_v63, %v8459_v14 }
 0x36e   : > { %v3218_v51 = vpop.permute.xlu0 %3217  ;;  %v3191_v10 = vsel %vm9512_vm8, %v8459_v14, %v8457_v9 }
 0x36f   : > { %2787 = vmin.xlane.f32.xlu0 %v8461_v3  ;;  %v3307_v1 = vmul.f32 0.5, %v3275_v40  ;;  %v3262_v23 = vsub.f32 %v8069_v50, %v3218_v51  ;;  %v4068_v19 = vadd.f32 -0.5, %v3275_v40  ;;  %3207 = vst.msk [vmem:[#allocation2 + $0x78] sm:$0xff] %vm182_vm15, %v3191_v10  ;;  %vm3291_vm1 = vcmp.lt.f32.partialorder %v3275_v40, 1.0 }
 0x370   : > { %v3214_v54 = vpop.permute.xlu1 %3213 }
 0x371   : > { %v3260_v33 = vsub.f32 %v8064_v16, %v3214_v54  ;;  %v3323_v6 = vmul.f32 %v3307_v1, %v3275_v40  ;;  %v3278_v7 = vand.u32 2147483647, %v3262_v23 }
 0x372   : > { %v3222_v50 = vpop.permute.xlu0 %3221 }
 0x373   : > { %v3276_v51 = vand.u32 2147483647, %v3260_v33  ;;  %v3310_v26 = vmul.f32 0.5, %v3278_v7  ;;  %v3264_v9 = vsub.f32 %v8079_v46, %v3222_v50  ;;  %v3355_v1 = vsel %vm3291_vm1, %v3323_v6, %v4068_v19 }
 0x374   : > { %v3216_v27 = vpop.permute.xlu1 %3215  ;;  %v4071_v48 = vadd.f32 -0.5, %v3278_v7  ;;  %v3372_v40 = vsel %vm3371_vm9, %v3355_v1, 0.0  ;;  %vm3294_vm6 = vcmp.lt.f32.partialorder %v3278_v7, 1.0 }
 0x375   : > { %v3308_v31 = vmul.f32 0.5, %v3276_v51  ;;  %v4069_v16 = vadd.f32 -0.5, %v3276_v51  ;;  %v3261_v23 = vsub.f32 %v8074_v52, %v3216_v27  ;;  %vm3292_vm8 = vcmp.lt.f32.partialorder %v3276_v51, 1.0 }
 0x376   : > { %v3280_v54 = vand.u32 2147483647, %v3264_v9  ;;  %v3326_v37 = vmul.f32 %v3310_v26, %v3278_v7 }
 0x377   : > { %v3324_v10 = vmul.f32 %v3308_v31, %v3276_v51  ;;  %v3277_v61 = vand.u32 2147483647, %v3261_v23 }
 0x378   : > { %v3220_v33 = vpop.permute.xlu1 %3219  ;;  %v3312_v0 = vmul.f32 0.5, %v3280_v54  ;;  %v3358_v9 = vsel %vm3294_vm6, %v3326_v37, %v4071_v48  ;;  %v4073_v26 = vadd.f32 -0.5, %v3280_v54  ;;  %vm3296_vm1 = vcmp.lt.f32.partialorder %v3280_v54, 1.0 }
 0x379   : > { %v3356_v17 = vsel %vm3292_vm8, %v3324_v10, %v4069_v16  ;;  %v3309_v4 = vmul.f32 0.5, %v3277_v61  ;;  %v4070_v49 = vadd.f32 -0.5, %v3277_v61  ;;  %vm3293_vm3 = vcmp.lt.f32.partialorder %v3277_v61, 1.0 }
 0x37a   : > { %v3373_v46 = vsel %vm3371_vm9, %v3356_v17, 0.0  ;;  %v3263_v6 = vsub.f32 %v8084_v58, %v3220_v33  ;;  %v3328_v19 = vmul.f32 %v3312_v0, %v3280_v54  ;;  %v3377_v1 = vsel %vm3371_vm9, %v3358_v9, 0.0 }
 0x37b   : > { %v3374_v52 = vadd.f32 %v3373_v46, %v3372_v40  ;;  %v3325_v27 = vmul.f32 %v3309_v4, %v3277_v61  ;;  %vm2523_vm6 = vcmp.eq.f32.partialorder %v8050_v55, %v8459_v14  ;;  %v8494_v46 = vld [vmem:[%s4566_s27 + $0x38] sm:$0xff] }
 0x37c   : > { %v3279_v31 = vand.u32 2147483647, %v3263_v6  ;;  %v3224_v50 = vpop.permute.xlu1 %3223  ;;  %v3360_v37 = vsel %vm3296_vm1, %v3328_v19, %v4073_v26  ;;  %v2555_v9 = vsel %vm2523_vm6, %v9950_v41, 256 }
 0x37d   : > { %v3357_v51 = vsel %vm3293_vm3, %v3325_v27, %v4070_v49  ;;  %v3265_v7 = vsub.f32 %v8089_v43, %v3224_v50  ;;  %v3381_v43 = vsel %vm3371_vm9, %v3360_v37, 0.0 }
 0x37e   : > { %v3375_v16 = vsel %vm3371_vm9, %v3357_v51, 0.0  ;;  %v3311_v23 = vmul.f32 0.5, %v3279_v31  ;;  %v4072_v17 = vadd.f32 -0.5, %v3279_v31  ;;  %vm3295_vm8 = vcmp.lt.f32.partialorder %v3279_v31, 1.0 }
 0x37f   : > { %v3376_v10 = vadd.f32 %v3375_v16, %v3374_v52  ;;  %v3281_v58 = vand.u32 2147483647, %v3265_v7  ;;  %v2559_v7 = vand.u32 65535, %v8127_v57  ;;  %v2575_v57 = vand.u32 65535, %v8169_v39 }
 0x380   : > { %v3327_v4 = vmul.f32 %v3311_v23, %v3279_v31  ;;  %v2556_v31 = vsel %vm2524_vm14, %v9805_v2, 256  ;;  %v2591_v23 = vand.u32 65535, %v8167_v36 }
 0x381   : > { %v3378_v48 = vadd.f32 %v3377_v1, %v3376_v10  ;;  %v3313_v0 = vmul.f32 0.5, %v3281_v58  ;;  %v4074_v61 = vadd.f32 -0.5, %v3281_v58  ;;  %vm3297_vm3 = vcmp.lt.f32.partialorder %v3281_v58, 1.0 }
 0x382   : > { %v3359_v40 = vsel %vm3295_vm8, %v3327_v4, %v4072_v17  ;;  %vm2797_vm1 = vcmp.lt.s32.totalorder %v2555_v9, %v2556_v31  ;;  %v2561_v1 = vcvt.s32.f32 %v2559_v7  ;;  %v2623_v4 = vand.u32 65535, %v8197_v47 }
 0x383   : > { %v3379_v49 = vsel %vm3371_vm9, %v3359_v40, 0.0  ;;  %v3329_v54 = vmul.f32 %v3313_v0, %v3281_v58  ;;  %v8503_v26 = vsel %vm2797_vm1, %v2555_v9, %v2556_v31  ;;  %v2593_v58 = vcvt.s32.f32 %v2591_v23 }
 0x384   : > { %v3380_v33 = vadd.f32 %v3379_v49, %v3378_v48  ;;  %v2800_v50 = vshra.s32 %v8503_v26, 16  ;;  %v2625_v0 = vcvt.s32.f32 %v2623_v4  ;;  %v2577_v36 = vcvt.s32.f32 %v2575_v57 }
 0x385   : > { %3225 = vrot.lane.b32.xlu0 %v8494_v46, %s4490_s5  ;;  %v3361_v6 = vsel %vm3297_vm3, %v3329_v54, %v4074_v61  ;;  %v2607_v61 = vand.u32 65535, %v8160_v32  ;;  %v2639_v49 = vand.u32 65535, %v8249_v29  ;;  %v2671_v54 = vand.u32 65535, %v8259_v24 }
 0x386   : > { %v3382_v52 = vadd.f32 %v3381_v43, %v3380_v33  ;;  %v3383_v27 = vsel %vm3371_vm9, %v3361_v6, 0.0  ;;  %v8506_v51 = vcvt.s32.f32 %v2800_v50  ;;  %v2703_v50 = vand.u32 65535, %v8332_v53 }
 0x387   : > { %v2609_v40 = vcvt.s32.f32 %v2607_v61  ;;  %v2641_v32 = vcvt.s32.f32 %v2639_v49  ;;  %v2673_v29 = vcvt.s32.f32 %v2671_v54  ;;  %v2719_v7 = vand.u32 65535, %v8357_v30 }
 0x388   : > { %v8501_v19 = vadd.f32 %v3383_v27, %v3382_v52  ;;  %v2687_v27 = vand.u32 65535, %v8306_v59  ;;  %v2751_v53 = vand.u32 65535, %v8381_v35  ;;  %v2735_v4 = vand.u32 65535, %v8404_v15 }
 0x389   : > { %v2721_v23 = vcvt.s32.f32 %v2719_v7  ;;  %v2767_v35 = vand.u32 65535, %v8429_v44 }
 0x38a   : > { %v2689_v9 = vcvt.s32.f32 %v2687_v27  ;;  %v2737_v57 = vcvt.s32.f32 %v2735_v4  ;;  %v10318_v4 = vld [vmem:[#allocation31_spill] sm:$0xff] }
 0x38d   : > { %2803 = vmin.xlane.f32.xlu1 %v8506_v51 }
 0x3a3   : > { %v8510_v16 = vpop.xlane.xlu0 %2563 }
 0x3a4   : > { %vm2565_vm8 = vcmp.eq.f32.partialorder %v8154_v20, %v8510_v16 }
 0x3a5   : > { %v2566_v17 = vsel %vm2565_vm8, %v2561_v1, inf }
 0x3a6   : > { %2567 = vmin.xlane.f32.xlu0 %v2566_v17 }
 0x3a7   : > { %v8515_v10 = vpop.xlane.xlu0 %2595 }
 0x3a8   : > { %vm2597_vm14 = vcmp.eq.f32.partialorder %v8190_v21, %v8515_v10 }
 0x3a9   : > { %v2598_v37 = vsel %vm2597_vm14, %v2593_v58, inf  ;;  %v2753_v58 = vcvt.s32.f32 %v2751_v53  ;;  %v2570_v53 = vcvt.f32.s32 %v8510_v16  ;;  %v10320_v16 = vld [vmem:[#allocation80_spill] sm:$0xff] }
 0x3aa   : > { %2599 = vmin.xlane.f32.xlu0 %v2598_v37 }
 0x3ab   : > { %v8521_v48 = vpop.xlane.xlu0 %2627 }
 0x3ac   : > { %vm2629_vm3 = vcmp.eq.f32.partialorder %v8238_v56, %v8521_v48 }
 0x3ad   : > { %v8523_v20 = vpop.xlane.xlu1 %2579  ;;  %v2630_v47 = vsel %vm2629_vm3, %v2625_v0, inf  ;;  %v2769_v0 = vcvt.s32.f32 %v2767_v35  ;;  %v2571_v35 = vshll.u32 %v2570_v53, 16  ;;  %v10324_v53 = vld [vmem:[#allocation49_spill] sm:$0xff] }
 0x3ae   : > { %vm2581_vm6 = vcmp.eq.f32.partialorder %v8246_v60, %v8523_v20  ;;  %2631 = vmin.xlane.f32.xlu0 %v2630_v47  ;;  %v2655_v60 = vand.u32 65535, %v8285_v42 }
 0x3af   : > { %v2582_v21 = vsel %vm2581_vm6, %v2577_v36, inf  ;;  %v8543_v52 = vpop.xlane.xlu0 %2659  ;;  %v2783_v36 = vand.u32 65535, %v8453_v28 }
 0x3b0   : > { %2583 = vmin.xlane.f32.xlu1 %v2582_v21  ;;  %vm2661_vm3 = vcmp.eq.f32.partialorder %v8299_v18, %v8543_v52 }
 0x3b1   : > { %v8530_v39 = vpop.xlane.xlu1 %2611 }
 0x3b2   : > { %vm2613_vm1 = vcmp.eq.f32.partialorder %v8255_v34, %v8530_v39  ;;  %v2657_v34 = vcvt.s32.f32 %v2655_v60 }
 0x3b3   : > { %v2614_v43 = vsel %vm2613_vm1, %v2609_v40, inf }
 0x3b4   : > { %2615 = vmin.xlane.f32.xlu1 %v2614_v43  ;;  %v2662_v42 = vsel %vm2661_vm3, %v2657_v34, inf  ;;  %v8587_v43 = vld [vmem:[%s4566_s27 + $0x50] sm:$0xff] }
 0x3b5   : > { %v8535_v56 = vpop.xlane.xlu1 %2643  ;;  %2663 = vmin.xlane.f32.xlu0 %v2662_v42  ;;  %v8597_v42 = vld [vmem:[%s4566_s27 + $0x48] sm:$0xff] }
 0x3b6   : > { %vm2645_vm8 = vcmp.eq.f32.partialorder %v8268_v13, %v8535_v56  ;;  %v8550_v13 = vpop.xlane.xlu0 %2691 }
 0x3b7   : > { %v2646_v33 = vsel %vm2645_vm8, %v2641_v32, inf  ;;  %vm2693_vm6 = vcmp.eq.f32.partialorder %v8320_v11, %v8550_v13 }
 0x3b8   : > { %2647 = vmin.xlane.f32.xlu1 %v2646_v33  ;;  %v2694_v31 = vsel %vm2693_vm6, %v2689_v9, inf  ;;  %v10316_v9 = vld [vmem:[#allocation71_spill] sm:$0xff] }
 0x3b9   : > { %v8541_v6 = vpop.xlane.xlu1 %2675  ;;  %2695 = vmin.xlane.f32.xlu0 %v2694_v31  ;;  %v4067_v31 = vrot.slane %v10316_v9, 9 }
 0x3ba   : > { %vm2677_vm14 = vcmp.eq.f32.partialorder %v8295_v45, %v8541_v6  ;;  %v2705_v45 = vcvt.s32.f32 %v2703_v50 }
 0x3bb   : > { %v2678_v24 = vsel %vm2677_vm14, %v2673_v29, inf  ;;  %v2913_v50 = vmul.f32 %v4067_v31, %v10316_v9 }
 0x3bc   : > { %2679 = vmin.xlane.f32.xlu1 %v2678_v24 }
 0x3bd   : > { %v8555_v59 = vpop.xlane.xlu1 %2707 }
 0x3be   : > { %vm2709_vm1 = vcmp.eq.f32.partialorder %v8336_v38, %v8555_v59  ;;  %v8560_v1 = vpop.xlane.xlu0 %2723 }
 0x3bf   : > { %v2710_v18 = vsel %vm2709_vm1, %v2705_v45, inf  ;;  %vm2725_vm8 = vcmp.eq.f32.partialorder %v8360_v8, %v8560_v1  ;;  %v2799_v45 = vand.u32 65535, %v8503_v26 }
 0x3c0   : > { %2711 = vmin.xlane.f32.xlu1 %v2710_v18  ;;  %v2726_v11 = vsel %vm2725_vm8, %v2721_v23, inf  ;;  %v2914_v18 = vmax.f32 %v2913_v50, 1e-12 }
 0x3c1   : > { %2727 = vmin.xlane.f32.xlu0 %v2726_v11  ;;  %v2801_v23 = vcvt.s32.f32 %v2799_v45 }
 0x3c2   : > { %4342 = vrcp.f32 %v2914_v18 }
 0x3cc   : > { %v4343_v11 = vpop.eup %4342 }
 0x3ce   : > { %v8565_v17 = vpop.xlane.xlu0 %2755 }
 0x3cf   : > { %vm2757_vm14 = vcmp.eq.f32.partialorder %v8392_v5, %v8565_v17 }
 0x3d0   : > { %v2758_v38 = vsel %vm2757_vm14, %v2753_v58, inf  ;;  %v10317_v58 = vld [vmem:[#allocation30_spill] sm:$0xff] }
 0x3d1   : > { %2759 = vmin.xlane.f32.xlu0 %v2758_v38  ;;  %v2952_v38 = vrot.slane %v4343_v11, %v10317_v58 }
 0x3d4   : > { %v8570_v30 = vpop.xlane.xlu1 %2739 }
 0x3d5   : > { %vm2741_vm3 = vcmp.eq.f32.partialorder %v8408_v22, %v8570_v30  ;;  %v2785_v22 = vcvt.s32.f32 %v2783_v36  ;;  %v10319_v36 = vld [vmem:[#allocation66_spill] sm:$0xff] }
 0x3d6   : > { %v2742_v8 = vsel %vm2741_vm3, %v2737_v57, inf  ;;  %v2956_v57 = vrot.slane %v4343_v11, %v10318_v4  ;;  %v10326_v4 = vld [vmem:[#allocation53_spill] sm:$0xff] }
 0x3d7   : > { %2743 = vmin.xlane.f32.xlu1 %v2742_v8 }
 0x3df   : > { %v8575_v37 = vpop.xlane.xlu1 %2771 }
 0x3e0   : > { %vm2773_vm6 = vcmp.eq.f32.partialorder %v8432_v62, %v8575_v37 }
 0x3e1   : > { %v2774_v5 = vsel %vm2773_vm6, %v2769_v0, inf  ;;  %v2602_v0 = vcvt.f32.s32 %v8515_v10 }
 0x3e2   : > { %2775 = vmin.xlane.f32.xlu1 %v2774_v5  ;;  %v8613_v5 = vrot.slane %v2952_v38, %v10317_v58 }
 0x3e3   : > { %v3228_v15 = vpop.permute.xlu1 %3227 }
 0x3e4   : > { %v3267_v61 = vsub.f32 %v8475_v12, %v3228_v15  ;;  %v8616_v15 = vrot.slane %v2956_v57, %v10317_v58 }
 0x3e6   : > { %v3283_v21 = vand.u32 2147483647, %v3267_v61  ;;  %v2967_v61 = vmul.f32 %v8613_v5, %v10319_v36  ;;  %v2970_v58 = vmul.f32 %v8616_v15, %v10324_v53  ;;  %v2976_v57 = vmul.f32 %v8616_v15, %v10326_v4  ;;  %v10333_v4 = vld [vmem:[#allocation106_spill] sm:$0xff] }
 0x3e8   : > { %v3315_v49 = vmul.f32 0.5, %v3283_v21  ;;  %v4076_v60 = vadd.f32 -0.5, %v3283_v21  ;;  %vm3299_vm14 = vcmp.lt.f32.partialorder %v3283_v21, 1.0 }
 0x3ea   : > { %v3331_v28 = vmul.f32 %v3315_v49, %v3283_v21  ;;  %v2634_v21 = vcvt.f32.s32 %v8521_v48  ;;  %v10322_v48 = vld [vmem:[#allocation36_spill] sm:$0xff] }
 0x3f3   : > { %3231 = vrot.lane.b32.xlu1 %v8587_v43, %s4490_s5 }
 0x3fc   : > { %v8581_v47 = vpop.xlane.xlu0 %2787 }
 0x3fd   : > { %vm2789_vm1 = vcmp.eq.f32.partialorder %v8461_v3, %v8581_v47  ;;  %v3363_v3 = vsel %vm3299_vm14, %v3331_v28, %v4076_v60 }
 0x3fe   : > { %v2790_v44 = vsel %vm2789_vm1, %v2785_v22, inf  ;;  %v3387_v27 = vsel %vm3371_vm9, %v3363_v3, 0.0  ;;  %v2968_v22 = vmul.f32 %v8616_v15, %v10320_v16 }
 0x3ff   : > { %2791 = vmin.xlane.f32.xlu0 %v2790_v44  ;;  %v2603_v44 = vshll.u32 %v2602_v0, 16 }
 0x400   : > { %v3226_v40 = vpop.permute.xlu0 %3225 }
 0x401   : > { %v3266_v62 = vsub.f32 %v8494_v46, %v3226_v40 }
 0x403   : > { %v3282_v12 = vand.u32 2147483647, %v3266_v62 }
 0x405   : > { %v3314_v32 = vmul.f32 0.5, %v3282_v12  ;;  %v4075_v54 = vadd.f32 -0.5, %v3282_v12  ;;  %vm3298_vm8 = vcmp.lt.f32.partialorder %v3282_v12, 1.0 }
 0x407   : > { %v3330_v33 = vmul.f32 %v3314_v32, %v3282_v12  ;;  %v2586_v12 = vcvt.f32.s32 %v8523_v20 }
 0x409   : > { %v3362_v29 = vsel %vm3298_vm8, %v3330_v33, %v4075_v54  ;;  %v2635_v54 = vshll.u32 %v2634_v21, 16  ;;  %v10321_v33 = vld [vmem:[#allocation35_spill] sm:$0xff]  ;;  %v2587_v20 = vshll.u32 %v2586_v12, 16 }
 0x40a   : > { %v3385_v34 = vsel %vm3371_vm9, %v3362_v29, 0.0  ;;  %v2971_v3 = vmul.f32 %v8613_v5, %v10321_v33  ;;  %v2972_v29 = vmul.f32 %v8616_v15, %v10322_v48 }
 0x40b   : > { %v3386_v46 = vadd.f32 %v3385_v34, %v8501_v19  ;;  %v2618_v34 = vcvt.f32.s32 %v8530_v39  ;;  %v10325_v39 = vld [vmem:[#allocation52_spill] sm:$0xff] }
 0x40c   : > { %v2975_v38 = vmul.f32 %v8613_v5, %v10325_v39 }
 0x40d   : > { %v8594_v24 = vadd.f32 %v3387_v27, %v3386_v46 }
 0x415   : > { %3229 = vrot.lane.b32.xlu0 %v8597_v42, %s4490_s5 }
 0x41a   : > { %v8604_v7 = vpop.xlane.xlu1 %2803 }
 0x41b   : > { %vm2805_vm3 = vcmp.eq.f32.partialorder %v8506_v51, %v8604_v7 }
 0x41c   : > { %v2806_v19 = vsel %vm2805_vm3, %v2801_v23, inf  ;;  %v10323_v23 = vld [vmem:[#allocation48_spill] sm:$0xff] }
 0x41d   : > { %2807 = vmin.xlane.f32.xlu1 %v2806_v19  ;;  %v2969_v19 = vmul.f32 %v8613_v5, %v10323_v23 }
 0x433   : > { %v2568_v8 = vpop.xlane.xlu0 %2567 }
 0x434   : > { %v2569_v26 = vcvt.f32.s32 %v2568_v8  ;;  %v2619_v8 = vshll.u32 %v2618_v34, 16  ;;  %v10329_v34 = vld [vmem:[#allocation94_spill] sm:$0xff] }
 0x436   : > { %v2572_v51 = vadd.s32 %v2571_v35, %v2569_v26  ;;  %v2650_v35 = vcvt.f32.s32 %v8535_v56  ;;  %v2682_v56 = vcvt.f32.s32 %v8541_v6 }
 0x437   : > { %v2600_v10 = vpop.xlane.xlu0 %2599 }
 0x438   : > { %vm2813_vm6 = vcmp.eq.s32.totalorder %v9950_v41, %v2572_v51  ;;  %vm2814_vm1 = vcmp.eq.s32.totalorder %v9805_v2, %v2572_v51  ;;  %v2601_v40 = vcvt.f32.s32 %v2600_v10  ;;  %v2683_v48 = vshll.u32 %v2682_v56, 16 }
 0x439   : > { %v2999_v49 = vsel %vm2813_vm6, %v2967_v61, 0.0  ;;  %v3000_v62 = vsel %vm2814_vm1, %v2968_v22, 0.0 }
 0x43a   : > { %v3031_v28 = vadd.f32 %v3000_v62, %v2999_v49  ;;  %v2604_v32 = vadd.s32 %v2603_v44, %v2601_v40  ;;  %v10327_v40 = vld [vmem:[#allocation83_spill] sm:$0xff] }
 0x43b   : > { %v2632_v60 = vpop.xlane.xlu0 %2631  ;;  %v2973_v49 = vmul.f32 %v8613_v5, %v10327_v40  ;;  %v10328_v62 = vld [vmem:[#allocation87_spill] sm:$0xff]  ;;  %v10335_v40 = vld [vmem:[#allocation9_spill] sm:$0xff] }
 0x43c   : > { %3032 = vadd.xlane.f32.xlu0 %v3031_v28  ;;  %vm2817_vm8 = vcmp.eq.s32.totalorder %v9950_v41, %v2604_v32  ;;  %vm2818_vm14 = vcmp.eq.s32.totalorder %v9805_v2, %v2604_v32  ;;  %v2633_v27 = vcvt.f32.s32 %v2632_v60  ;;  %v2974_v12 = vmul.f32 %v8616_v15, %v10328_v62  ;;  %v10336_v62 = vld [vmem:[#allocation63_spill] sm:$0xff] }
 0x43d   : > { %v2584_v46 = vpop.xlane.xlu1 %2583  ;;  %v3003_v31 = vsel %vm2817_vm8, %v2971_v3, 0.0  ;;  %v3004_v50 = vsel %vm2818_vm14, %v2972_v29, 0.0  ;;  %v2651_v28 = vshll.u32 %v2650_v35, 16 }
 0x43e   : > { %v2585_v9 = vcvt.f32.s32 %v2584_v46  ;;  %v2636_v45 = vadd.s32 %v2635_v54, %v2633_v27  ;;  %v3037_v18 = vadd.f32 %v3004_v50, %v3003_v31  ;;  %v2666_v54 = vcvt.f32.s32 %v8543_v52  ;;  %v10330_v27 = vld [vmem:[#allocation95_spill] sm:$0xff] }
 0x43f   : > { %v2977_v46 = vmul.f32 %v8613_v5, %v10329_v34 }
 0x440   : > { %v2588_v11 = vadd.s32 %v2587_v20, %v2585_v9  ;;  %vm2821_vm3 = vcmp.eq.s32.totalorder %v9950_v41, %v2636_v45  ;;  %vm2822_vm6 = vcmp.eq.s32.totalorder %v9805_v2, %v2636_v45  ;;  %3038 = vadd.xlane.f32.xlu0 %v3037_v18  ;;  %v2978_v20 = vmul.f32 %v8616_v15, %v10330_v27 }
 0x441   : > { %v2616_v26 = vpop.xlane.xlu1 %2615  ;;  %v3007_v51 = vsel %vm2821_vm3, %v2975_v38, 0.0  ;;  %v3008_v16 = vsel %vm2822_vm6, %v2976_v57, 0.0  ;;  %v2698_v9 = vcvt.f32.s32 %v8550_v13  ;;  %v2667_v50 = vshll.u32 %v2666_v54, 16  ;;  %v10332_v38 = vld [vmem:[#allocation62_spill] sm:$0xff] }
 0x442   : > { %vm2815_vm1 = vcmp.eq.s32.totalorder %v9950_v41, %v2588_v11  ;;  %vm2816_vm8 = vcmp.eq.s32.totalorder %v9805_v2, %v2588_v11  ;;  %v2617_v0 = vcvt.f32.s32 %v2616_v26  ;;  %v3043_v10 = vadd.f32 %v3008_v16, %v3007_v51  ;;  %v2664_v31 = vpop.xlane.xlu0 %2663  ;;  %v10334_v26 = vld [vmem:[#allocation107_spill] sm:$0xff] }
 0x443   : > { %v3001_v36 = vsel %vm2815_vm1, %v2969_v19, 0.0  ;;  %v3002_v61 = vsel %vm2816_vm8, %v2970_v58, 0.0  ;;  %v2665_v45 = vcvt.f32.s32 %v2664_v31  ;;  %v10331_v58 = vld [vmem:[#allocation61_spill] sm:$0xff]  ;;  %v2980_v13 = vmul.f32 %v8616_v15, %v10332_v38 }
 0x444   : > { %v2620_v22 = vadd.s32 %v2619_v8, %v2617_v0  ;;  %v3034_v21 = vadd.f32 %v3002_v61, %v3001_v36  ;;  %3044 = vadd.xlane.f32.xlu0 %v3043_v10  ;;  %v2979_v39 = vmul.f32 %v8613_v5, %v10331_v58  ;;  %v2981_v57 = vmul.f32 %v8613_v5, %v10333_v4 }
 0x445   : > { %v2648_v44 = vpop.xlane.xlu1 %2647  ;;  %v2668_v53 = vadd.s32 %v2667_v50, %v2665_v45  ;;  %v2699_v8 = vshll.u32 %v2698_v9, 16  ;;  %v2982_v0 = vmul.f32 %v8616_v15, %v10334_v26  ;;  %v2730_v9 = vcvt.f32.s32 %v8560_v1 }
 0x446   : > { %vm2819_vm14 = vcmp.eq.s32.totalorder %v9950_v41, %v2620_v22  ;;  %vm2820_vm3 = vcmp.eq.s32.totalorder %v9805_v2, %v2620_v22  ;;  %v2649_v32 = vcvt.f32.s32 %v2648_v44  ;;  %3035 = vadd.xlane.f32.xlu1 %v3034_v21  ;;  %v2696_v35 = vpop.xlane.xlu0 %2695  ;;  %v2714_v21 = vcvt.f32.s32 %v8555_v59 }
 0x447   : > { %v3005_v60 = vsel %vm2819_vm14, %v2973_v49, 0.0  ;;  %v3006_v33 = vsel %vm2820_vm3, %v2974_v12, 0.0  ;;  %vm2825_vm3 = vcmp.eq.s32.totalorder %v9950_v41, %v2668_v53  ;;  %v2697_v51 = vcvt.f32.s32 %v2696_v35  ;;  %v10341_v35 = vld [vmem:[#allocation19_spill] sm:$0xff] }
 0x448   : > { %v2652_v6 = vadd.s32 %v2651_v28, %v2649_v32  ;;  %v3040_v3 = vadd.f32 %v3006_v33, %v3005_v60  ;;  %v3011_v61 = vsel %vm2825_vm3, %v2979_v39, 0.0  ;;  %v2983_v49 = vmul.f32 %v8613_v5, %v10335_v40 }
 0x449   : > { %v2680_v29 = vpop.xlane.xlu1 %2679  ;;  %v2700_v10 = vadd.s32 %v2699_v8, %v2697_v51  ;;  %v2984_v12 = vmul.f32 %v8616_v15, %v10336_v62  ;;  %v2715_v60 = vshll.u32 %v2714_v21, 16  ;;  %v2762_v1 = vcvt.f32.s32 %v8565_v17 }
 0x44a   : > { %vm2823_vm6 = vcmp.eq.s32.totalorder %v9950_v41, %v2652_v6  ;;  %vm2824_vm1 = vcmp.eq.s32.totalorder %v9805_v2, %v2652_v6  ;;  %v2681_v52 = vcvt.f32.s32 %v2680_v29  ;;  %3041 = vadd.xlane.f32.xlu1 %v3040_v3  ;;  %v10337_v3 = vld [vmem:[#allocation110_spill] sm:$0xff]  ;;  %v10338_v29 = vld [vmem:[#allocation111_spill] sm:$0xff]  ;;  %v2991_v26 = vmul.f32 %v8613_v5, %v10341_v35 }
 0x44b   : > { %v3009_v18 = vsel %vm2823_vm6, %v2977_v46, 0.0  ;;  %v3010_v23 = vsel %vm2824_vm1, %v2978_v20, 0.0  ;;  %vm2826_vm6 = vcmp.eq.s32.totalorder %v9805_v2, %v2668_v53  ;;  %vm2829_vm1 = vcmp.eq.s32.totalorder %v9950_v41, %v2700_v10 }
 0x44c   : > { %v2684_v19 = vadd.s32 %v2683_v48, %v2681_v52  ;;  %v3046_v11 = vadd.f32 %v3010_v23, %v3009_v18  ;;  %v3012_v16 = vsel %vm2826_vm6, %v2980_v13, 0.0  ;;  %vm2830_vm0 = vcmp.eq.s32.totalorder %v9805_v2, %v2700_v10  ;;  %v10339_v18 = vld [vmem:[#allocation24_spill] sm:$0xff] }
 0x44d   : > { %v3049_v56 = vadd.f32 %v3012_v16, %v3011_v61  ;;  %v2712_v28 = vpop.xlane.xlu1 %2711  ;;  %v3015_v32 = vsel %vm2829_vm1, %v2983_v49, 0.0  ;;  %v3016_v54 = vsel %vm2830_vm0, %v2984_v12, 0.0  ;;  %v2985_v48 = vmul.f32 %v8613_v5, %v10337_v3  ;;  %v10346_v3 = vld [vmem:[#allocation121_spill] sm:$0xff] }
 0x44e   : > { %vm2827_vm8 = vcmp.eq.s32.totalorder %v9950_v41, %v2684_v19  ;;  %vm2828_vm14 = vcmp.eq.s32.totalorder %v9805_v2, %v2684_v19  ;;  %3047 = vadd.xlane.f32.xlu1 %v3046_v11  ;;  %v2713_v59 = vcvt.f32.s32 %v2712_v28  ;;  %v3055_v33 = vadd.f32 %v3016_v54, %v3015_v32  ;;  %v2728_v31 = vpop.xlane.xlu0 %2727  ;;  %v10340_v19 = vld [vmem:[#allocation64_spill] sm:$0xff] }
 0x44f   : > { %v3013_v36 = vsel %vm2827_vm8, %v2981_v57, 0.0  ;;  %v3014_v22 = vsel %vm2828_vm14, %v2982_v0, 0.0  ;;  %3050 = vadd.xlane.f32.xlu0 %v3049_v56  ;;  %v2986_v34 = vmul.f32 %v8616_v15, %v10338_v29  ;;  %v2731_v52 = vshll.u32 %v2730_v9, 16  ;;  %v10342_v0 = vld [vmem:[#allocation41_spill] sm:$0xff] }
 0x450   : > { %v3052_v44 = vadd.f32 %v3014_v22, %v3013_v36  ;;  %v2716_v6 = vadd.s32 %v2715_v60, %v2713_v59  ;;  %v2729_v50 = vcvt.f32.s32 %v2728_v31  ;;  %v2987_v23 = vmul.f32 %v8613_v5, %v10339_v18 }
 0x451   : > { %v2988_v11 = vmul.f32 %v8616_v15, %v10340_v19  ;;  %v2763_v13 = vshll.u32 %v2762_v1, 16  ;;  %v2746_v57 = vcvt.f32.s32 %v8570_v30  ;;  %v2992_v51 = vmul.f32 %v8616_v15, %v10342_v0  ;;  %v10343_v30 = vld [vmem:[#allocation50_spill] sm:$0xff] }
 0x452   : > { %3053 = vadd.xlane.f32.xlu1 %v3052_v44  ;;  %vm2831_vm8 = vcmp.eq.s32.totalorder %v9950_v41, %v2716_v6  ;;  %vm2832_vm14 = vcmp.eq.s32.totalorder %v9805_v2, %v2716_v6  ;;  %v2732_v45 = vadd.s32 %v2731_v52, %v2729_v50  ;;  %v2989_v56 = vmul.f32 %v8613_v5, %v10343_v30  ;;  %v10344_v44 = vld [vmem:[#allocation74_spill] sm:$0xff] }
 0x453   : > { %3056 = vadd.xlane.f32.xlu0 %v3055_v33  ;;  %v3017_v46 = vsel %vm2831_vm8, %v2985_v48, 0.0  ;;  %v3018_v27 = vsel %vm2832_vm14, %v2986_v34, 0.0  ;;  %v2747_v16 = vshll.u32 %v2746_v57, 16  ;;  %v2990_v40 = vmul.f32 %v8616_v15, %v10344_v44  ;;  %v10345_v33 = vld [vmem:[#allocation120_spill] sm:$0xff]  ;;  %v8745_v30 = vld [vmem:[%s4566_s27 + $0x78] sm:$0xff] }
 0x454   : > { %v3058_v20 = vadd.f32 %v3018_v27, %v3017_v46  ;;  %vm2833_vm0 = vcmp.eq.s32.totalorder %v9950_v41, %v2732_v45  ;;  %vm2834_vm3 = vcmp.eq.s32.totalorder %v9805_v2, %v2732_v45  ;;  %v2778_v28 = vcvt.f32.s32 %v8575_v37 }
 0x455   : > { %v3019_v53 = vsel %vm2833_vm0, %v2987_v23, 0.0  ;;  %v3020_v58 = vsel %vm2834_vm3, %v2988_v11, 0.0  ;;  %v2993_v6 = vmul.f32 %v8613_v5, %v10345_v33  ;;  %v2994_v48 = vmul.f32 %v8616_v15, %v10346_v3  ;;  %v10347_v23 = vld [vmem:[#allocation81_spill] sm:$0xff]  ;;  %v10348_v11 = vld [vmem:[#allocation20_spill] sm:$0xff]  ;;  %v3122_v3 = vld [vmem:[#allocation3 + $0x58] sm:$0xff] }
 0x456   : > { %3059 = vadd.xlane.f32.xlu1 %v3058_v20  ;;  %v3061_v39 = vadd.f32 %v3020_v58, %v3019_v53  ;;  %v2779_v54 = vshll.u32 %v2778_v28, 16  ;;  %v2794_v37 = vcvt.f32.s32 %v8581_v47  ;;  %v2995_v19 = vmul.f32 %v8613_v5, %v10347_v23  ;;  %v10381_v23 = vld [vmem:[#allocation21_spill] sm:$0xff] }
 0x457   : > { %v2996_v53 = vmul.f32 %v8616_v15, %v10348_v11 }
 0x458   : > { %3062 = vadd.xlane.f32.xlu0 %v3061_v39  ;;  %v2795_v31 = vshll.u32 %v2794_v37, 16  ;;  %v3429_v37 = vld [vmem:[#allocation2 + $0x8] sm:$0xff] }
 0x45e   : > { %v2760_v38 = vpop.xlane.xlu0 %2759 }
 0x45f   : > { %v2761_v4 = vcvt.f32.s32 %v2760_v38 }
 0x461   : > { %v2764_v8 = vadd.s32 %v2763_v13, %v2761_v4 }
 0x463   : > { %vm2837_vm6 = vcmp.eq.s32.totalorder %v9950_v41, %v2764_v8  ;;  %vm2838_vm1 = vcmp.eq.s32.totalorder %v9805_v2, %v2764_v8 }
 0x464   : > { %v2744_v36 = vpop.xlane.xlu1 %2743  ;;  %v3023_v61 = vsel %vm2837_vm6, %v2991_v26, 0.0  ;;  %v3024_v17 = vsel %vm2838_vm1, %v2992_v51, 0.0  ;;  %v8724_v26 = vld [vmem:[%s4566_s27 + $0x60] sm:$0xff] }
 0x465   : > { %v2745_v22 = vcvt.f32.s32 %v2744_v36  ;;  %v3067_v21 = vadd.f32 %v3024_v17, %v3023_v61 }
 0x467   : > { %v2748_v10 = vadd.s32 %v2747_v16, %v2745_v22  ;;  %3068 = vadd.xlane.f32.xlu0 %v3067_v21  ;;  %v8734_v16 = vld [vmem:[%s4566_s27 + $0x58] sm:$0xff]  ;;  %v8739_v22 = vld [vmem:[%s4566_s27 + $0x68] sm:$0xff]  ;;  %v2810_v21 = vcvt.f32.s32 %v8604_v7 }
 0x469   : > { %vm2835_vm8 = vcmp.eq.s32.totalorder %v9950_v41, %v2748_v10  ;;  %vm2836_vm14 = vcmp.eq.s32.totalorder %v9805_v2, %v2748_v10 }
 0x46a   : > { %v3021_v49 = vsel %vm2835_vm8, %v2989_v56, 0.0  ;;  %v3022_v62 = vsel %vm2836_vm14, %v2990_v40, 0.0  ;;  %v10349_v40 = vld [vmem:[#allocation25_spill] sm:$0xff] }
 0x46b   : > { %v3064_v12 = vadd.f32 %v3022_v62, %v3021_v49  ;;  %v2997_v49 = vmul.f32 %v8613_v5, %v10349_v40  ;;  %v10350_v62 = vld [vmem:[#allocation51_spill] sm:$0xff]  ;;  %v3113_v5 = vld [vmem:[#allocation3 + $0x10] sm:$0xff] }
 0x46c   : > { %v10369_v40 = vld [vmem:[#allocation115_spill] sm:$0xff] }
 0x46d   : > { %3065 = vadd.xlane.f32.xlu1 %v3064_v12  ;;  %v2998_v12 = vmul.f32 %v8616_v15, %v10350_v62 }
 0x46f   : > { %v2776_v32 = vpop.xlane.xlu1 %2775 }
 0x470   : > { %v2777_v60 = vcvt.f32.s32 %v2776_v32 }
 0x472   : > { %v2780_v59 = vadd.s32 %v2779_v54, %v2777_v60  ;;  %v3111_v54 = vld [vmem:[#allocation3] sm:$0xff] }
 0x473   : > { %v3232_v27 = vpop.permute.xlu1 %3231 }
 0x474   : > { %vm2839_vm0 = vcmp.eq.s32.totalorder %v9950_v41, %v2780_v59  ;;  %vm2840_vm3 = vcmp.eq.s32.totalorder %v9805_v2, %v2780_v59  ;;  %v3269_v20 = vsub.f32 %v8587_v43, %v3232_v27 }
 0x475   : > { %v3025_v29 = vsel %vm2839_vm0, %v2993_v6, 0.0  ;;  %v3026_v34 = vsel %vm2840_vm3, %v2994_v48, 0.0  ;;  %v8760_v6 = vld [vmem:[%s4566_s27 + $0x70] sm:$0xff]  ;;  %s9194_s27 = scalar_lea.hbm %s9243_s2, %s4033_s4 }
 0x476   : > { %v3070_v46 = vadd.f32 %v3026_v34, %v3025_v29  ;;  %v3285_v52 = vand.u32 2147483647, %v3269_v20  ;;  %v3112_v34 = vld [vmem:[#allocation3 + $0x8] sm:$0xff] }
 0x478   : > { %3071 = vadd.xlane.f32.xlu1 %v3070_v46  ;;  %v3317_v58 = vmul.f32 0.5, %v3285_v52  ;;  %v4078_v8 = vadd.f32 -0.5, %v3285_v52  ;;  %vm3301_vm14 = vcmp.lt.f32.partialorder %v3285_v52, 1.0  ;;  %v3115_v46 = vld [vmem:[#allocation3 + $0x20] sm:$0xff] }
 0x47a   : > { %v3333_v13 = vmul.f32 %v3317_v58, %v3285_v52 }
 0x489   : > { %3235 = vrot.lane.b32.xlu1 %v8724_v26, %s4490_s5 }
 0x48c   : > { %v2792_v9 = vpop.xlane.xlu0 %2791 }
 0x48d   : > { %v2793_v50 = vcvt.f32.s32 %v2792_v9 }
 0x48f   : > { %v2796_v45 = vadd.s32 %v2795_v31, %v2793_v50  ;;  %v3430_v31 = vld [vmem:[#allocation2 + $0x10] sm:$0xff] }
 0x490   : > { %v3230_v18 = vpop.permute.xlu0 %3229 }
 0x491   : > { %vm2841_vm6 = vcmp.eq.s32.totalorder %v9950_v41, %v2796_v45  ;;  %vm2842_vm1 = vcmp.eq.s32.totalorder %v9805_v2, %v2796_v45  ;;  %v3268_v47 = vsub.f32 %v8597_v42, %v3230_v18  ;;  %v3365_v42 = vsel %vm3301_vm14, %v3333_v13, %v4078_v8  ;;  %v3114_v45 = vld [vmem:[#allocation3 + $0x18] sm:$0xff] }
 0x492   : > { %v3027_v43 = vsel %vm2841_vm6, %v2995_v19, 0.0  ;;  %v3028_v39 = vsel %vm2842_vm1, %v2996_v53, 0.0  ;;  %v3391_v61 = vsel %vm3371_vm9, %v3365_v42, 0.0  ;;  %v3116_v53 = vld [vmem:[#allocation3 + $0x28] sm:$0xff]  ;;  %vm10382_vm6 = vcmp.lt.s32.totalorder %v10381_v23, 200  ;;  %v10395_v42 = vld [vmem:[#allocation17_spill] sm:$0xff] }
 0x493   : > { %v3284_v1 = vand.u32 2147483647, %v3268_v47  ;;  %v3073_v38 = vadd.f32 %v3028_v39, %v3027_v43  ;;  %v10385_v47 = vld [vmem:[#allocation103_spill] sm:$0xff] }
 0x495   : > { %v3316_v4 = vmul.f32 0.5, %v3284_v1  ;;  %v4077_v57 = vadd.f32 -0.5, %v3284_v1  ;;  %3074 = vadd.xlane.f32.xlu0 %v3073_v38  ;;  %vm3300_vm8 = vcmp.lt.f32.partialorder %v3284_v1, 1.0  ;;  %v3118_v38 = vld [vmem:[#allocation3 + $0x38] sm:$0xff] }
 0x497   : > { %v3332_v35 = vmul.f32 %v3316_v4, %v3284_v1  ;;  %v3117_v1 = vld [vmem:[#allocation3 + $0x30] sm:$0xff] }
 0x499   : > { %v3364_v0 = vsel %vm3300_vm8, %v3332_v35, %v4077_v57  ;;  %vm10386_vm8 = vcmp.lt.s32.totalorder %v10385_v47, 200  ;;  %v10393_v57 = vmov 0.0  }
 0x49a   : > { %v3389_v51 = vsel %vm3371_vm9, %v3364_v0, 0.0 }
 0x49b   : > { %v3390_v36 = vadd.f32 %v3389_v51, %v8594_v24  ;;  %v2811_v24 = vshll.u32 %v2810_v21, 16  ;;  %v10366_v21 = vld [vmem:[#allocation85_spill] sm:$0xff] }
 0x49d   : > { %v8731_v17 = vadd.f32 %v3391_v61, %v3390_v36  ;;  %v3119_v36 = vld [vmem:[#allocation3 + $0x40] sm:$0xff] }
 0x4aa   : > { %v2808_v10 = vpop.xlane.xlu1 %2807 }
 0x4ab   : > { %3233 = vrot.lane.b32.xlu0 %v8734_v16, %s4490_s5  ;;  %v2809_v56 = vcvt.f32.s32 %v2808_v10  ;;  %v10367_v10 = vld [vmem:[#allocation54_spill] sm:$0xff] }
 0x4ad   : > { %v2812_v44 = vadd.s32 %v2811_v24, %v2809_v56  ;;  %v3120_v56 = vld [vmem:[#allocation3 + $0x48] sm:$0xff] }
 0x4af   : > { %3237 = vrot.lane.b32.xlu0 %v8739_v22, %s4490_s5  ;;  %vm2843_vm0 = vcmp.eq.s32.totalorder %v9950_v41, %v2812_v44  ;;  %vm2844_vm3 = vcmp.eq.s32.totalorder %v9805_v2, %v2812_v44 }
 0x4b0   : > { %v3029_v7 = vsel %vm2843_vm0, %v2997_v49, 0.0  ;;  %v3030_v28 = vsel %vm2844_vm3, %v2998_v12, 0.0  ;;  %v10370_v49 = vld [vmem:[#allocation16_spill] sm:$0xff]  ;;  %v3121_v12 = vld [vmem:[#allocation3 + $0x50] sm:$0xff] }
 0x4b1   : > { %v3076_v32 = vadd.f32 %v3030_v28, %v3029_v7  ;;  %v10372_v28 = vld [vmem:[#allocation12_spill] sm:$0xff] }
 0x4b3   : > { %3241 = vrot.lane.b32.xlu0 %v8745_v30, %s4490_s5  ;;  %3077 = vadd.xlane.f32.xlu1 %v3076_v32  ;;  %v10373_v32 = vld [vmem:[#allocation79_spill] sm:$0xff] }
 0x4c4   : > { %3239 = vrot.lane.b32.xlu1 %v8760_v6, %s4490_s5 }
 0x4c9   : > { %v3033_v60 = vpop.xlane.xlu0 %3032 }
 0x4ca   : > { %v3127_v33 = vsel %vm3095_vm7, %v3033_v60, %v3111_v54  ;;  %vm10368_vm7 = vcmp.gt.f32.partialorder %v10366_v21, %v10367_v10  ;;  %v3123_v60 = vld [vmem:[#allocation3 + $0x60] sm:$0xff] }
 0x4cb   : > { %3144 = vst.msk [vmem:[#allocation3] sm:$0xff] %vm182_vm15, %v3127_v33  ;;  %v10375_v33 = vld [vmem:[#allocation114_spill] sm:$0xff] }
 0x4cd   : > { %v3039_v15 = vpop.xlane.xlu0 %3038 }
 0x4ce   : > { %v3129_v29 = vsel %vm3097_vm10, %v3039_v15, %v3113_v5  ;;  %v10376_v5 = vld [vmem:[#allocation113_spill] sm:$0xff] }
 0x4cf   : > { %3146 = vst.msk [vmem:[#allocation3 + $0x10] sm:$0xff] %vm182_vm15, %v3129_v29  ;;  %vm10377_vm10 = vcmp.gt.f32.partialorder %v10375_v33, %v10376_v5 }
 0x4d1   : > { %v3045_v25 = vpop.xlane.xlu0 %3044 }
 0x4d2   : > { %v3131_v50 = vsel %vm3099_vm2, %v3045_v25, %v3115_v46  ;;  %v10379_v46 = vld [vmem:[#allocation65_spill] sm:$0xff]  ;;  %v8814_v25 = vld [vmem:[#allocation3] sm:$0xff]  ;;  %vm3445_vm2 = vcmp.gt.f32.partialorder %v3429_v37, 0.0 }
 0x4d3   : > { %v3036_v27 = vpop.xlane.xlu1 %3035  ;;  %3148 = vst.msk [vmem:[#allocation3 + $0x20] sm:$0xff] %vm182_vm15, %v3131_v50  ;;  %v3476_v52 = vmin.f32 %v8814_v25, 0.9999999  ;;  %vm8824_vm1 = vmand %vm3445_vm2, %vm10382_vm6  ;;  %v4084_v47 = vadd.f32 -0.9, %v8814_v25 }
 0x4d4   : > { %v3128_v9 = vsel %vm3096_vm12, %v3036_v27, %v3112_v34  ;;  %v10378_v34 = vld [vmem:[#allocation67_spill] sm:$0xff]  ;;  %v4117_v8 = vsel %vm8824_vm1, 1.0, %v10393_v57 }
 0x4d5   : > { %3145 = vst.msk [vmem:[#allocation3 + $0x8] sm:$0xff] %vm182_vm15, %v3128_v9  ;;  %vm10380_vm12 = vcmp.gt.f32.partialorder %v10378_v34, %v10379_v46  ;;  %v3428_v9 = vld [vmem:[#allocation2] sm:$0xff]  ;;  %v10406_v34 = vld [vmem:[#allocation40_spill] sm:$0xff] }
 0x4d6   : > { %v8818_v50 = vld [vmem:[#allocation3 + $0x10] sm:$0xff] }
 0x4d7   : > { %v3042_v18 = vpop.xlane.xlu1 %3041 }
 0x4d8   : > { %v3130_v11 = vsel %vm3098_vm5, %v3042_v18, %v3114_v45  ;;  %vm10371_vm5 = vcmp.gt.f32.partialorder %v10369_v40, %v10370_v49  ;;  %v10397_v49 = vld [vmem:[#allocation58_spill] sm:$0xff] }
 0x4d9   : > { %3147 = vst.msk [vmem:[#allocation3 + $0x18] sm:$0xff] %vm182_vm15, %v3130_v11  ;;  %v3556_v11 = vsub.f32 1.0, %v3476_v52 }
 0x4da   : > { %v8855_v10 = vld [vmem:[#allocation3 + $0x20] sm:$0xff] }
 0x4db   : > { %v3048_v58 = vpop.xlane.xlu1 %3047 }
 0x4dc   : > { %v3132_v39 = vsel %vm3100_vm4, %v3048_v58, %v3116_v53  ;;  %v3051_v13 = vpop.xlane.xlu0 %3050  ;;  %vm10374_vm4 = vcmp.gt.f32.partialorder %v10372_v28, %v10373_v32  ;;  %v8808_v29 = vld [vmem:[#allocation3 + $0x8] sm:$0xff]  ;;  %v3431_v58 = vld [vmem:[#allocation2 + $0x18] sm:$0xff]  ;;  %v3480_v28 = vmin.f32 %v8855_v10, 0.9999999 }
 0x4dd   : > { %3149 = vst.msk [vmem:[#allocation3 + $0x28] sm:$0xff] %vm182_vm15, %v3132_v39  ;;  %v3133_v35 = vsel %vm3101_vm13, %v3051_v13, %v3117_v1  ;;  %v3477_v20 = vmin.f32 %v8808_v29, 0.9999999  ;;  %vm3446_vm13 = vcmp.gt.f32.partialorder %v3430_v31, 0.0  ;;  %v3124_v53 = vld [vmem:[#allocation3 + $0x68] sm:$0xff]  ;;  %v10389_v1 = vld [vmem:[#allocation34_spill] sm:$0xff] }
 0x4de   : > { %3150 = vst.msk [vmem:[#allocation3 + $0x30] sm:$0xff] %vm182_vm15, %v3133_v35  ;;  %v3478_v39 = vmin.f32 %v8818_v50, 0.9999999  ;;  %vm10390_vm0 = vcmp.lt.s32.totalorder %v10389_v1, 200  ;;  %v10394_v35 = vld [vmem:[#allocation112_spill] sm:$0xff] }
 0x4df   : > { %v3054_v4 = vpop.xlane.xlu1 %3053  ;;  %v3557_v45 = vsub.f32 1.0, %v3477_v20  ;;  %vm8837_vm3 = vmand %vm3446_vm13, %vm10390_vm0  ;;  %v4085_v20 = vadd.f32 -0.9, %v8808_v29 }
 0x4e0   : > { %v3134_v51 = vsel %vm3102_vm11, %v3054_v4, %v3118_v38  ;;  %v3057_v61 = vpop.xlane.xlu0 %3056  ;;  %vm3444_vm11 = vcmp.gt.f32.partialorder %v3428_v9, 0.0  ;;  %v8820_v18 = vld [vmem:[#allocation3 + $0x18] sm:$0xff]  ;;  %v4118_v21 = vsel %vm8837_vm3, 1.0, %v10393_v57 }
 0x4e1   : > { %3151 = vst.msk [vmem:[#allocation3 + $0x38] sm:$0xff] %vm182_vm15, %v3134_v51  ;;  %v3135_v24 = vsel %vm10368_vm7, %v3057_v61, %v3119_v36  ;;  %vm8830_vm14 = vmand %vm3444_vm11, %vm10386_vm8  ;;  %4344 = vlog2.f32 %v3557_v45  ;;  %v3479_v4 = vmin.f32 %v8820_v18, 0.9999999  ;;  %vm10396_vm7 = vcmp.gt.f32.partialorder %v10394_v35, %v10395_v42  ;;  %v3432_v51 = vld [vmem:[#allocation2 + $0x20] sm:$0xff]  ;;  %v3125_v45 = vld [vmem:[#allocation3 + $0x70] sm:$0xff] }
 0x4e2   : > { %3152 = vst.msk [vmem:[#allocation3 + $0x40] sm:$0xff] %vm182_vm15, %v3135_v24  ;;  %4346 = vlog2.f32 %v3556_v11  ;;  %v3558_v36 = vsub.f32 1.0, %v3478_v39  ;;  %v4116_v61 = vsel %vm8830_vm14, 1.0, %v10393_v57  ;;  %v3725_v24 = vsel %vm182_vm15, %v4117_v8, 0.0  ;;  %v3435_v11 = vld [vmem:[#allocation2 + $0x38] sm:$0xff]  ;;  %v10410_v42 = vld [vmem:[#allocation96_spill] sm:$0xff] }
 0x4e3   : > { %v3060_v44 = vpop.xlane.xlu1 %3059  ;;  %vm10407_vm8 = vcmp.lt.s32.totalorder %v10406_v34, 200 }
 0x4e4   : > { %v3136_v62 = vsel %vm10371_vm5, %v3060_v44, %v3120_v56  ;;  %vm3447_vm5 = vcmp.gt.f32.partialorder %v3431_v58, 0.0  ;;  %v3433_v56 = vld [vmem:[#allocation2 + $0x28] sm:$0xff]  ;;  %v3559_v44 = vsub.f32 1.0, %v3479_v4  ;;  %4348 = vlog2.f32 %v3558_v36  ;;  %v10414_v36 = vld [vmem:[#allocation97_spill] sm:$0xff] }
 0x4e5   : > { %3153 = vst.msk [vmem:[#allocation3 + $0x48] sm:$0xff] %vm182_vm15, %v3136_v62  ;;  %v3063_v7 = vpop.xlane.xlu0 %3062  ;;  %v8858_v40 = vld [vmem:[#allocation3 + $0x28] sm:$0xff]  ;;  %vm3449_vm2 = vcmp.gt.f32.partialorder %v3433_v56, 0.0  ;;  %v8893_v9 = vld [vmem:[#allocation3 + $0x30] sm:$0xff] }
 0x4e6   : > { %v3137_v54 = vsel %vm10374_vm4, %v3063_v7, %v3121_v12  ;;  %vm3448_vm4 = vcmp.gt.f32.partialorder %v3432_v51, 0.0  ;;  %v3724_v12 = vsel %vm182_vm15, %v4116_v61, 0.0  ;;  %v3727_v7 = vsel %vm182_vm15, %v4118_v21, 0.0  ;;  %vm8883_vm0 = vmand %vm3449_vm2, %vm10407_vm8  ;;  %v10415_v61 = vld [vmem:[#allocation92_spill] sm:$0xff] }
 0x4e7   : > { %3154 = vst.msk [vmem:[#allocation3 + $0x50] sm:$0xff] %vm182_vm15, %v3137_v54  ;;  %v3726_v32 = vadd.f32 %v3725_v24, %v3724_v12  ;;  %v10401_v54 = vld [vmem:[#allocation119_spill] sm:$0xff]  ;;  %v3481_v33 = vmin.f32 %v8858_v40, 0.9999999  ;;  %4350 = vlog2.f32 %v3559_v44  ;;  %v4121_v1 = vsel %vm8883_vm0, 1.0, %v10393_v57 }
 0x4e8   : > { %vm10402_vm11 = vcmp.lt.s32.totalorder %v10401_v54, 200  ;;  %v8896_v23 = vld [vmem:[#allocation3 + $0x38] sm:$0xff]  ;;  %v3482_v51 = vmin.f32 %v8893_v9, 0.9999999  ;;  %vm10416_vm2 = vcmp.gt.f32.partialorder %v10414_v36, %v10415_v61  ;;  %v4086_v12 = vadd.f32 -0.9, %v8818_v50 }
 0x4e9   : > { %vm8871_vm13 = vmand %vm3448_vm4, %vm10402_vm11  ;;  %vm10411_vm4 = vcmp.lt.s32.totalorder %v10410_v42, 200  ;;  %v8926_v21 = vld [vmem:[#allocation3 + $0x40] sm:$0xff]  ;;  %vm3451_vm11 = vcmp.gt.f32.partialorder %v3435_v11, 0.0 }
 0x4ea   : > { %v4120_v37 = vsel %vm8871_vm13, 1.0, %v10393_v57 }
 0x4f4   : > { %v3069_v59 = vpop.xlane.xlu0 %3068 }
 0x4f5   : > { %v3139_v15 = vsel %vm10377_vm10, %v3069_v59, %v3123_v60  ;;  %vm10398_vm10 = vcmp.lt.s32.totalorder %v10397_v49, 200  ;;  %v3434_v59 = vld [vmem:[#allocation2 + $0x30] sm:$0xff]  ;;  %v3733_v49 = vsel %vm182_vm15, %v4121_v1, 0.0 }
 0x4f6   : > { %3156 = vst.msk [vmem:[#allocation3 + $0x60] sm:$0xff] %vm182_vm15, %v3139_v15  ;;  %v3728_v15 = vadd.f32 %v3727_v7, %v3726_v32  ;;  %v3524_v7 = vmul.f32 10.0, %v4084_v47  ;;  %v3526_v47 = vmul.f32 10.0, %v4086_v12 }
 0x4fa   : > { %v3066_v48 = vpop.xlane.xlu1 %3065 }
 0x4fb   : > { %v3138_v27 = vsel %vm10380_vm12, %v3066_v48, %v3122_v3  ;;  %vm8862_vm12 = vmand %vm3447_vm5, %vm10398_vm10  ;;  %v4345_v3 = vpop.eup %4344  ;;  %v10405_v48 = vld [vmem:[#allocation11_spill] sm:$0xff]  ;;  %vm3450_vm5 = vcmp.gt.f32.partialorder %v3434_v59, 0.0 }
 0x4fc   : > { %3155 = vst.msk [vmem:[#allocation3 + $0x58] sm:$0xff] %vm182_vm15, %v3138_v27  ;;  %v4119_v5 = vsel %vm8862_vm12, 1.0, %v10393_v57  ;;  %vm2123_vm6 = vcmp.lt.s32.totalorder %v9950_v41, %v10405_v48  ;;  %v3560_v27 = vsub.f32 1.0, %v3480_v28  ;;  %v4347_v52 = vpop.eup %4346  ;;  %v3575_v39 = vmul.f32 0.6931472, %v4345_v3  ;;  %vm8918_vm10 = vmand %vm3450_vm5, %vm10411_vm4  ;;  %v3436_v59 = vld [vmem:[#allocation2 + $0x40] sm:$0xff] }
 0x4fd   : > { %v3729_v31 = vsel %vm182_vm15, %v4119_v5, 0.0  ;;  %v8907_v8 = vsel %vm2123_vm6, %v8050_v55, 0.0  ;;  %v3573_v24 = vmul.f32 0.6931472, %v4347_v52  ;;  %v4349_v56 = vpop.eup %4348  ;;  %v4122_v32 = vsel %vm8918_vm10, 1.0, %v10393_v57 }
 0x4fe   : > { %v3730_v58 = vadd.f32 %v3729_v31, %v3728_v15  ;;  %4352 = vlog2.f32 %v3560_v27  ;;  %v3605_v28 = vsub.f32 0.0, %v3575_v39  ;;  %v4351_v54 = vpop.eup %4350  ;;  %v4087_v5 = vadd.f32 -0.9, %v8820_v18 }
 0x4ff   : > { %v3562_v15 = vsub.f32 1.0, %v3482_v51  ;;  %v3577_v27 = vmul.f32 0.6931472, %v4349_v56  ;;  %vm3493_vm6 = vcmp.gt.f32.partialorder %v8808_v29, 0.9  ;;  %vm3452_vm5 = vcmp.gt.f32.partialorder %v3436_v59, 0.0 }
 0x500   : > { %v4100_v39 = vadd.f32 2.3025851, %v3524_v7  ;;  %v3579_v1 = vmul.f32 0.6931472, %v4351_v54  ;;  %vm3492_vm4 = vcmp.gt.f32.partialorder %v8814_v25, 0.9 }
 0x501   : > { %v8951_v29 = vld [vmem:[#allocation3 + $0x48] sm:$0xff]  ;;  %v3527_v51 = vmul.f32 10.0, %v4087_v5  ;;  %v3606_v36 = vsub.f32 0.0, %v3577_v27  ;;  %v10422_v25 = vld [vmem:[#allocation99_spill] sm:$0xff]  ;;  %v10426_v27 = vld [vmem:[#allocation78_spill] sm:$0xff] }
 0x502   : > { %v3607_v12 = vsub.f32 0.0, %v3579_v1  ;;  %v3485_v19 = vmin.f32 %v8951_v29, 0.9999999  ;;  %v4090_v1 = vadd.f32 -0.9, %v8893_v9 }
 0x503   : > { %v4103_v54 = vadd.f32 2.3025851, %v3527_v51 }
 0x505   : > { %v3072_v13 = vpop.xlane.xlu1 %3071 }
 0x506   : > { %v3140_v0 = vsel %vm10396_vm7, %v3072_v13, %v3124_v53  ;;  %vm2124_vm7 = vcmp.lt.s32.totalorder %v9805_v2, %v10405_v48  ;;  %v3561_v53 = vsub.f32 1.0, %v3481_v33  ;;  %v3731_v13 = vsel %vm182_vm15, %v4120_v37, 0.0 }
 0x507   : > { %3157 = vst.msk [vmem:[#allocation3 + $0x68] sm:$0xff] %vm182_vm15, %v3140_v0  ;;  %v8913_v35 = vsel %vm2124_vm7, %v8054_v63, 0.0  ;;  %v3483_v2 = vmin.f32 %v8896_v23, 0.9999999  ;;  %v3525_v63 = vmul.f32 10.0, %v4085_v20  ;;  %v3732_v44 = vadd.f32 %v3731_v13, %v3730_v58  ;;  %v10417_v20 = vld [vmem:[#allocation18_spill] sm:$0xff] }
 0x508   : > { %4354 = vlog2.f32 %v3561_v53  ;;  %v3484_v33 = vmin.f32 %v8926_v21, 0.9999999  ;;  %v3604_v37 = vsub.f32 0.0, %v3573_v24  ;;  %v8939_v31 = vadd.f32 %v10417_v20, %v8907_v8  ;;  %v10418_v53 = vld [vmem:[#allocation69_spill] sm:$0xff]  ;;  %v4353_v61 = vpop.eup %4352 }
 0x509   : > { %v4101_v3 = vadd.f32 2.3025851, %v3525_v63  ;;  %v3563_v34 = vsub.f32 1.0, %v3483_v2  ;;  %v3734_v52 = vadd.f32 %v3733_v49, %v3732_v44  ;;  %vm10419_vm8 = vcmp.lt.s32.totalorder %v10418_v53, 200 }
 0x50a   : > { %vm8946_vm7 = vmand %vm3451_vm11, %vm10419_vm8  ;;  %v3564_v42 = vsub.f32 1.0, %v3484_v33  ;;  %4356 = vlog2.f32 %v3562_v15  ;;  %v3620_v11 = vsel %vm3492_vm4, %v4100_v39, %v3604_v37  ;;  %vm10423_vm11 = vcmp.lt.s32.totalorder %v10422_v25, 200  ;;  %v9001_v25 = vld [vmem:[#allocation3 + $0x58] sm:$0xff] }
 0x50b   : > { %v3621_v13 = vsel %vm3493_vm6, %v4101_v3, %v3605_v28  ;;  %4358 = vlog2.f32 %v3563_v34  ;;  %v4123_v63 = vsel %vm8946_vm7, 1.0, %v10393_v57  ;;  %vm8962_vm6 = vmand %vm3452_vm5, %vm10423_vm11  ;;  %v4089_v44 = vadd.f32 -0.9, %v8858_v40  ;;  %v3438_v34 = vld [vmem:[#allocation2 + $0x50] sm:$0xff] }
 0x50c   : > { %v3637_v2 = vsel %vm8824_vm1, %v3621_v13, 0.0  ;;  %v4102_v49 = vadd.f32 2.3025851, %v3526_v47  ;;  %vm3494_vm1 = vcmp.gt.f32.partialorder %v8818_v50, 0.9  ;;  %4360 = vlog2.f32 %v3564_v42 }
 0x50d   : > { %v3636_v28 = vsel %vm8830_vm14, %v3620_v11, 0.0  ;;  %v3581_v59 = vmul.f32 0.6931472, %v4353_v61  ;;  %v3653_v5 = vsel %vm182_vm15, %v3637_v2, 0.0  ;;  %vm3495_vm8 = vcmp.gt.f32.partialorder %v8820_v18, 0.9 }
 0x50e   : > { %v3622_v33 = vsel %vm3494_vm1, %v4102_v49, %v3606_v36  ;;  %v4124_v3 = vsel %vm8962_vm6, 1.0, %v10393_v57  ;;  %v3737_v50 = vsel %vm182_vm15, %v4123_v63, 0.0  ;;  %vm10427_vm5 = vcmp.lt.s32.totalorder %v10426_v27, 200 }
 0x50f   : > { %v3529_v37 = vmul.f32 10.0, %v4089_v44  ;;  %v3652_v18 = vsel %vm182_vm15, %v3636_v28, 0.0  ;;  %v3565_v53 = vsub.f32 1.0, %v3485_v19  ;;  %v3638_v47 = vsel %vm8837_vm3, %v3622_v33, 0.0 }
 0x510   : > { %v3654_v39 = vadd.f32 %v3653_v5, %v3652_v18  ;;  %v3608_v13 = vsub.f32 0.0, %v3581_v59  ;;  %v3739_v42 = vsel %vm182_vm15, %v4124_v3, 0.0  ;;  %vm3454_vm4 = vcmp.gt.f32.partialorder %v3438_v34, 0.0  ;;  %v10430_v5 = vld [vmem:[#allocation32_spill] sm:$0xff] }
 0x511   : > { %v4105_v2 = vadd.f32 2.3025851, %v3529_v37  ;;  %v4091_v44 = vadd.f32 -0.9, %v8896_v23  ;;  %4362 = vlog2.f32 %v3565_v53  ;;  %vm3497_vm3 = vcmp.gt.f32.partialorder %v8858_v40, 0.9  ;;  %v3236_v37 = vpop.permute.xlu1 %3235 }
 0x512   : > { %v4355_v7 = vpop.eup %4354  ;;  %vm10431_vm11 = vcmp.lt.s32.totalorder %v10430_v5, 200  ;;  %v4092_v3 = vadd.f32 -0.9, %v8926_v21 }
 0x513   : > { %v3583_v20 = vmul.f32 0.6931472, %v4355_v7  ;;  %vm9013_vm1 = vmand %vm3454_vm4, %vm10431_vm11 }
 0x514   : > { %v4357_v51 = vpop.eup %4356  ;;  %v9033_v60 = vsel %vm9013_vm1, 1.0, %v10393_v57 }
 0x515   : > { %v4359_v38 = vpop.eup %4358  ;;  %v3609_v63 = vsub.f32 0.0, %v3583_v20  ;;  %v3585_v7 = vmul.f32 0.6931472, %v4357_v51  ;;  %v9022_v20 = vld [vmem:[#allocation3 + $0x60] sm:$0xff]  ;;  %v4093_v51 = vadd.f32 -0.9, %v8951_v29 }
 0x516   : > { %v3587_v33 = vmul.f32 0.6931472, %v4359_v38 }
 0x517   : > { %v3610_v18 = vsub.f32 0.0, %v3585_v7 }
 0x522   : > { %v3075_v4 = vpop.xlane.xlu0 %3074 }
 0x523   : > { %v3141_v55 = vsel %vm10416_vm2, %v3075_v4, %v3125_v45  ;;  %v3735_v45 = vsel %vm182_vm15, %v4122_v32, 0.0  ;;  %v3437_v4 = vld [vmem:[#allocation2 + $0x48] sm:$0xff]  ;;  %v8971_v32 = vld [vmem:[#allocation3 + $0x50] sm:$0xff] }
 0x524   : > { %3158 = vst.msk [vmem:[#allocation3 + $0x70] sm:$0xff] %vm182_vm15, %v3141_v55  ;;  %v4088_v55 = vadd.f32 -0.9, %v8855_v10  ;;  %v3736_v24 = vadd.f32 %v3735_v45, %v3734_v52  ;;  %vm3453_vm2 = vcmp.gt.f32.partialorder %v3437_v4, 0.0  ;;  %v3623_v52 = vsel %vm3495_vm8, %v4103_v54, %v3607_v12  ;;  %v4361_v54 = vpop.eup %4360 }
 0x525   : > { %vm8982_vm14 = vmand %vm3453_vm2, %vm10427_vm5  ;;  %v3486_v45 = vmin.f32 %v8971_v32, 0.9999999  ;;  %vm3496_vm2 = vcmp.gt.f32.partialorder %v8855_v10, 0.9  ;;  %v3639_v36 = vsel %vm8862_vm12, %v3623_v52, 0.0  ;;  %v3530_v12 = vmul.f32 10.0, %v4090_v1 }
 0x526   : > { %v3528_v15 = vmul.f32 10.0, %v4088_v55  ;;  %v3738_v4 = vadd.f32 %v3737_v50, %v3736_v24  ;;  %v8998_v11 = vsel %vm8982_vm14, 1.0, %v10393_v57  ;;  %v3234_v61 = vpop.permute.xlu0 %3233  ;;  %v3655_v24 = vsel %vm182_vm15, %v3638_v47, 0.0  ;;  %v9026_v47 = vld [vmem:[#allocation3 + $0x68] sm:$0xff] }
 0x527   : > { %v3566_v49 = vsub.f32 1.0, %v3486_v45  ;;  %v3656_v62 = vadd.f32 %v3655_v24, %v3654_v39  ;;  %v3657_v28 = vsel %vm182_vm15, %v3639_v36, 0.0  ;;  %v3270_v59 = vsub.f32 %v8734_v16, %v3234_v61 }
 0x528   : > { %v4104_v55 = vadd.f32 2.3025851, %v3528_v15  ;;  %vm3498_vm12 = vcmp.gt.f32.partialorder %v8893_v9, 0.9  ;;  %v3487_v10 = vmin.f32 %v9001_v25, 0.9999999  ;;  %v3625_v50 = vsel %vm3497_vm3, %v4105_v2, %v3609_v63 }
 0x529   : > { %vm3499_vm8 = vcmp.gt.f32.partialorder %v8896_v23, 0.9  ;;  %v3531_v16 = vmul.f32 10.0, %v4091_v44  ;;  %4364 = vlog2.f32 %v3566_v49  ;;  %v3658_v27 = vadd.f32 %v3657_v28, %v3656_v62  ;;  %v4363_v62 = vpop.eup %4362 }
 0x52a   : > { %v3624_v19 = vsel %vm3496_vm2, %v4104_v55, %v3608_v13  ;;  %v4106_v34 = vadd.f32 2.3025851, %v3530_v12  ;;  %v3589_v52 = vmul.f32 0.6931472, %v4361_v54  ;;  %v9024_v45 = vadd.f32 %v3739_v42, %v3738_v4  ;;  %v3238_v13 = vpop.permute.xlu0 %3237 }
 0x52b   : > { %v3640_v40 = vsel %vm8871_vm13, %v3624_v19, 0.0  ;;  %v3286_v53 = vand.u32 2147483647, %v3270_v59  ;;  %v3611_v39 = vsub.f32 0.0, %v3587_v33  ;;  %v3641_v1 = vsel %vm8883_vm0, %v3625_v50, 0.0  ;;  %v9038_v61 = vld [vmem:[#allocation3 + $0x70] sm:$0xff] }
 0x52c   : > { %v3532_v36 = vmul.f32 10.0, %v4092_v3  ;;  %v3567_v38 = vsub.f32 1.0, %v3487_v10  ;;  %v3659_v4 = vsel %vm182_vm15, %v3640_v40, 0.0  ;;  %v3271_v42 = vsub.f32 %v8724_v26, %v3236_v37 }
 0x52d   : > { %v3488_v55 = vmin.f32 %v9022_v20, 0.9999999  ;;  %v4107_v46 = vadd.f32 2.3025851, %v3531_v16  ;;  %v3660_v2 = vadd.f32 %v3659_v4, %v3658_v27  ;;  %v3489_v63 = vmin.f32 %v9026_v47, 0.9999999 }
 0x52e   : > { %v3612_v24 = vsub.f32 0.0, %v3589_v52  ;;  %v3626_v44 = vsel %vm3498_vm12, %v4106_v34, %v3610_v18  ;;  %v3661_v49 = vsel %vm182_vm15, %v3641_v1, 0.0  ;;  %v3318_v12 = vmul.f32 0.5, %v3286_v53  ;;  %v3242_v19 = vpop.permute.xlu0 %3241 }
 0x52f   : > { %v3272_v7 = vsub.f32 %v8739_v22, %v3238_v13  ;;  %vm3500_vm13 = vcmp.gt.f32.partialorder %v8926_v21, 0.9  ;;  %v3627_v26 = vsel %vm3499_vm8, %v4107_v46, %v3611_v39  ;;  %v3490_v28 = vmin.f32 %v9038_v61, 0.9999999  ;;  %v3126_v13 = vld [vmem:[#allocation3 + $0x78] sm:$0xff] }
 0x530   : > { %v3533_v54 = vmul.f32 10.0, %v4093_v51  ;;  %v4108_v59 = vadd.f32 2.3025851, %v3532_v36  ;;  %4366 = vlog2.f32 %v3567_v38  ;;  %v3287_v33 = vand.u32 2147483647, %v3271_v42 }
 0x531   : > { %vm3501_vm0 = vcmp.gt.f32.partialorder %v8951_v29, 0.9  ;;  %v3568_v9 = vsub.f32 1.0, %v3488_v55  ;;  %v3642_v5 = vsel %vm8918_vm10, %v3626_v44, 0.0  ;;  %v3662_v10 = vadd.f32 %v3661_v49, %v3660_v2  ;;  %v9066_v44 = vld [vmem:[#allocation2 + $0x58] sm:$0xff] }
 0x532   : > { %v3569_v22 = vsub.f32 1.0, %v3489_v63  ;;  %v3591_v3 = vmul.f32 0.6931472, %v4363_v62  ;;  %v3628_v21 = vsel %vm3500_vm13, %v4108_v59, %v3612_v24  ;;  %v3643_v23 = vsel %vm8946_vm7, %v3627_v26, 0.0  ;;  %v10434_v63 = vld [vmem:[#allocation14_spill] sm:$0xff] }
 0x533   : > { %v4365_v50 = vpop.eup %4364  ;;  %v3334_v16 = vmul.f32 %v3318_v12, %v3286_v53  ;;  %v4079_v40 = vadd.f32 -0.5, %v3286_v53  ;;  %v3288_v27 = vand.u32 2147483647, %v3272_v7  ;;  %v3274_v37 = vsub.f32 %v8745_v30, %v3242_v19 }
 0x534   : > { %vm3302_vm5 = vcmp.lt.f32.partialorder %v3286_v53, 1.0  ;;  %v4094_v34 = vadd.f32 -0.9, %v8971_v32  ;;  %v3570_v52 = vsub.f32 1.0, %v3490_v28  ;;  %v3663_v0 = vsel %vm182_vm15, %v3642_v5, 0.0 }
 0x535   : > { %v3319_v18 = vmul.f32 0.5, %v3287_v33  ;;  %4368 = vlog2.f32 %v3568_v9  ;;  %v3664_v39 = vadd.f32 %v3663_v0, %v3662_v10  ;;  %v3665_v1 = vsel %vm182_vm15, %v3643_v23, 0.0 }
 0x536   : > { %v3593_v58 = vmul.f32 0.6931472, %v4365_v50  ;;  %4370 = vlog2.f32 %v3569_v22  ;;  %v3613_v51 = vsub.f32 0.0, %v3591_v3  ;;  %v3644_v36 = vsel %vm8962_vm6, %v3628_v21, 0.0 }
 0x537   : > { %v3366_v38 = vsel %vm3302_vm5, %v3334_v16, %v4079_v40  ;;  %v3320_v30 = vmul.f32 0.5, %v3288_v27  ;;  %v3290_v53 = vand.u32 2147483647, %v3274_v37  ;;  %v4109_v4 = vadd.f32 2.3025851, %v3533_v54 }
 0x538   : > { %vm3502_vm10 = vcmp.gt.f32.partialorder %v8971_v32, 0.9  ;;  %v4095_v55 = vadd.f32 -0.9, %v9001_v25  ;;  %v3534_v46 = vmul.f32 10.0, %v4094_v34  ;;  %4372 = vlog2.f32 %v3570_v52 }
 0x539   : > { %v3335_v2 = vmul.f32 %v3319_v18, %v3287_v33  ;;  %vm10435_vm7 = vcmp.gt.f32.partialorder %v8459_v14, %v10434_v63  ;;  %v3666_v56 = vadd.f32 %v3665_v1, %v3664_v39  ;;  %v3667_v49 = vsel %vm182_vm15, %v3644_v36, 0.0 }
 0x53a   : > { %v4367_v62 = vpop.eup %4366  ;;  %v3393_v12 = vsel %vm3371_vm9, %v3366_v38, 0.0  ;;  %v4096_v7 = vadd.f32 -0.9, %v9022_v20  ;;  %v3614_v26 = vsub.f32 0.0, %v3593_v58  ;;  %v3629_v19 = vsel %vm3501_vm0, %v4109_v4, %v3613_v51 }
 0x53b   : > { %v4080_v28 = vadd.f32 -0.5, %v3287_v33  ;;  %v3336_v54 = vmul.f32 %v3320_v30, %v3288_v27  ;;  %v4081_v14 = vadd.f32 -0.5, %v3288_v27  ;;  %v3322_v59 = vmul.f32 0.5, %v3290_v53 }
 0x53c   : > { %vm3303_vm6 = vcmp.lt.f32.partialorder %v3287_v33, 1.0  ;;  %vm3304_vm4 = vcmp.lt.f32.partialorder %v3288_v27, 1.0  ;;  %vm3455_vm2 = vcmp.gt.f32.partialorder %v9066_v44, 0.0  ;;  %v3535_v5 = vmul.f32 10.0, %v4095_v55 }
 0x53d   : > { %v4110_v10 = vadd.f32 2.3025851, %v3534_v46  ;;  %v3367_v22 = vsel %vm3303_vm6, %v3335_v2, %v4080_v28  ;;  %v3394_v21 = vadd.f32 %v3393_v12, %v8731_v17  ;;  %v3595_v23 = vmul.f32 0.6931472, %v4367_v62  ;;  %v3441_v28 = vld [vmem:[#allocation2 + $0x68] sm:$0xff] }
 0x53e   : > { %v3536_v50 = vmul.f32 10.0, %v4096_v7  ;;  %v3645_v16 = vsel %vm8982_vm14, %v3629_v19, 0.0  ;;  %v3668_v33 = vadd.f32 %v3667_v49, %v3666_v56  ;;  %v3338_v34 = vmul.f32 %v3322_v59, %v3290_v53  ;;  %v3440_v56 = vld [vmem:[#allocation2 + $0x60] sm:$0xff] }
 0x53f   : > { %v3630_v29 = vsel %vm3502_vm10, %v4110_v10, %v3614_v26  ;;  %v4369_v40 = vpop.eup %4368  ;;  %v4083_v52 = vadd.f32 -0.5, %v3290_v53  ;;  %v3368_v0 = vsel %vm3304_vm4, %v3336_v54, %v4081_v14  ;;  %vm3306_vm3 = vcmp.lt.f32.partialorder %v3290_v53, 1.0  ;;  %v10436_v54 = vld [vmem:[#allocation39_spill] sm:$0xff] }
 0x540   : > { %v3078_v42 = vpop.xlane.xlu1 %3077  ;;  %v4371_v18 = vpop.eup %4370  ;;  %v4097_v17 = vadd.f32 -0.9, %v9026_v47  ;;  %v4111_v39 = vadd.f32 2.3025851, %v3535_v5  ;;  %v3615_v43 = vsub.f32 0.0, %v3595_v23  ;;  %v3397_v36 = vsel %vm3371_vm9, %v3368_v0, 0.0 }
 0x541   : > { %v3142_v24 = vsel %vm10435_vm7, %v3078_v42, %v3126_v13  ;;  %v3597_v38 = vmul.f32 0.6931472, %v4369_v40  ;;  %v3370_v53 = vsel %vm3306_vm3, %v3338_v34, %v4083_v52  ;;  %v4098_v4 = vadd.f32 -0.9, %v9038_v61  ;;  %v3443_v0 = vld [vmem:[#allocation2 + $0x78] sm:$0xff] }
 0x542   : > { %3159 = vst.msk [vmem:[#allocation3 + $0x78] sm:$0xff] %vm182_vm15, %v3142_v24  ;;  %v4373_v51 = vpop.eup %4372  ;;  %v3599_v42 = vmul.f32 0.6931472, %v4371_v18  ;;  %vm3503_vm12 = vcmp.gt.f32.partialorder %v9001_v25, 0.9  ;;  %v3537_v55 = vmul.f32 10.0, %v4097_v17  ;;  %v3826_v52 = vadd.f32 %v8939_v31, %v8913_v35 }
 0x543   : > { %v3646_v2 = vsel %vm9013_vm1, %v3630_v29, 0.0  ;;  %v3601_v49 = vmul.f32 0.6931472, %v4373_v51  ;;  %v3631_v62 = vsel %vm3503_vm12, %v4111_v39, %v3615_v43  ;;  %v3401_v7 = vsel %vm3371_vm9, %v3370_v53, 0.0  ;;  %v10444_v18 = vld [vmem:[#allocation13_spill] sm:$0xff]  ;;  %v10448_v43 = vld [vmem:[#allocation70_spill] sm:$0xff] }
 0x544   : > { %v3240_v9 = vpop.permute.xlu1 %3239  ;;  %v3616_v26 = vsub.f32 0.0, %v3597_v38  ;;  %vm10437_vm11 = vcmp.lt.s32.totalorder %v10436_v54, 200  ;;  %v3538_v15 = vmul.f32 10.0, %v4098_v4  ;;  %v3617_v14 = vsub.f32 0.0, %v3599_v42 }
 0x545   : > { %v3273_v3 = vsub.f32 %v8760_v6, %v3240_v9  ;;  %v3395_v6 = vsel %vm3371_vm9, %v3367_v22, 0.0  ;;  %vm9098_vm8 = vmand %vm3455_vm2, %vm10437_vm11  ;;  %v3669_v59 = vsel %vm182_vm15, %v3645_v16, 0.0  ;;  %vm3456_vm1 = vcmp.gt.f32.partialorder %v3440_v56, 0.0  ;;  %v3442_v22 = vld [vmem:[#allocation2 + $0x70] sm:$0xff] }
 0x546   : > { %v3396_v13 = vadd.f32 %v3395_v6, %v3394_v21  ;;  %vm3504_vm13 = vcmp.gt.f32.partialorder %v9022_v20, 0.9  ;;  %v4112_v9 = vadd.f32 2.3025851, %v3536_v50  ;;  %v3647_v5 = vsel %vm9098_vm8, %v3631_v62, 0.0 }
 0x547   : > { %v3289_v37 = vand.u32 2147483647, %v3273_v3  ;;  %v4113_v3 = vadd.f32 2.3025851, %v3537_v55  ;;  %v3618_v21 = vsub.f32 0.0, %v3601_v49  ;;  %v3671_v44 = vsel %vm182_vm15, %v3646_v2, 0.0 }
 0x548   : > { %v3398_v24 = vadd.f32 %v3397_v36, %v3396_v13  ;;  %vm3505_vm0 = vcmp.gt.f32.partialorder %v9026_v47, 0.9  ;;  %v3632_v23 = vsel %vm3504_vm13, %v4112_v9, %v3616_v26  ;;  %v3670_v29 = vadd.f32 %v3669_v59, %v3668_v33 }
 0x549   : > { %v3321_v1 = vmul.f32 0.5, %v3289_v37  ;;  %v4082_v32 = vadd.f32 -0.5, %v3289_v37  ;;  %v9084_v58 = vld [vmem:[#allocation3 + $0x78] sm:$0xff]  ;;  %vm3305_vm14 = vcmp.lt.f32.partialorder %v3289_v37, 1.0  ;;  %v4114_v40 = vadd.f32 2.3025851, %v3538_v15 }
 0x54a   : > { %v3491_v27 = vmin.f32 %v9084_v58, 0.9999999  ;;  %v4099_v16 = vadd.f32 -0.9, %v9084_v58  ;;  %v3633_v20 = vsel %vm3505_vm0, %v4113_v3, %v3617_v14  ;;  %v3673_v50 = vsel %vm182_vm15, %v3647_v5, 0.0 }
 0x54b   : > { %v3337_v30 = vmul.f32 %v3321_v1, %v3289_v37  ;;  %vm3458_vm5 = vcmp.gt.f32.partialorder %v3442_v22, 0.0  ;;  %v10440_v37 = vld [vmem:[#allocation84_spill] sm:$0xff]  ;;  %vm3506_vm6 = vcmp.gt.f32.partialorder %v9038_v61, 0.9  ;;  %v3672_v47 = vadd.f32 %v3671_v44, %v3670_v29 }
 0x54c   : > { %v3571_v46 = vsub.f32 1.0, %v3491_v27  ;;  %vm10441_vm10 = vcmp.lt.s32.totalorder %v10440_v37, 200  ;;  %v4127_v33 = vsel %vm9098_vm8, 1.0, %v10393_v57  ;;  %vm10445_vm4 = vcmp.lt.s32.totalorder %v10444_v18, 200 }
 0x54d   : > { %v3369_v63 = vsel %vm3305_vm14, %v3337_v30, %v4082_v32  ;;  %vm9113_vm7 = vmand %vm3456_vm1, %vm10441_vm10  ;;  %v3634_v17 = vsel %vm3506_vm6, %v4114_v40, %v3618_v21  ;;  %v3741_v61 = vsel %vm182_vm15, %v8998_v11, 0.0  ;;  %v3743_v39 = vsel %vm182_vm15, %v9033_v60, 0.0 }
 0x54e   : > { %v3399_v12 = vsel %vm3371_vm9, %v3369_v63, 0.0  ;;  %4374 = vlog2.f32 %v3571_v46  ;;  %vm3457_vm9 = vcmp.gt.f32.partialorder %v3441_v28, 0.0  ;;  %v3648_v1 = vsel %vm9113_vm7, %v3632_v23, 0.0 }
 0x54f   : > { %v3400_v19 = vadd.f32 %v3399_v12, %v3398_v24  ;;  %vm9126_vm2 = vmand %vm3457_vm9, %vm10445_vm4  ;;  %v3674_v32 = vadd.f32 %v3673_v50, %v3672_v47  ;;  %v3742_v13 = vadd.f32 %v3741_v61, %v9024_v45  ;;  %vm10449_vm3 = vcmp.lt.s32.totalorder %v10448_v43, 200 }
 0x550   : > { %v3649_v31 = vsel %vm9126_vm2, %v3633_v20, 0.0  ;;  %vm9142_vm14 = vmand %vm3458_vm5, %vm10449_vm3  ;;  %v3539_v11 = vmul.f32 10.0, %v4099_v16  ;;  %v3745_v60 = vsel %vm182_vm15, %v4127_v33, 0.0  ;;  %vm3459_vm12 = vcmp.gt.f32.partialorder %v3443_v0, 0.0 }
 0x551   : > { %v3402_v10 = vadd.f32 %v3401_v7, %v3400_v19  ;;  %v3650_v27 = vsel %vm9142_vm14, %v3634_v17, 0.0  ;;  %v3744_v38 = vadd.f32 %v3743_v39, %v3742_v13  ;;  %v3675_v45 = vsel %vm182_vm15, %v3648_v1, 0.0 }
 0x552   : > { %v3677_v53 = vsel %vm182_vm15, %v3649_v31, 0.0  ;;  %v3676_v4 = vadd.f32 %v3675_v45, %v3674_v32  ;;  %v4128_v42 = vsel %vm9113_vm7, 1.0, %v10393_v57  ;;  %v4129_v55 = vsel %vm9126_vm2, 1.0, %v10393_v57 }
 0x553   : > { %3403 = vadd.xlane.f32.xlu1 %v3402_v10  ;;  %v3746_v46 = vadd.f32 %v3745_v60, %v3744_v38  ;;  %vm10452_vm11 = vcmp.lt.s32.totalorder %v10405_v48, 200  ;;  %v4115_v63 = vadd.f32 2.3025851, %v3539_v11  ;;  %v3679_v56 = vsel %vm182_vm15, %v3650_v27, 0.0  ;;  %v10455_v10 = vld [vmem:[#allocation68_spill] sm:$0xff] }
 0x554   : > { %vm9159_vm8 = vmand %vm3459_vm12, %vm10452_vm11  ;;  %vm3507_vm1 = vcmp.gt.f32.partialorder %v9084_v58, 0.9  ;;  %v3678_v49 = vadd.f32 %v3677_v53, %v3676_v4  ;;  %v4130_v62 = vsel %vm9142_vm14, 1.0, %v10393_v57  ;;  %v3747_v7 = vsel %vm182_vm15, %v4128_v42, 0.0 }
 0x555   : > { %v3749_v48 = vsel %vm182_vm15, %v4129_v55, 0.0  ;;  %vm2315_vm13 = vcmp.gt.f32.partialorder %v8907_v8, 0.0  ;;  %v4131_v58 = vsel %vm9159_vm8, 1.0, %v10393_v57  ;;  %v3748_v28 = vadd.f32 %v3747_v7, %v3746_v46 }
 0x556   : > { %v3680_v19 = vadd.f32 %v3679_v56, %v3678_v49  ;;  %v3751_v25 = vsel %vm182_vm15, %v4130_v62, 0.0  ;;  %v3753_v59 = vsel %vm182_vm15, %v4131_v58, 0.0  ;;  %v4065_v9 = vsel %vm2315_vm13, 1.0, %v10393_v57 }
 0x557   : > { %3827 = vadd.xlane.f32.xlu1 %v3826_v52  ;;  %v3750_v14 = vadd.f32 %v3749_v48, %v3748_v28  ;;  %vm2316_vm9 = vcmp.gt.f32.partialorder %v8913_v35, 0.0  ;;  %v3897_v22 = vadd.f32 %v4065_v9, %v10455_v10  ;;  %vm3908_vm0 = vcmp.eq.s32.totalorder %v9950_v41, 0 }
 0x558   : > { %v4375_v36 = vpop.eup %4374  ;;  %v4066_v3 = vsel %vm2316_vm9, 1.0, %v10393_v57  ;;  %vm3915_vm5 = vcmp.eq.s32.totalorder %v9950_v41, 2  ;;  %vm3919_vm10 = vcmp.eq.s32.totalorder %v9950_v41, 3  ;;  %vm3923_vm7 = vcmp.eq.s32.totalorder %v9950_v41, 4 }
 0x559   : > { %v3603_v30 = vmul.f32 0.6931472, %v4375_v36  ;;  %v3752_v8 = vadd.f32 %v3751_v25, %v3750_v14  ;;  %v3898_v21 = vadd.f32 %v4066_v3, %v3897_v22 }
 0x55b   : > { %v3619_v24 = vsub.f32 0.0, %v3603_v30  ;;  %v3754_v5 = vadd.f32 %v3753_v59, %v3752_v8 }
 0x55d   : > { %v3635_v12 = vsel %vm3507_vm1, %v4115_v63, %v3619_v24 }
 0x55e   : > { %v3651_v26 = vsel %vm9159_vm8, %v3635_v12, 0.0 }
 0x55f   : > { %v3681_v54 = vsel %vm182_vm15, %v3651_v26, 0.0  ;;  %vm3911_vm15 = vcmp.eq.s32.totalorder %v9950_v41, 1 }
 0x560   : > { %v3682_v15 = vadd.f32 %v3681_v54, %v3680_v19 }
 0x562   : > { %3683 = vadd.xlane.f32.xlu0 %v3682_v15 }
 0x566   : > { %3755 = vadd.xlane.f32.xlu0 %v3754_v5 }
 0x56a   : > { %3899 = vadd.xlane.f32.xlu0 %v3898_v21 }
 0x5e0   : > { %v3404_v44 = vpop.xlane.xlu1 %3403 }
 0x5e1   : > { %v3405_v23 = vrot.slane %v3404_v44, 4 }
 0x5e3   : > { %v3406_v29 = vadd.f32 %v3405_v23, %v3404_v44 }
 0x5e4   : > { %v3828_v20 = vpop.xlane.xlu1 %3827 }
 0x5e5   : > { %v3407_v16 = vrot.slane %v3406_v29, 2  ;;  %v3829_v37 = vrot.slane %v3828_v20, 4 }
 0x5e7   : > { %v3408_v40 = vadd.f32 %v3407_v16, %v3406_v29  ;;  %v3830_v47 = vadd.f32 %v3829_v37, %v3828_v20 }
 0x5e9   : > { %v3409_v50 = vrot.slane %v3408_v40, 1  ;;  %v3831_v0 = vrot.slane %v3830_v47, 2 }
 0x5eb   : > { %v3410_v34 = vadd.f32 %v3409_v50, %v3408_v40  ;;  %v3832_v39 = vadd.f32 %v3831_v0, %v3830_v47 }
 0x5ed   : > { %4136 = vpush %v3410_v34  ;;  %v3833_v60 = vrot.slane %v3832_v39, 1 }
 0x5ef   : > { %v3684_v33 = vpop.xlane.xlu0 %3683  ;;  %v3834_v45 = vadd.f32 %v3833_v60, %v3832_v39 }
 0x5f0   : > { %v3685_v35 = vrot.slane %v3684_v33, 4 }
 0x5f2   : > { %v3686_v52 = vadd.f32 %v3685_v35, %v3684_v33 }
 0x5f3   : > { %v3756_v18 = vpop.xlane.xlu0 %3755 }
 0x5f4   : > { %v3687_v6 = vrot.slane %v3686_v52, 2  ;;  %v3757_v57 = vrot.slane %v3756_v18, 4 }
 0x5f6   : > { %v3758_v17 = vadd.f32 %v3757_v57, %v3756_v18  ;;  %v3688_v61 = vadd.f32 %v3687_v6, %v3686_v52 }
 0x5f7   : > { %v3900_v1 = vpop.xlane.xlu0 %3899 }
 0x5f8   : > { %v3759_v31 = vrot.slane %v3758_v17, 2  ;;  %v3901_v32 = vrot.slane %v3900_v1, 4  ;;  %v3689_v13 = vrot.slane %v3688_v61, 1 }
 0x5fa   : > { %v3902_v43 = vadd.f32 %v3901_v32, %v3900_v1  ;;  %v3690_v51 = vadd.f32 %v3689_v13, %v3688_v61  ;;  %v3760_v11 = vadd.f32 %v3759_v31, %v3758_v17 }
 0x5fc   : > { %v3903_v36 = vrot.slane %v3902_v43, 2  ;;  %4138 = vpush %v3690_v51  ;;  %v3761_v27 = vrot.slane %v3760_v11, 1 }
 0x5fe   : > { %v3904_v38 = vadd.f32 %v3903_v36, %v3902_v43  ;;  %v3762_v30 = vadd.f32 %v3761_v27, %v3760_v11 }
 0x600   : > { %4140 = vpush %v3762_v30  ;;  %v3905_v53 = vrot.slane %v3904_v38, 1 }
 0x601   : > { %4142 = vpush %v3834_v45 }
 0x602   : > { %v3906_v4 = vadd.f32 %v3905_v53, %v3904_v38 }
 0x604   : > { %4144 = vpush %v3906_v4 }
 0x61e   : > { %s4137_s6 = spop %4136 }
 0x61f   : > { %v3909_v42 = vstv %s4137_s6 }
 0x620   : > { %v3910_v2 = vsel %vm3908_vm0, %v3909_v42, 0.0 }
 0x62d   : > { %s4139_s8 = spop %4138 }
 0x62e   : > { %v3912_v55 = vstv %s4139_s8 }
 0x62f   : > { %v3913_v46 = vsel %vm3911_vm15, %v3912_v55, 0.0 }
 0x630   : > { %v3914_v63 = vadd.f32 %v3913_v46, %v3910_v2 }
 0x631   : > { %s4141_s16 = spop %4140 }
 0x632   : > { %v3916_v24 = vstv %s4141_s16  ;;  %s4143_s18 = spop %4142 }
 0x633   : > { %v3917_v56 = vsel %vm3915_vm5, %v3916_v24, 0.0  ;;  %v3920_v49 = vstv %s4143_s18 }
 0x634   : > { %v3918_v62 = vadd.f32 %v3917_v56, %v3914_v63  ;;  %v3921_v12 = vsel %vm3919_vm10, %v3920_v49, 0.0 }
 0x635   : > { %s4145_s20 = spop %4144 }
 0x636   : > { %v3922_v7 = vadd.f32 %v3921_v12, %v3918_v62  ;;  %v3924_v48 = vstv %s4145_s20 }
 0x637   : > { %v3925_v26 = vsel %vm3923_vm7, %v3924_v48, 0.0 }
 0x638   : > { %v3926_v19 = vadd.f32 %v3925_v26, %v3922_v7 }
 0x63a   : > { %3927 = vst [vmem:[%s165_s23] sm:$0xff] %v3926_v19 }
 0x63b   : > { %4411 = shalt.err (!%p4408_p5)
}
 0x63c   : > { %s4412_s4 = scalar_lea.hbm %s9194_s27, 128  ;;  %s4416_s7 = scalar_lea.hbm %s9243_s2, 256 }
 0x63d   : > { %p4413_p6 = scmp.ne.s32.totalorder %s9194_s27, %s4412_s4  ;;  %p4417_p10 = scmp.lt.u32.totalorder %s9194_s27, %s9243_s2 }
 0x63e   : > { %p4418_p11 = scmp.lt.u32.totalorder %s4416_s7, %s4412_s4  ;;  %p4420_p13 = scmp.lt.u32.totalorder %s4412_s4, %s9194_s27 }
 0x63f   : > { %p4414_p7 = pnand %p4413_p6, %p4547_p4 }
 0x640   : > { %p4419_p12 = por %p4418_p11, %p4417_p10 }
 0x641   : > { %p4415_p9 = pneg %p4414_p7 }
 0x642   : > { %p4421_p0 = por %p4420_p13, %p4419_p12 }
 0x644   : > { %p4422_p1 = pnand %p4421_p0, %p4415_p9 }
 0x646   : > { %4425 = shalt.err (!%p4422_p1)
}
 0x647   : > { %4146 = dma.vmem_to_hbm [thread:$0]  (%p4547_p4), %s9196_s24, 128, %s9194_s27, %s3929_s28  }
 0x648 PF: > { %p4152_p2 = scmp.ge.s32.totalorder %s4476_s14, 2  ;;  %s3954_s16 = sand.u32 1, %s4456_s9  }
 0x649   : > { %s3955_s18 = scalar_lea.sflag [#allocation7], %s3954_s16 }
 0x64a   : > { %p4149_p3 = pnand %p4152_p2, %p4554_p8 }
 0x64c   : > { %4451 = dma.done.wait (!%p4149_p3), %s3955_s18, 128  }
 0x64d   : > { %4453 = vsyncadd (!%p4149_p3), %s3955_s18, 4294967168  ;;  %s15_s14 = sadd.s32 1, %s4476_s14   ;;  %s10456_s9 = smov %s4460_s10 }
 0x64e   : > { %p12_p5 = scmp.ge.s32.totalorder %s15_s14, 4   ;;  %s10457_s10 = smov %s4464_s11 }
 0x64f   : > { %s10458_s11 = smov %s4560_s22  ;;  %s10459_s12 = smov %s4472_s13 }
 0x650   : > { %s10460_s13 = smov %s10462_s17  ;;  %14 = sbr.rel (!%p12_p5) target bundleno = 4 (0x4), region = 74 }
 0x657   :  { %3960 = vsyncpa [#allocation7], 1 }
 0x658   :  { %3962 = vsyncpa [#allocation7 + $0x1], 1 }

</bundles_post_ra>
